<compile_context>
chip_gen: v7x
topology: tpu7x:2x2x1
jax: 0.10.0
libtpu: 0.0.40
codegen_flags: <defaults>
</compile_context>

<pallas_src>
import functools

import jax
import jax.numpy as jnp
from jax import lax
from jax.experimental import pallas as pl
from jax.experimental.pallas import tpu as pltpu

CHANNEL = 32
KSIZE = 5
PAD = 2


def _toeplitz_weight(w_oihw, W):
    """(Cout, Cin, 5, 5) -> (5, W*Cin, W*Cout) bf16 block-Toeplitz slabs.

    T[dy, xi*C + ci, xo*C + co] = w[co, ci, dy, xi - xo + PAD] (0 if out of range)
    so that   out[y, xo*C + co] = sum_dy  xpad_rows[y + dy] @ T[dy]
    implements the 'same'-padded 5x5 conv along W (H padding handled by the
    2 zero halo rows of the in-kernel scratch).
    """
    C = w_oihw.shape[1]
    w_hwio = jnp.transpose(w_oihw, (2, 3, 1, 0)).astype(jnp.float32)  # (dy,dx,ci,co)
    dx = jnp.arange(KSIZE)[:, None, None]
    xi = jnp.arange(W)[None, :, None]
    xo = jnp.arange(W)[None, None, :]
    sel = (xi == xo + dx - PAD).astype(jnp.float32)                   # (5, W, W)
    t = jnp.einsum('dio,ydcp->yicop', sel, w_hwio)                    # (5, W, C, W, C)
    return t.reshape(KSIZE, W * C, W * C).astype(jnp.bfloat16)


def resblock_kernel(x_ref, t1_ref, t2_ref, b1_ref, b2_ref, out_ref,
                    xpad_ref, mid_ref, *, H, Wc):
    # Zero only the 2-row halo strips, and only once: the interiors are fully
    # overwritten each step and the halo rows are never written again
    # (scratch persists across grid iterations).
    @pl.when(pl.program_id(0) == 0)
    def _init_halos():
        halo = jnp.zeros((PAD, Wc), jnp.float32)
        xpad_ref[:PAD, :] = halo
        xpad_ref[PAD + H:, :] = halo
        mid_ref[:PAD, :] = halo
        mid_ref[PAD + H:, :] = halo

    x = x_ref[0]                                    # (H, Wc) f32, lane-dense
    xpad_ref[PAD:PAD + H, :] = x                    # in-kernel H zero-padding

    # ---- conv20: 5 fat bf16 matmuls (H,512)@(512,512), f32 accumulation ----
    acc = jnp.zeros((H, Wc), jnp.float32)
    for dy in range(KSIZE):
        acc += jnp.dot(xpad_ref[dy:dy + H, :].astype(jnp.bfloat16),
                       t1_ref[dy],
                       preferred_element_type=jnp.float32)
    rs1 = jnp.maximum(acc + b1_ref[0, :][None, :], 0.0)
    mid_ref[PAD:PAD + H, :] = rs1                   # H-padded intermediate

    # ---- conv21 + bias + residual add --------------------------------------
    acc = jnp.zeros((H, Wc), jnp.float32)
    for dy in range(KSIZE):
        acc += jnp.dot(mid_ref[dy:dy + H, :].astype(jnp.bfloat16),
                       t2_ref[dy],
                       preferred_element_type=jnp.float32)
    out_ref[0] = x + acc + b2_ref[0, :][None, :]


def resblock_pallas(x_nchw, w1, b1, w2, b2):
    """x_nchw: (N, C, H, W) f32; w*: (Cout, Cin, 5, 5); b*: (Cout,)."""
    N, C, H, W = x_nchw.shape
    assert C == CHANNEL
    Wc = W * C

    # Glue: NCHW -> lane-dense (N, H, W*C); block-Toeplitz bf16 weight slabs;
    # per-lane-tiled biases.  No spatial jnp.pad in HBM.
    x = jnp.transpose(x_nchw, (0, 2, 3, 1)).reshape(N, H, Wc).astype(jnp.float32)
    t1 = _toeplitz_weight(w1, W)                    # (5, Wc, Wc) bf16
    t2 = _toeplitz_weight(w2, W)
    b1_t = jnp.tile(b1.astype(jnp.float32), W).reshape(1, Wc)
    b2_t = jnp.tile(b2.astype(jnp.float32), W).reshape(1, Wc)

    kernel = functools.partial(resblock_kernel, H=H, Wc=Wc)

    out = pl.pallas_call(
        kernel,
        out_shape=jax.ShapeDtypeStruct((N, H, Wc), jnp.float32),
        grid_spec=pltpu.PrefetchScalarGridSpec(
            num_scalar_prefetch=0,
            grid=(N,),
            in_specs=[
                pl.BlockSpec((1, H, Wc), lambda n: (n, 0, 0)),          # x
                pl.BlockSpec((KSIZE, Wc, Wc), lambda n: (0, 0, 0)),     # T1
                pl.BlockSpec((KSIZE, Wc, Wc), lambda n: (0, 0, 0)),     # T2
                pl.BlockSpec((1, Wc), lambda n: (0, 0)),                # b1
                pl.BlockSpec((1, Wc), lambda n: (0, 0)),                # b2
            ],
            out_specs=pl.BlockSpec((1, H, Wc), lambda n: (n, 0, 0)),
            scratch_shapes=[
                pltpu.VMEM((H + 2 * PAD, Wc), jnp.float32),   # H-padded x
                pltpu.VMEM((H + 2 * PAD, Wc), jnp.float32),   # H-padded mid
            ],
        ),
        compiler_params=pltpu.CompilerParams(
            dimension_semantics=("parallel",),
            vmem_limit_bytes=32 * 1024 * 1024,
        ),
    )(x, t1, t2, b1_t, b2_t)

    # Back to PyTorch's NCHW convention.
    return jnp.transpose(out.reshape(N, H, W, C), (0, 3, 1, 2))


def resblock_reference(x_nchw, w1, b1, w2, b2):
    """Pure-JAX f32 reference matching nn.Conv2d(NCHW, OIHW) semantics."""
    dn = lax.conv_dimension_numbers(x_nchw.shape, w1.shape,
                                    ("NCHW", "OIHW", "NCHW"))
    c1 = lax.conv_general_dilated(x_nchw, w1, (1, 1), ((PAD, PAD), (PAD, PAD)),
                                  dimension_numbers=dn)
    c1 = jnp.maximum(c1 + b1[None, :, None, None], 0.0)
    c2 = lax.conv_general_dilated(c1, w2, (1, 1), ((PAD, PAD), (PAD, PAD)),
                                  dimension_numbers=dn)
    c2 = c2 + b2[None, :, None, None]
    return x_nchw + c2


if __name__ == "__main__":
    key = jax.random.PRNGKey(0)
    k_x, k_w1, k_b1, k_w2, k_b2 = jax.random.split(key, 5)

    N, C, H, W = 2, CHANNEL, 16, 16
    x = jax.random.normal(k_x, (N, C, H, W), jnp.float32)

    # Deterministic synthetic parameters (shapes from nn.Conv2d(32,32,5,1,2)).
    fan_in = C * KSIZE * KSIZE
    bound = 1.0 / (fan_in ** 0.5)
    w1 = jax.random.uniform(k_w1, (C, C, KSIZE, KSIZE), jnp.float32, -bound, bound)
    b1 = jax.random.uniform(k_b1, (C,), jnp.float32, -bound, bound)
    w2 = jax.random.uniform(k_w2, (C, C, KSIZE, KSIZE), jnp.float32, -bound, bound)
    b2 = jax.random.uniform(k_b2, (C,), jnp.float32, -bound, bound)

    out = jax.block_until_ready(resblock_pallas(x, w1, b1, w2, b2))
    ref = jax.block_until_ready(resblock_reference(x, w1, b1, w2, b2))

    assert out.shape == (N, C, H, W)
    # bf16 MXU operands with f32 accumulation -> tolerance loosened from 1e-4.
    assert jnp.allclose(out, ref, atol=5e-2, rtol=5e-2), (
        f"max abs err {jnp.max(jnp.abs(out - ref))}")

    print("KERNEL_OK")
</pallas_src>

<mosaic_0001>
module attributes {stable_mosaic.version = 11 : i64} {
  func.func @resblock_kernel(%arg0: i32, %arg1: memref<1x16x512xf32, #tpu.memory_space<vmem>>, %arg2: memref<5x512x512xbf16, #tpu.memory_space<vmem>>, %arg3: memref<5x512x512xbf16, #tpu.memory_space<vmem>>, %arg4: memref<1x512xf32, #tpu.memory_space<vmem>>, %arg5: memref<1x512xf32, #tpu.memory_space<vmem>>, %arg6: memref<1x16x512xf32, #tpu.memory_space<vmem>>, %arg7: memref<20x512xf32, #tpu.memory_space<vmem>>, %arg8: memref<20x512xf32, #tpu.memory_space<vmem>>) attributes {dimension_semantics = [#tpu.dimension_semantics<parallel>], iteration_bounds = array<i64: 2>, scalar_prefetch = 0 : i64, scratch_operands = 2 : i64, tpu.core_type = #tpu.core_type<tc>, window_params = [{transform_indices = @transform_0, window_bounds = array<i64: 1, 16, 512>}, {pipeline_mode = #tpu.pipeline_mode<synchronous>, transform_indices = @transform_1, window_bounds = array<i64: 5, 512, 512>}, {pipeline_mode = #tpu.pipeline_mode<synchronous>, transform_indices = @transform_2, window_bounds = array<i64: 5, 512, 512>}, {pipeline_mode = #tpu.pipeline_mode<synchronous>, transform_indices = @transform_3, window_bounds = array<i64: 1, 512>}, {pipeline_mode = #tpu.pipeline_mode<synchronous>, transform_indices = @transform_4, window_bounds = array<i64: 1, 512>}, {transform_indices = @transform_5, window_bounds = array<i64: 1, 16, 512>}]} {
    %c0_i32 = arith.constant 0 : i32
    %0 = arith.cmpi eq, %arg0, %c0_i32 : i32
    %1 = arith.extui %0 : i1 to i32
    %c0_i32_0 = arith.constant 0 : i32
    %2 = arith.cmpi ne, %1, %c0_i32_0 : i32
    scf.if %2 {
      %cst_72 = arith.constant 0.000000e+00 : f32
      %85 = vector.broadcast %cst_72 : f32 to vector<2x512xf32>
      %c0_73 = arith.constant 0 : index
      %c0_74 = arith.constant 0 : index
      %86 = vector.load %arg7[%c0_73, %c0_74] : memref<20x512xf32, #tpu.memory_space<vmem>>, vector<2x512xf32>
      tpu.vector_store %arg7[%c0_73, %c0_74], %85 {strides = array<i32>} : memref<20x512xf32, #tpu.memory_space<vmem>>, vector<2x512xf32>,
      %c18 = arith.constant 18 : index
      %c0_75 = arith.constant 0 : index
      %87 = vector.load %arg7[%c18, %c0_75] : memref<20x512xf32, #tpu.memory_space<vmem>>, vector<2x512xf32>
      tpu.vector_store %arg7[%c18, %c0_75], %85 {strides = array<i32>} : memref<20x512xf32, #tpu.memory_space<vmem>>, vector<2x512xf32>,
      %c0_76 = arith.constant 0 : index
      %c0_77 = arith.constant 0 : index
      %88 = vector.load %arg8[%c0_76, %c0_77] : memref<20x512xf32, #tpu.memory_space<vmem>>, vector<2x512xf32>
      tpu.vector_store %arg8[%c0_76, %c0_77], %85 {strides = array<i32>} : memref<20x512xf32, #tpu.memory_space<vmem>>, vector<2x512xf32>,
      %c18_78 = arith.constant 18 : index
      %c0_79 = arith.constant 0 : index
      %89 = vector.load %arg8[%c18_78, %c0_79] : memref<20x512xf32, #tpu.memory_space<vmem>>, vector<2x512xf32>
      tpu.vector_store %arg8[%c18_78, %c0_79], %85 {strides = array<i32>} : memref<20x512xf32, #tpu.memory_space<vmem>>, vector<2x512xf32>,
    } else {
    }
    %c0 = arith.constant 0 : index
    %c0_1 = arith.constant 0 : index
    %c0_2 = arith.constant 0 : index
    %3 = vector.load %arg1[%c0, %c0_1, %c0_2] : memref<1x16x512xf32, #tpu.memory_space<vmem>>, vector<1x16x512xf32>
    %4 = vector.shape_cast %3 : vector<1x16x512xf32> to vector<16x512xf32>
    %c2 = arith.constant 2 : index
    %c0_3 = arith.constant 0 : index
    %5 = vector.load %arg7[%c2, %c0_3] : memref<20x512xf32, #tpu.memory_space<vmem>>, vector<16x512xf32>
    tpu.vector_store %arg7[%c2, %c0_3], %4 {strides = array<i32>} : memref<20x512xf32, #tpu.memory_space<vmem>>, vector<16x512xf32>,
    %cst = arith.constant 0.000000e+00 : f32
    %6 = vector.broadcast %cst : f32 to vector<16x512xf32>
    %c0_4 = arith.constant 0 : index
    %c0_5 = arith.constant 0 : index
    %7 = vector.load %arg7[%c0_4, %c0_5] : memref<20x512xf32, #tpu.memory_space<vmem>>, vector<16x512xf32>
    %8 = arith.truncf %7 : vector<16x512xf32> to vector<16x512xbf16>
    %c0_6 = arith.constant 0 : index
    %c0_7 = arith.constant 0 : index
    %c0_8 = arith.constant 0 : index
    %9 = vector.load %arg2[%c0_6, %c0_7, %c0_8] : memref<5x512x512xbf16, #tpu.memory_space<vmem>>, vector<1x512x512xbf16>
    %10 = vector.shape_cast %9 : vector<1x512x512xbf16> to vector<512x512xbf16>
    %cst_9 = arith.constant dense<0.000000e+00> : vector<16x512xf32>
    %11 = tpu.matmul %8, %10, %cst_9 {dimension_numbers = #tpu.dot_dimension_numbers<[1], [0], [0], [1], [0, 0, 1, 1], [], []>} : vector<16x512xbf16>, vector<512x512xbf16>, vector<16x512xf32> -> vector<16x512xf32>
    %12 = arith.addf %6, %11 : vector<16x512xf32>
    %c1 = arith.constant 1 : index
    %c0_10 = arith.constant 0 : index
    %13 = vector.load %arg7[%c1, %c0_10] : memref<20x512xf32, #tpu.memory_space<vmem>>, vector<16x512xf32>
    %14 = arith.truncf %13 : vector<16x512xf32> to vector<16x512xbf16>
    %c1_11 = arith.constant 1 : index
    %c0_12 = arith.constant 0 : index
    %c0_13 = arith.constant 0 : index
    %15 = vector.load %arg2[%c1_11, %c0_12, %c0_13] : memref<5x512x512xbf16, #tpu.memory_space<vmem>>, vector<1x512x512xbf16>
    %16 = vector.shape_cast %15 : vector<1x512x512xbf16> to vector<512x512xbf16>
    %cst_14 = arith.constant dense<0.000000e+00> : vector<16x512xf32>
    %17 = tpu.matmul %14, %16, %cst_14 {dimension_numbers = #tpu.dot_dimension_numbers<[1], [0], [0], [1], [0, 0, 1, 1], [], []>} : vector<16x512xbf16>, vector<512x512xbf16>, vector<16x512xf32> -> vector<16x512xf32>
    %18 = arith.addf %12, %17 : vector<16x512xf32>
    %c2_15 = arith.constant 2 : index
    %c0_16 = arith.constant 0 : index
    %19 = vector.load %arg7[%c2_15, %c0_16] : memref<20x512xf32, #tpu.memory_space<vmem>>, vector<16x512xf32>
    %20 = arith.truncf %19 : vector<16x512xf32> to vector<16x512xbf16>
    %c2_17 = arith.constant 2 : index
    %c0_18 = arith.constant 0 : index
    %c0_19 = arith.constant 0 : index
    %21 = vector.load %arg2[%c2_17, %c0_18, %c0_19] : memref<5x512x512xbf16, #tpu.memory_space<vmem>>, vector<1x512x512xbf16>
    %22 = vector.shape_cast %21 : vector<1x512x512xbf16> to vector<512x512xbf16>
    %cst_20 = arith.constant dense<0.000000e+00> : vector<16x512xf32>
    %23 = tpu.matmul %20, %22, %cst_20 {dimension_numbers = #tpu.dot_dimension_numbers<[1], [0], [0], [1], [0, 0, 1, 1], [], []>} : vector<16x512xbf16>, vector<512x512xbf16>, vector<16x512xf32> -> vector<16x512xf32>
    %24 = arith.addf %18, %23 : vector<16x512xf32>
    %c3 = arith.constant 3 : index
    %c0_21 = arith.constant 0 : index
    %25 = vector.load %arg7[%c3, %c0_21] : memref<20x512xf32, #tpu.memory_space<vmem>>, vector<16x512xf32>
    %26 = arith.truncf %25 : vector<16x512xf32> to vector<16x512xbf16>
    %c3_22 = arith.constant 3 : index
    %c0_23 = arith.constant 0 : index
    %c0_24 = arith.constant 0 : index
    %27 = vector.load %arg2[%c3_22, %c0_23, %c0_24] : memref<5x512x512xbf16, #tpu.memory_space<vmem>>, vector<1x512x512xbf16>
    %28 = vector.shape_cast %27 : vector<1x512x512xbf16> to vector<512x512xbf16>
    %cst_25 = arith.constant dense<0.000000e+00> : vector<16x512xf32>
    %29 = tpu.matmul %26, %28, %cst_25 {dimension_numbers = #tpu.dot_dimension_numbers<[1], [0], [0], [1], [0, 0, 1, 1], [], []>} : vector<16x512xbf16>, vector<512x512xbf16>, vector<16x512xf32> -> vector<16x512xf32>
    %30 = arith.addf %24, %29 : vector<16x512xf32>
    %c4 = arith.constant 4 : index
    %c0_26 = arith.constant 0 : index
    %31 = vector.load %arg7[%c4, %c0_26] : memref<20x512xf32, #tpu.memory_space<vmem>>, vector<16x512xf32>
    %32 = arith.truncf %31 : vector<16x512xf32> to vector<16x512xbf16>
    %c4_27 = arith.constant 4 : index
    %c0_28 = arith.constant 0 : index
    %c0_29 = arith.constant 0 : index
    %33 = vector.load %arg2[%c4_27, %c0_28, %c0_29] : memref<5x512x512xbf16, #tpu.memory_space<vmem>>, vector<1x512x512xbf16>
    %34 = vector.shape_cast %33 : vector<1x512x512xbf16> to vector<512x512xbf16>
    %cst_30 = arith.constant dense<0.000000e+00> : vector<16x512xf32>
    %35 = tpu.matmul %32, %34, %cst_30 {dimension_numbers = #tpu.dot_dimension_numbers<[1], [0], [0], [1], [0, 0, 1, 1], [], []>} : vector<16x512xbf16>, vector<512x512xbf16>, vector<16x512xf32> -> vector<16x512xf32>
    %36 = arith.addf %30, %35 : vector<16x512xf32>
    %c0_31 = arith.constant 0 : index
    %c0_32 = arith.constant 0 : index
    %37 = vector.load %arg4[%c0_31, %c0_32] : memref<1x512xf32, #tpu.memory_space<vmem>>, vector<1x512xf32>
    %38 = vector.shape_cast %37 : vector<1x512xf32> to vector<512xf32>
    %39 = vector.shape_cast %38 : vector<512xf32> to vector<1x512xf32>
    %40 = vector.broadcast %39 : vector<1x512xf32> to vector<16x512xf32>
    %41 = arith.addf %36, %40 : vector<16x512xf32>
    %cst_33 = arith.constant 0.000000e+00 : f32
    %42 = vector.broadcast %cst_33 : f32 to vector<16x512xf32>
    %43 = arith.maximumf %41, %42 : vector<16x512xf32>
    %c2_34 = arith.constant 2 : index
    %c0_35 = arith.constant 0 : index
    %44 = vector.load %arg8[%c2_34, %c0_35] : memref<20x512xf32, #tpu.memory_space<vmem>>, vector<16x512xf32>
    tpu.vector_store %arg8[%c2_34, %c0_35], %43 {strides = array<i32>} : memref<20x512xf32, #tpu.memory_space<vmem>>, vector<16x512xf32>,
    %cst_36 = arith.constant 0.000000e+00 : f32
    %45 = vector.broadcast %cst_36 : f32 to vector<16x512xf32>
    %c0_37 = arith.constant 0 : index
    %c0_38 = arith.constant 0 : index
    %46 = vector.load %arg8[%c0_37, %c0_38] : memref<20x512xf32, #tpu.memory_space<vmem>>, vector<16x512xf32>
    %47 = arith.truncf %46 : vector<16x512xf32> to vector<16x512xbf16>
    %c0_39 = arith.constant 0 : index
    %c0_40 = arith.constant 0 : index
    %c0_41 = arith.constant 0 : index
    %48 = vector.load %arg3[%c0_39, %c0_40, %c0_41] : memref<5x512x512xbf16, #tpu.memory_space<vmem>>, vector<1x512x512xbf16>
    %49 = vector.shape_cast %48 : vector<1x512x512xbf16> to vector<512x512xbf16>
    %cst_42 = arith.constant dense<0.000000e+00> : vector<16x512xf32>
    %50 = tpu.matmul %47, %49, %cst_42 {dimension_numbers = #tpu.dot_dimension_numbers<[1], [0], [0], [1], [0, 0, 1, 1], [], []>} : vector<16x512xbf16>, vector<512x512xbf16>, vector<16x512xf32> -> vector<16x512xf32>
    %51 = arith.addf %45, %50 : vector<16x512xf32>
    %c1_43 = arith.constant 1 : index
    %c0_44 = arith.constant 0 : index
    %52 = vector.load %arg8[%c1_43, %c0_44] : memref<20x512xf32, #tpu.memory_space<vmem>>, vector<16x512xf32>
    %53 = arith.truncf %52 : vector<16x512xf32> to vector<16x512xbf16>
    %c1_45 = arith.constant 1 : index
    %c0_46 = arith.constant 0 : index
    %c0_47 = arith.constant 0 : index
    %54 = vector.load %arg3[%c1_45, %c0_46, %c0_47] : memref<5x512x512xbf16, #tpu.memory_space<vmem>>, vector<1x512x512xbf16>
    %55 = vector.shape_cast %54 : vector<1x512x512xbf16> to vector<512x512xbf16>
    %cst_48 = arith.constant dense<0.000000e+00> : vector<16x512xf32>
    %56 = tpu.matmul %53, %55, %cst_48 {dimension_numbers = #tpu.dot_dimension_numbers<[1], [0], [0], [1], [0, 0, 1, 1], [], []>} : vector<16x512xbf16>, vector<512x512xbf16>, vector<16x512xf32> -> vector<16x512xf32>
    %57 = arith.addf %51, %56 : vector<16x512xf32>
    %c2_49 = arith.constant 2 : index
    %c0_50 = arith.constant 0 : index
    %58 = vector.load %arg8[%c2_49, %c0_50] : memref<20x512xf32, #tpu.memory_space<vmem>>, vector<16x512xf32>
    %59 = arith.truncf %58 : vector<16x512xf32> to vector<16x512xbf16>
    %c2_51 = arith.constant 2 : index
    %c0_52 = arith.constant 0 : index
    %c0_53 = arith.constant 0 : index
    %60 = vector.load %arg3[%c2_51, %c0_52, %c0_53] : memref<5x512x512xbf16, #tpu.memory_space<vmem>>, vector<1x512x512xbf16>
    %61 = vector.shape_cast %60 : vector<1x512x512xbf16> to vector<512x512xbf16>
    %cst_54 = arith.constant dense<0.000000e+00> : vector<16x512xf32>
    %62 = tpu.matmul %59, %61, %cst_54 {dimension_numbers = #tpu.dot_dimension_numbers<[1], [0], [0], [1], [0, 0, 1, 1], [], []>} : vector<16x512xbf16>, vector<512x512xbf16>, vector<16x512xf32> -> vector<16x512xf32>
    %63 = arith.addf %57, %62 : vector<16x512xf32>
    %c3_55 = arith.constant 3 : index
    %c0_56 = arith.constant 0 : index
    %64 = vector.load %arg8[%c3_55, %c0_56] : memref<20x512xf32, #tpu.memory_space<vmem>>, vector<16x512xf32>
    %65 = arith.truncf %64 : vector<16x512xf32> to vector<16x512xbf16>
    %c3_57 = arith.constant 3 : index
    %c0_58 = arith.constant 0 : index
    %c0_59 = arith.constant 0 : index
    %66 = vector.load %arg3[%c3_57, %c0_58, %c0_59] : memref<5x512x512xbf16, #tpu.memory_space<vmem>>, vector<1x512x512xbf16>
    %67 = vector.shape_cast %66 : vector<1x512x512xbf16> to vector<512x512xbf16>
    %cst_60 = arith.constant dense<0.000000e+00> : vector<16x512xf32>
    %68 = tpu.matmul %65, %67, %cst_60 {dimension_numbers = #tpu.dot_dimension_numbers<[1], [0], [0], [1], [0, 0, 1, 1], [], []>} : vector<16x512xbf16>, vector<512x512xbf16>, vector<16x512xf32> -> vector<16x512xf32>
    %69 = arith.addf %63, %68 : vector<16x512xf32>
    %c4_61 = arith.constant 4 : index
    %c0_62 = arith.constant 0 : index
    %70 = vector.load %arg8[%c4_61, %c0_62] : memref<20x512xf32, #tpu.memory_space<vmem>>, vector<16x512xf32>
    %71 = arith.truncf %70 : vector<16x512xf32> to vector<16x512xbf16>
    %c4_63 = arith.constant 4 : index
    %c0_64 = arith.constant 0 : index
    %c0_65 = arith.constant 0 : index
    %72 = vector.load %arg3[%c4_63, %c0_64, %c0_65] : memref<5x512x512xbf16, #tpu.memory_space<vmem>>, vector<1x512x512xbf16>
    %73 = vector.shape_cast %72 : vector<1x512x512xbf16> to vector<512x512xbf16>
    %cst_66 = arith.constant dense<0.000000e+00> : vector<16x512xf32>
    %74 = tpu.matmul %71, %73, %cst_66 {dimension_numbers = #tpu.dot_dimension_numbers<[1], [0], [0], [1], [0, 0, 1, 1], [], []>} : vector<16x512xbf16>, vector<512x512xbf16>, vector<16x512xf32> -> vector<16x512xf32>
    %75 = arith.addf %69, %74 : vector<16x512xf32>
    %76 = arith.addf %4, %75 : vector<16x512xf32>
    %c0_67 = arith.constant 0 : index
    %c0_68 = arith.constant 0 : index
    %77 = vector.load %arg5[%c0_67, %c0_68] : memref<1x512xf32, #tpu.memory_space<vmem>>, vector<1x512xf32>
    %78 = vector.shape_cast %77 : vector<1x512xf32> to vector<512xf32>
    %79 = vector.shape_cast %78 : vector<512xf32> to vector<1x512xf32>
    %80 = vector.broadcast %79 : vector<1x512xf32> to vector<16x512xf32>
    %81 = arith.addf %76, %80 : vector<16x512xf32>
    %c0_69 = arith.constant 0 : index
    %c0_70 = arith.constant 0 : index
    %c0_71 = arith.constant 0 : index
    %82 = vector.load %arg6[%c0_69, %c0_70, %c0_71] : memref<1x16x512xf32, #tpu.memory_space<vmem>>, vector<1x16x512xf32>
    %83 = vector.shape_cast %82 : vector<1x16x512xf32> to vector<16x512xf32>
    %84 = vector.shape_cast %81 : vector<16x512xf32> to vector<1x16x512xf32>
    tpu.vector_store %arg6[%c0_69, %c0_70, %c0_71], %84 {strides = array<i32>} : memref<1x16x512xf32, #tpu.memory_space<vmem>>, vector<1x16x512xf32>,
    return
  }
  func.func @transform_0(%arg0: i32) -> (i32, i32, i32) {
    %c0_i32 = arith.constant 0 : i32
    %c0_i32_0 = arith.constant 0 : i32
    %c0_i32_1 = arith.constant 0 : i32
    return %arg0, %c0_i32, %c0_i32_0 : i32, i32, i32
  }
  func.func @transform_1(%arg0: i32) -> (i32, i32, i32) {
    %c0_i32 = arith.constant 0 : i32
    %c0_i32_0 = arith.constant 0 : i32
    %c0_i32_1 = arith.constant 0 : i32
    %c0_i32_2 = arith.constant 0 : i32
    return %c0_i32, %c0_i32_0, %c0_i32_1 : i32, i32, i32
  }
  func.func @transform_2(%arg0: i32) -> (i32, i32, i32) {
    %c0_i32 = arith.constant 0 : i32
    %c0_i32_0 = arith.constant 0 : i32
    %c0_i32_1 = arith.constant 0 : i32
    %c0_i32_2 = arith.constant 0 : i32
    return %c0_i32, %c0_i32_0, %c0_i32_1 : i32, i32, i32
  }
  func.func @transform_3(%arg0: i32) -> (i32, i32) {
    %c0_i32 = arith.constant 0 : i32
    %c0_i32_0 = arith.constant 0 : i32
    %c0_i32_1 = arith.constant 0 : i32
    return %c0_i32, %c0_i32_0 : i32, i32
  }
  func.func @transform_4(%arg0: i32) -> (i32, i32) {
    %c0_i32 = arith.constant 0 : i32
    %c0_i32_0 = arith.constant 0 : i32
    %c0_i32_1 = arith.constant 0 : i32
    return %c0_i32, %c0_i32_0 : i32, i32
  }
  func.func @transform_5(%arg0: i32) -> (i32, i32, i32) {
    %c0_i32 = arith.constant 0 : i32
    %c0_i32_0 = arith.constant 0 : i32
    %c0_i32_1 = arith.constant 0 : i32
    return %arg0, %c0_i32, %c0_i32_0 : i32, i32, i32
  }
}

</mosaic_0001>

<bundles_post_ra>
// kernel: tpu_custom_call.1
= control target key start
LH: loop header
LB: loop body
LE: loop exit
PB: predicated region body
PF: predicated region fallthrough
CT: control target
= control target key end

     0   :  { %10 = vsyncpa [#allocation5], 0  ;;  %s14768_s0 = inlined_call_operand.hbm [shape: f32[2,16,512], index: 0, kind: input, shape index: {}]   ;;  %s14769_s1 = inlined_call_operand.hbm [shape: bf16[5,512,512], index: 1, kind: input, shape index: {}]   ;;  %s14770_s2 = inlined_call_operand.hbm [shape: bf16[5,512,512], index: 2, kind: input, shape index: {}]   ;;  %s14771_s3 = inlined_call_operand.hbm [shape: f32[1,512], index: 3, kind: input, shape index: {}]   ;;  %s14772_s4 = inlined_call_operand.hbm [shape: f32[1,512], index: 4, kind: input, shape index: {}]   ;;  %s14773_s5 = inlined_call_operand.hbm [shape: f32[2,16,512], index: 5, kind: output, shape index: {}]  }
   0x1   :  { %12 = vsyncpa [#allocation5 + $0x1], 0 }
   0x2   :  { %13 = vsyncpa [#allocation8], 0 }
   0x3   :  { %14 = vsyncpa [#allocation11], 0 }
   0x4   :  { %15 = vsyncpa [#allocation6], 0 }
   0x5   :  { %17 = vsyncpa [#allocation6 + $0x1], 0  ;;  %s14328_s18 = smov 0   ;;  %s14330_s19 = smov 0  }
   0x6   :  { %s14332_s20 = smov 0   ;;  %s14334_s21 = smov 0  }
   0x7 LB: > { %s14349_s22 = sadd.s32 4294967295, %s14283_s21   ;;  %s10579_s23 = sadd.s32 4294967294, %s14283_s21   ;;  %s14283_s21 = sphi %s14334_s21, %s14797_s21   ;;  %s14279_s20 = sphi %s14332_s20, %s14796_s20   ;;  %s14275_s19 = sphi %s14330_s19, %s14795_s19   ;;  %s14271_s18 = sphi %s14328_s18, %s14794_s18  }
   0x8   : > { %p43_p0 = scmp.ne.s32.totalorder %s14275_s19, %s14271_s18  ;;  %p14774_p1 = scmp.eq.s32.totalorder %s14349_s22, 0 }
   0x9   : > { %p157_p3 = scmp.eq.s32.totalorder %s10579_s23, 1  ;;  %p10580_p5 = scmp.ge.s32.totalorder %s14283_s21, 1 }
   0xa   : > { %p14358_p4 = por %p14774_p1, %p43_p0  ;;  %p164_p7 = scmp.lt.s32.totalorder %s14283_s21, 3 }
   0xb   : > { %p14363_p6 = por %p157_p3, %p43_p0  ;;  %s14285_s27 = smov [#allocation7]  }
   0xc   : > { %s14777_s24 = scalar_select %p14358_p4, 1, 0 }
   0xd   : > { %s14778_s25 = scalar_select %p14363_p6, 1, 0 }
   0xe   : > { %p14369_p9 = pnand %p10580_p5, %p164_p7  ;;  %s176_s28 = sshll.u32 %s14285_s27, 4  ;;  %s14373_s28 = int_to_ptr.vmem [resolvable:$true] %s176_s28 }
   0xf   : > { %s14286_s30 = smov [#allocation10]   ;;  %s14287_s7 = smov [#allocation9]  }
  0x10   : > { %s14779_s26 = scalar_select %p14369_p9, 1, 0 }
  0x11   : > { %p12048_p10 = pneg %p14369_p9  ;;  %s203_s6 = sshll.u32 %s14286_s30, 4  ;;  %s14384_s6 = int_to_ptr.vmem [resolvable:$true] %s203_s6 }
  0x12   : > { %s14386_s8 = sshll.u32 %s14287_s7, 4  ;;  %s14067_s11 = scalar_lea.hbm %s14769_s1, 81920  ;;  %s190_s8 = int_to_ptr.vmem [resolvable:$true] %s14386_s8 }
  0x13   : > { %p14380_p12 = pnand %p12048_p10, %p14774_p1  ;;  %p14068_p13 = scmp.ne.s32.totalorder %s14769_s1, %s14067_s11 }
  0x14   : > { %p14074_p7 = scmp.lt.u32.totalorder %s14067_s11, %s14769_s1 }
  0x15   : > { %p14396_p0 = pneg %p14380_p12 }
  0x17   : > { %p14070_p3 = pnand %p14396_p0, %p14068_p13 }
  0x19   : > { %p14071_p5 = pneg %p14070_p3 }
  0x1b   : > { %p14076_p10 = pnand %p14074_p7, %p14071_p5 }
  0x1d   : > { %14079 = shalt.err (!%p14076_p10)
}
  0x1e   : > { %s14080_s17 = scalar_lea.vmem %s14373_s28, 81920  ;;  %p14088_p2 = scmp.lt.s32.totalorder %s14373_s28, %s14373_s28 }
  0x1f   : > { %p14081_p11 = scmp.ne.s32.totalorder %s14373_s28, %s14080_s17  ;;  %p14089_p6 = scmp.lt.s32.totalorder %s14080_s17, %s14080_s17 }
  0x21   : > { %p14083_p8 = pnand %p14081_p11, %p14396_p0  ;;  %p14090_p13 = por %p14089_p6, %p14088_p2 }
  0x23   : > { %p14084_p1 = pneg %p14083_p8 }
  0x25   : > { %p14091_p3 = pnand %p14090_p13, %p14084_p1 }
  0x27   : > { %14094 = shalt.err (!%p14091_p3)
}
  0x28   : > { %s14288_s23 = smov 256   ;;  %s14289_s27 = smov 16  }
  0x29   : > { %12051 = dma.hbm_to_vmem [thread:$0]  (!%p14380_p12), %s14769_s1, 81920, %s14373_s28, [#allocation8], %s14288_s23, %s14288_s23, %s14289_s27  }
  0x2a   : > { %s14095_s11 = scalar_lea.hbm %s14771_s3, 64 }
  0x2b   : > { %p14096_p1 = scmp.ne.s32.totalorder %s14771_s3, %s14095_s11  ;;  %p14102_p8 = scmp.lt.u32.totalorder %s14095_s11, %s14771_s3 }
  0x2d   : > { %p14098_p2 = pnand %p14096_p1, %p14396_p0 }
  0x2f   : > { %p14099_p6 = pneg %p14098_p2 }
  0x31   : > { %p14104_p11 = pnand %p14102_p8, %p14099_p6 }
  0x33   : > { %14107 = shalt.err (!%p14104_p11)
}
  0x34   : > { %s14108_s28 = scalar_lea.vmem %s14384_s6, 64  ;;  %p14116_p13 = scmp.lt.s32.totalorder %s14384_s6, %s14384_s6 }
  0x35   : > { %p14109_p5 = scmp.ne.s32.totalorder %s14384_s6, %s14108_s28  ;;  %p14117_p3 = scmp.lt.s32.totalorder %s14108_s28, %s14108_s28 }
  0x37   : > { %p14111_p7 = pnand %p14109_p5, %p14396_p0  ;;  %p14118_p1 = por %p14117_p3, %p14116_p13 }
  0x39   : > { %p14112_p10 = pneg %p14111_p7 }
  0x3b   : > { %p14119_p2 = pnand %p14118_p1, %p14112_p10 }
  0x3d   : > { %14122 = shalt.err (!%p14119_p2)
}
  0x3e   : > { %12057 = dma.hbm_to_vmem [thread:$0]  (!%p14380_p12), %s14771_s3, 64, %s14384_s6, [#allocation11]  }
  0x3f   : > { %s14123_s10 = scalar_lea.hbm %s14770_s2, 81920 }
  0x40   : > { %p14124_p6 = scmp.ne.s32.totalorder %s14770_s2, %s14123_s10  ;;  %p14130_p5 = scmp.lt.u32.totalorder %s14123_s10, %s14770_s2 }
  0x42   : > { %p14126_p8 = pnand %p14124_p6, %p14396_p0 }
  0x44   : > { %p14127_p11 = pneg %p14126_p8 }
  0x46   : > { %p14132_p7 = pnand %p14130_p5, %p14127_p11 }
  0x48   : > { %14135 = shalt.err (!%p14132_p7)
}
  0x49   : > { %s14136_s16 = scalar_lea.vmem %s190_s8, 81920  ;;  %p14144_p1 = scmp.lt.s32.totalorder %s190_s8, %s190_s8 }
  0x4a   : > { %p14137_p10 = scmp.ne.s32.totalorder %s190_s8, %s14136_s16  ;;  %p14145_p2 = scmp.lt.s32.totalorder %s14136_s16, %s14136_s16 }
  0x4c   : > { %p14139_p13 = pnand %p14137_p10, %p14396_p0  ;;  %p14146_p4 = por %p14145_p2, %p14144_p1 }
  0x4e   : > { %p14140_p3 = pneg %p14139_p13 }
  0x50   : > { %p14147_p9 = pnand %p14146_p4, %p14140_p3 }
  0x52   : > { %14150 = shalt.err (!%p14147_p9)
}
  0x53   : > { %12054 = dma.hbm_to_vmem [thread:$0]  (!%p14380_p12), %s14770_s2, 81920, %s190_s8, [#allocation8], %s14288_s23, %s14288_s23, %s14289_s27  }
  0x54   : > { %s14290_s17 = smov [#allocation12]   ;;  %s14151_s10 = scalar_lea.hbm %s14772_s4, 64 }
  0x55   : > { %s214_s30 = sshll.u32 %s14290_s17, 4  ;;  %p14152_p4 = scmp.ne.s32.totalorder %s14772_s4, %s14151_s10  ;;  %s215_s30 = int_to_ptr.vmem [resolvable:$true] %s214_s30 }
  0x56   : > { %p14158_p8 = scmp.lt.u32.totalorder %s14151_s10, %s14772_s4 }
  0x57   : > { %p14154_p9 = pnand %p14152_p4, %p14396_p0 }
  0x59   : > { %p14155_p6 = pneg %p14154_p9 }
  0x5b   : > { %p14160_p11 = pnand %p14158_p8, %p14155_p6 }
  0x5d   : > { %14163 = shalt.err (!%p14160_p11)
}
  0x5e   : > { %s14164_s8 = scalar_lea.vmem %s215_s30, 64  ;;  %p14172_p13 = scmp.lt.s32.totalorder %s215_s30, %s215_s30 }
  0x5f   : > { %p14165_p5 = scmp.ne.s32.totalorder %s215_s30, %s14164_s8  ;;  %p14173_p3 = scmp.lt.s32.totalorder %s14164_s8, %s14164_s8 }
  0x61   : > { %p14167_p7 = pnand %p14165_p5, %p14396_p0  ;;  %p14174_p1 = por %p14173_p3, %p14172_p13 }
  0x63   : > { %p14168_p10 = pneg %p14167_p7 }
  0x65   : > { %p14175_p2 = pnand %p14174_p1, %p14168_p10 }
  0x67   : > { %14178 = shalt.err (!%p14175_p2)
}
  0x68   : > { %12060 = dma.hbm_to_vmem [thread:$0]  (!%p14380_p12), %s14772_s4, 64, %s215_s30, [#allocation11]  }
  0x69   : > { %s14484_s14 = sadd.s32 1, %s14283_s21   ;;  %s30_s16 = sadd.s32 1, %s14279_s20 }
  0x6a   : > { %s27_s29 = ssub.s32 %s14283_s21, %s14484_s14  ;;  %p37_p0 = scmp.ne.s32.totalorder %s14279_s20, %s14275_s19 }
  0x6b   : > { %p28_p4 = scmp.eq.s32.totalorder %s27_s29, 0  ;;  %p38_p9 = scmp.eq.s32.totalorder %s14283_s21, 0 }
  0x6c   : > { %p14782_p6 = scmp.eq.s32.totalorder %s14349_s22, 1  ;;  %p12073_p11 = scmp.lt.s32.totalorder %s14283_s21, 2 }
  0x6d   : > { %s14500_s28 = scalar_select %p28_p4, %s14279_s20, %s30_s16  }
  0x6e   : > { %p14494_p8 = por %p14782_p6, %p37_p0  ;;  %p39_p5 = por %p38_p9, %p37_p0 }
  0x6f   : > { %s225_s17 = sand.u32 1, %s14279_s20   ;;  %s11882_s30 = sshll.u32 %s14283_s21, 10 }
  0x70   : > { %s10586_s7 = sshll.u32 %s225_s17, 6  ;;  %s14507_s11 = scalar_lea.hbm %s14768_s0, %s11882_s30 }
  0x71   : > { %s229_s12 = scalar_lea.vmem [#allocation4], %s10586_s7  ;;  %p14511_p12 = pnand %p12073_p11, %p39_p5 }
  0x72   : > { %s236_s13 = sshll.u32 %s229_s12, 4  ;;  %s14515_s8 = scalar_lea.sflag [#allocation5], %s225_s17  ;;  %s14509_s13 = int_to_ptr.vmem [resolvable:$true] %s236_s13 }
  0x73   : > { %s14179_s23 = scalar_lea.hbm %s14507_s11, 1024  ;;  %p14181_p10 = pneg %p14511_p12 }
  0x74   : > { %p14180_p7 = scmp.ne.s32.totalorder %s14507_s11, %s14179_s23  ;;  %s14184_s29 = scalar_lea.hbm %s14768_s0, 2048 }
  0x75   : > { %p14185_p1 = scmp.lt.u32.totalorder %s14507_s11, %s14768_s0  ;;  %p14186_p2 = scmp.lt.u32.totalorder %s14184_s29, %s14179_s23 }
  0x76   : > { %p14182_p13 = pnand %p14181_p10, %p14180_p7  ;;  %p14188_p4 = scmp.lt.u32.totalorder %s14179_s23, %s14507_s11 }
  0x77   : > { %p14187_p0 = por %p14186_p2, %p14185_p1 }
  0x78   : > { %p14183_p3 = pneg %p14182_p13 }
  0x79   : > { %p14189_p9 = por %p14188_p4, %p14187_p0 }
  0x7b   : > { %p14190_p6 = pnand %p14189_p9, %p14183_p3 }
  0x7d   : > { %14193 = shalt.err (!%p14190_p6)
}
  0x7e   : > { %s14194_s17 = scalar_lea.vmem %s14509_s13, 1024  ;;  %s14291_s9 = smov [#allocation4]  }
  0x7f   : > { %p14195_p11 = scmp.ne.s32.totalorder %s14509_s13, %s14194_s17  ;;  %s14199_s10 = sshll.u32 %s14291_s9, 4  ;;  %s14200_s10 = int_to_ptr.vmem [resolvable:$false] %s14199_s10 }
  0x80   : > { %s14201_s12 = scalar_lea.vmem %s14200_s10, 2048  ;;  %p14202_p13 = scmp.lt.s32.totalorder %s14509_s13, %s14200_s10 }
  0x81   : > { %p14197_p5 = pnand %p14195_p11, %p14181_p10  ;;  %p14203_p1 = scmp.lt.s32.totalorder %s14201_s12, %s14194_s17 }
  0x83   : > { %p14198_p7 = pneg %p14197_p5  ;;  %p14204_p2 = por %p14203_p1, %p14202_p13 }
  0x85   : > { %p14205_p0 = pnand %p14204_p2, %p14198_p7 }
  0x87   : > { %14208 = shalt.err (!%p14205_p0)
}
  0x88   : > { %s14292_s23 = smov 512   ;;  %s14293_s27 = smov 32  }
  0x89   : > { %12064 = dma.hbm_to_vmem [thread:$0]  (!%p14511_p12), %s14507_s11, 1024, %s14509_s13, %s14515_s8, %s14292_s23, %s14292_s23, %s14293_s27  }
  0x8a   : > { %p14785_p10 = scmp.ne.s32.totalorder %s14779_s26, 0 }
  0x8b   : > { %s14546_s16 = sand.u32 (!%p14785_p10), 1, %s14275_s19   ;;  %p14786_p3 = scmp.ne.s32.totalorder (!%p14785_p10), %s14777_s24, 0 }
  0x8c   : > { %248 = sbr.rel (%p14785_p10) target bundleno = 1855 (0x73f), region = 40  ;;  %s10590_s29 = sshll.u32 (!%p14785_p10), %s14546_s16, 6 }
  0x8d   : > { %s251_s7 = scalar_lea.sflag (!%p14785_p10), [#allocation5], %s14546_s16  ;;  %s14550_s30 = scalar_lea.vmem (!%p14785_p10), [#allocation4], %s10590_s29 }
  0x93   : > { %14254 = dma.done.wait (%p14786_p3), %s251_s7, 1024  }
  0x94   : > { %14256 = vsyncadd (%p14786_p3), %s251_s7, 4294966272  ;;  %p14787_p12 = scmp.eq.s32.totalorder %s14349_s22, 0 }
  0x96   : > { %14258 = dma.done.wait (%p14787_p12), [#allocation8], 163840   ;;  %p14788_p4 = pmov %p14787_p12 }
  0x98   : > { %14260 = vsyncadd (%p14788_p4), [#allocation8], 4294803456  ;;  %p14789_p9 = pmov %p14788_p4 }
  0x99   : > { %p14790_p6 = pmov %p14788_p4 }
  0x9a   : > { %14262 = dma.done.wait (%p14789_p9), [#allocation11], 128  }
  0x9b   : > { %14264 = vsyncadd (%p14790_p6), [#allocation11], 4294967168  ;;  %s14564_s26 = scalar_lea.vmem [#allocation13], %s10590_s29  ;;  %p14791_p11 = scmp.ne.s32.totalorder %s14349_s22, 0 }
  0x9c   : > { %v14294_v0 = vmov (!%p14791_p11), 0.0  }
  0x9d   : > { %300 = sbr.rel (%p14791_p11) target bundleno = 165 (0xa5), region = 64  ;;  %301 = vst [vmem:[#allocation2] sm:$0x3] (!%p14791_p11), %v14294_v0  ;;  %302 = vst [vmem:[#allocation2 + $0x8] sm:$0x3] (!%p14791_p11), %v14294_v0 }
  0x9e   : > { %303 = vst [vmem:[#allocation2 + $0x10] sm:$0x3] (!%p14791_p11), %v14294_v0  ;;  %304 = vst [vmem:[#allocation2 + $0x18] sm:$0x3] (!%p14791_p11), %v14294_v0 }
  0x9f   : > { %305 = vst [vmem:[#allocation2 + $0x40] sm:$0xc] (!%p14791_p11), %v14294_v0  ;;  %306 = vst [vmem:[#allocation2 + $0x48] sm:$0xc] (!%p14791_p11), %v14294_v0 }
  0xa0   : > { %307 = vst [vmem:[#allocation2 + $0x50] sm:$0xc] (!%p14791_p11), %v14294_v0  ;;  %308 = vst [vmem:[#allocation2 + $0x58] sm:$0xc] (!%p14791_p11), %v14294_v0 }
  0xa1   : > { %309 = vst [vmem:[#allocation3] sm:$0x3] (!%p14791_p11), %v14294_v0  ;;  %310 = vst [vmem:[#allocation3 + $0x8] sm:$0x3] (!%p14791_p11), %v14294_v0 }
  0xa2   : > { %311 = vst [vmem:[#allocation3 + $0x10] sm:$0x3] (!%p14791_p11), %v14294_v0  ;;  %312 = vst [vmem:[#allocation3 + $0x18] sm:$0x3] (!%p14791_p11), %v14294_v0 }
  0xa3   : > { %313 = vst [vmem:[#allocation3 + $0x40] sm:$0xc] (!%p14791_p11), %v14294_v0  ;;  %314 = vst [vmem:[#allocation3 + $0x48] sm:$0xc] (!%p14791_p11), %v14294_v0 }
  0xa4   : > { %315 = vst [vmem:[#allocation3 + $0x50] sm:$0xc] %v14294_v0  ;;  %316 = vst [vmem:[#allocation3 + $0x58] sm:$0xc] %v14294_v0 }
  0xa5 PF: > { %v12122_v1 = vld [vmem:[#allocation7 + $0x404] ss:$16 sps:$4 sm:$0xff]   ;;  %v12124_v2 = vld [vmem:[#allocation7 + $0x40c] ss:$16 sps:$4 sm:$0xff]   ;;  %v12126_v3 = vld [vmem:[#allocation7 + $0x400] ss:$16 sps:$4 sm:$0xff]  }
  0xa6   : > { %1348 = vmatprep.subr.bf16.mxu0 %v12122_v1  ;;  %v12127_v4 = vld [vmem:[#allocation7 + $0x408] ss:$16 sps:$4 sm:$0xff]   ;;  %1434 = vmatprep.subr.bf16.mxu1 %v12124_v2  ;;  %v12128_v5 = vld [vmem:[#allocation7 + $0x424] ss:$16 sps:$4 sm:$0xff]   ;;  %v12130_v6 = vld [vmem:[#allocation7 + $0x42c] ss:$16 sps:$4 sm:$0xff]  }
  0xa7   : > { %1349 = vmatpush1.bf16.msra.mxu0 %v12126_v3  ;;  %1435 = vmatpush1.bf16.msra.mxu1 %v12127_v4  ;;  %v12132_v7 = vld [vmem:[#allocation7 + $0x420] ss:$16 sps:$4 sm:$0xff]   ;;  %v12133_v8 = vld [vmem:[#allocation7 + $0x428] ss:$16 sps:$4 sm:$0xff]   ;;  %v12134_v9 = vld [vmem:[#allocation7 + $0x444] ss:$16 sps:$4 sm:$0xff]  }
  0xa8   : > { %1350 = vmatprep.subr.bf16.mxu0 %v12128_v5  ;;  %1436 = vmatprep.subr.bf16.mxu1 %v12130_v6  ;;  %v12136_v10 = vld [vmem:[#allocation7 + $0x44c] ss:$16 sps:$4 sm:$0xff]   ;;  %v12138_v11 = vld [vmem:[#allocation7 + $0x440] ss:$16 sps:$4 sm:$0xff]   ;;  %v12139_v12 = vld [vmem:[#allocation7 + $0x448] ss:$16 sps:$4 sm:$0xff]  }
  0xa9   : > { %v12140_v13 = vld [vmem:[#allocation7 + $0x464] ss:$16 sps:$4 sm:$0xff]   ;;  %v12142_v14 = vld [vmem:[#allocation7 + $0x46c] ss:$16 sps:$4 sm:$0xff]   ;;  %v12144_v15 = vld [vmem:[#allocation7 + $0x460] ss:$16 sps:$4 sm:$0xff]  }
  0xaa   : > { %v12145_v16 = vld [vmem:[#allocation7 + $0x468] ss:$16 sps:$4 sm:$0xff]   ;;  %v12146_v17 = vld [vmem:[#allocation7 + $0x484] ss:$16 sps:$4 sm:$0xff]   ;;  %v12148_v18 = vld [vmem:[#allocation7 + $0x48c] ss:$16 sps:$4 sm:$0xff]  }
  0xab   : > { %1351 = vmatpush1.bf16.msra.mxu0 %v12132_v7  ;;  %1437 = vmatpush1.bf16.msra.mxu1 %v12133_v8  ;;  %v12150_v19 = vld [vmem:[#allocation7 + $0x480] ss:$16 sps:$4 sm:$0xff]   ;;  %v12151_v20 = vld [vmem:[#allocation7 + $0x488] ss:$16 sps:$4 sm:$0xff]   ;;  %v12152_v21 = vld [vmem:[#allocation7 + $0x4a4] ss:$16 sps:$4 sm:$0xff]  }
  0xac   : > { %1352 = vmatprep.subr.bf16.mxu0 %v12134_v9  ;;  %1438 = vmatprep.subr.bf16.mxu1 %v12136_v10  ;;  %v12154_v22 = vld [vmem:[#allocation7 + $0x4ac] ss:$16 sps:$4 sm:$0xff]   ;;  %v12156_v23 = vld [vmem:[#allocation7 + $0x4a0] ss:$16 sps:$4 sm:$0xff]   ;;  %v12157_v24 = vld [vmem:[#allocation7 + $0x4a8] ss:$16 sps:$4 sm:$0xff]  }
  0xad   : > { %v12158_v25 = vld [vmem:[#allocation7 + $0x4c4] ss:$16 sps:$4 sm:$0xff]   ;;  %v12160_v26 = vld [vmem:[#allocation7 + $0x4cc] ss:$16 sps:$4 sm:$0xff]   ;;  %v12162_v27 = vld [vmem:[#allocation7 + $0x4c0] ss:$16 sps:$4 sm:$0xff]  }
  0xae   : > { %v12163_v28 = vld [vmem:[#allocation7 + $0x4c8] ss:$16 sps:$4 sm:$0xff]   ;;  %v12164_v29 = vld [vmem:[#allocation7 + $0x4e4] ss:$16 sps:$4 sm:$0xff]   ;;  %v12166_v30 = vld [vmem:[#allocation7 + $0x4ec] ss:$16 sps:$4 sm:$0xff]  }
  0xaf   : > { %1353 = vmatpush1.bf16.msra.mxu0 %v12138_v11  ;;  %1439 = vmatpush1.bf16.msra.mxu1 %v12139_v12  ;;  %v12168_v31 = vld [vmem:[#allocation7 + $0x4e0] ss:$16 sps:$4 sm:$0xff]   ;;  %v12169_v32 = vld [vmem:[#allocation7 + $0x4e8] ss:$16 sps:$4 sm:$0xff]   ;;  %v12170_v33 = vld [vmem:[#allocation7 + $0x504] ss:$16 sps:$4 sm:$0xff]  }
  0xb0   : > { %1354 = vmatprep.subr.bf16.mxu0 %v12140_v13  ;;  %1440 = vmatprep.subr.bf16.mxu1 %v12142_v14  ;;  %v12172_v34 = vld [vmem:[#allocation7 + $0x50c] ss:$16 sps:$4 sm:$0xff]   ;;  %v12174_v35 = vld [vmem:[#allocation7 + $0x500] ss:$16 sps:$4 sm:$0xff]   ;;  %v12175_v36 = vld [vmem:[#allocation7 + $0x508] ss:$16 sps:$4 sm:$0xff]  }
  0xb1   : > { %v12176_v37 = vld [vmem:[#allocation7 + $0x524] ss:$16 sps:$4 sm:$0xff]   ;;  %v12178_v38 = vld [vmem:[#allocation7 + $0x52c] ss:$16 sps:$4 sm:$0xff]   ;;  %v12180_v39 = vld [vmem:[#allocation7 + $0x520] ss:$16 sps:$4 sm:$0xff]  }
  0xb2   : > { %v12181_v40 = vld [vmem:[#allocation7 + $0x528] ss:$16 sps:$4 sm:$0xff]   ;;  %v12182_v41 = vld [vmem:[#allocation7 + $0x544] ss:$16 sps:$4 sm:$0xff]   ;;  %v12184_v42 = vld [vmem:[#allocation7 + $0x54c] ss:$16 sps:$4 sm:$0xff]  }
  0xb3   : > { %1355 = vmatpush1.bf16.msra.mxu0 %v12144_v15  ;;  %1441 = vmatpush1.bf16.msra.mxu1 %v12145_v16  ;;  %v12186_v43 = vld [vmem:[#allocation7 + $0x540] ss:$16 sps:$4 sm:$0xff]   ;;  %v12187_v44 = vld [vmem:[#allocation7 + $0x548] ss:$16 sps:$4 sm:$0xff]   ;;  %v12188_v45 = vld [vmem:[#allocation7 + $0x564] ss:$16 sps:$4 sm:$0xff]  }
  0xb4   : > { %1356 = vmatprep.subr.bf16.mxu0 %v12146_v17  ;;  %1442 = vmatprep.subr.bf16.mxu1 %v12148_v18  ;;  %v12190_v46 = vld [vmem:[#allocation7 + $0x56c] ss:$16 sps:$4 sm:$0xff]   ;;  %vm333_vm0 = vcmask 1041408   ;;  %v12192_v50 = vld [vmem:[#allocation7 + $0x560] ss:$16 sps:$4 sm:$0xff]   ;;  %vm2485_vm2 = vcmask 1046528  }
  0xb5   : > { %v318_v47 = vld [vmem:[%s14550_s30 + $0x8] sm:$0xff]  ;;  %v12194_v53 = vld [vmem:[#allocation7 + $0x584] ss:$16 sps:$4 sm:$0xff]   ;;  %v12198_v58 = vld [vmem:[#allocation7 + $0x580] ss:$16 sps:$4 sm:$0xff]   ;;  %vm4513_vm4 = vcmask 1045504  }
  0xb6   : > { %v322_v48 = vld [vmem:[%s14550_s30 + $0x28] sm:$0xff]  ;;  %v335_v49 = vrot.slane %v318_v47, 6  ;;  %v317_v56 = vld [vmem:[%s14550_s30] sm:$0xff]  ;;  %vm655_vm1 = vsmask.f32 7424  ;;  %s11883_s24 = sshll.u32 %s14349_s22, 10 }
  0xb7   : > { %1357 = vmatpush1.bf16.msra.mxu0 %v12150_v19  ;;  %1443 = vmatpush1.bf16.msra.mxu1 %v12151_v20  ;;  %v12193_v51 = vld [vmem:[#allocation7 + $0x568] ss:$16 sps:$4 sm:$0xff]   ;;  %v340_v52 = vrot.slane %v322_v48, 6  ;;  %v12196_v54 = vld [vmem:[#allocation7 + $0x58c] ss:$16 sps:$4 sm:$0xff]   ;;  %v321_v57 = vld [vmem:[%s14550_s30 + $0x20] sm:$0xff]  ;;  %s14717_s15 = scalar_lea.hbm %s14773_s5, %s11883_s24 }
  0xb8   : > { %1358 = vmatprep.subr.bf16.mxu0 %v12152_v21  ;;  %1444 = vmatprep.subr.bf16.mxu1 %v12154_v22  ;;  %359 = vst [vmem:[#allocation2 + $0x8] sm:$0xfc] %v335_v49  ;;  %v334_v59 = vrot.slane %v317_v56, 6  ;;  %v338_v60 = vrot.slane %v321_v57, 6  ;;  %v12199_v61 = vld [vmem:[#allocation7 + $0x588] ss:$16 sps:$4 sm:$0xff]  }
  0xb9   : > { %v14571_v55 = vsel %vm333_vm0, %v335_v49, %v340_v52  ;;  %367 = vst [vmem:[#allocation2 + $0x48] sm:$0x3] %v340_v52  ;;  %v12200_v62 = vld [vmem:[#allocation7 + $0x5a4] ss:$16 sps:$4 sm:$0xff]   ;;  %v12202_v63 = vld [vmem:[#allocation7 + $0x5ac] ss:$16 sps:$4 sm:$0xff]  }
  0xba   : > { %363 = vst [vmem:[#allocation2 + $0x28] sm:$0xff] %v14571_v55  ;;  %v339_v0 = vsel %vm333_vm0, %v334_v59, %v338_v60  ;;  %358 = vst [vmem:[#allocation2] sm:$0xfc] %v334_v59  ;;  %v12204_v1 = vld [vmem:[#allocation7 + $0x5a0] ss:$16 sps:$4 sm:$0xff]   ;;  %s10468_s11 = sshll.u32 %s14564_s26, 4  ;;  %s14719_s11 = int_to_ptr.vmem [resolvable:$true] %s10468_s11 }
  0xbb   : > { %1359 = vmatpush1.bf16.msra.mxu0 %v12156_v23  ;;  %1445 = vmatpush1.bf16.msra.mxu1 %v12157_v24  ;;  %366 = vst [vmem:[#allocation2 + $0x40] sm:$0x3] %v338_v60  ;;  %362 = vst [vmem:[#allocation2 + $0x20] sm:$0xff] %v339_v0  ;;  %v12205_v2 = vld [vmem:[#allocation7 + $0x5a8] ss:$16 sps:$4 sm:$0xff]   ;;  %s10455_s8 = scalar_lea.sflag [#allocation6], %s14546_s16 }
  0xbc   : > { %1360 = vmatprep.subr.bf16.mxu0 %v12158_v25  ;;  %1446 = vmatprep.subr.bf16.mxu1 %v12160_v26  ;;  %v12206_v4 = vld [vmem:[#allocation7 + $0x5c4] ss:$16 sps:$4 sm:$0xff]   ;;  %v12208_v5 = vld [vmem:[#allocation7 + $0x5cc] ss:$16 sps:$4 sm:$0xff]   ;;  %v12210_v8 = vld [vmem:[#allocation7 + $0x5c0] ss:$16 sps:$4 sm:$0xff]  }
  0xbd   : > { %v12211_v10 = vld [vmem:[#allocation7 + $0x5c8] ss:$16 sps:$4 sm:$0xff]   ;;  %v12212_v16 = vld [vmem:[#allocation7 + $0x5e4] ss:$16 sps:$4 sm:$0xff]   ;;  %v12214_v17 = vld [vmem:[#allocation7 + $0x5ec] ss:$16 sps:$4 sm:$0xff]  }
  0xbe   : > { %v12216_v22 = vld [vmem:[#allocation7 + $0x5e0] ss:$16 sps:$4 sm:$0xff]   ;;  %v12239_v48 = vld [vmem:[#allocation7 + $0x668] ss:$16 sps:$4 sm:$0xff]   ;;  %v12244_v49 = vld [vmem:[#allocation7 + $0x684] ss:$16 sps:$4 sm:$0xff]  }
  0xbf   : > { %1361 = vmatpush1.bf16.msra.mxu0 %v12162_v27  ;;  %1447 = vmatpush1.bf16.msra.mxu1 %v12163_v28  ;;  %v511_v3 = vld [vmem:[#allocation2 + $0x8] sm:$0xfe]  ;;  %v12236_v47 = vld [vmem:[#allocation7 + $0x660] ss:$16 sps:$4 sm:$0xff]   ;;  %vm3467_vm3 = vsmask.f32 6400 }
  0xc0   : > { %1362 = vmatprep.subr.bf16.mxu0 %v12164_v29  ;;  %1448 = vmatprep.subr.bf16.mxu1 %v12166_v30  ;;  %v515_v6 = vld [vmem:[#allocation2 + $0x48] sm:$0x1]  ;;  %v519_v7 = vpack.c.bf16 %v14571_v55, %v511_v3  ;;  %v12220_v29 = vld [vmem:[#allocation7 + $0x604] ss:$16 sps:$4 sm:$0xff]   ;;  %v12223_v30 = vld [vmem:[#allocation7 + $0x60c] ss:$16 sps:$4 sm:$0xff]  }
  0xc1   : > { %v523_v9 = vpack.c.bf16 %v515_v6, %v515_v6  ;;  %v510_v14 = vld [vmem:[#allocation2] sm:$0xfe]  ;;  %v12217_v27 = vld [vmem:[#allocation7 + $0x5e8] ss:$16 sps:$4 sm:$0xff]   ;;  %v12259_v59 = vld [vmem:[#allocation7 + $0x6cc] ss:$16 sps:$4 sm:$0xff]  }
  0xc2   : > { %v669_v11 = vshrl.u32 %v519_v7, 16  ;;  %v671_v12 = vshll.u32 %v519_v7, 16  ;;  %v514_v15 = vld [vmem:[#allocation2 + $0x40] sm:$0x1]  ;;  %v518_v19 = vpack.c.bf16 %v339_v0, %v510_v14  ;;  %v12245_v52 = vld [vmem:[#allocation7 + $0x688] ss:$16 sps:$4 sm:$0xff]  }
  0xc3   : > { %1363 = vmatpush1.bf16.msra.mxu0 %v12168_v31  ;;  %1449 = vmatpush1.bf16.msra.mxu1 %v12169_v32  ;;  %v676_v13 = vshll.u32 %v523_v9, 16  ;;  %v522_v20 = vpack.c.bf16 %v514_v15, %v514_v15  ;;  %v12248_v56 = vld [vmem:[#allocation7 + $0x6a0] ss:$16 sps:$4 sm:$0xff]   ;;  %v12251_v57 = vld [vmem:[#allocation7 + $0x6a8] ss:$16 sps:$4 sm:$0xff]   ;;  %s14209_s17 = scalar_lea.vmem %s14719_s11, 1024 }
  0xc4   : > { %1364 = vmatprep.subr.bf16.mxu0 %v12170_v33  ;;  %1450 = vmatprep.subr.bf16.mxu1 %v12172_v34  ;;  %v673_v18 = vrot.slane %v671_v12, 1  ;;  %v657_v24 = vshrl.u32 %v518_v19, 16  ;;  %v659_v25 = vshll.u32 %v518_v19, 16  ;;  %v12218_v34 = vld [vmem:[#allocation7 + $0x600] ss:$16 sps:$4 sm:$0xff]   ;;  %v320_v0 = vld [vmem:[%s14550_s30 + $0x18] sm:$0xff]  ;;  %p14210_p5 = scmp.ne.s32.totalorder %s14719_s11, %s14209_s17 }
  0xc5   : > { %v678_v21 = vrot.slane %v676_v13, 1  ;;  %v664_v26 = vshll.u32 %v522_v20, 16  ;;  %v12254_v60 = vld [vmem:[#allocation7 + $0x6c0] ss:$16 sps:$4 sm:$0xff]   ;;  %v12268_v6 = vld [vmem:[#allocation7 + $0x704] ss:$16 sps:$4 sm:$0xff]  }
  0xc6   : > { %v674_v23 = vor.u32 %v673_v18, %v669_v11  ;;  %v661_v31 = vrot.slane %v659_v25, 1  ;;  %v12260_v3 = vld [vmem:[#allocation7 + $0x6e0] ss:$16 sps:$4 sm:$0xff]   ;;  %v12269_v15 = vld [vmem:[#allocation7 + $0x708] ss:$16 sps:$4 sm:$0xff]   ;;  %p14211_p7 = pnand %p14210_p5, %p14494_p8  ;;  %s14295_s9 = smov [#allocation13]  }
  0xc7   : > { %1365 = vmatpush1.bf16.msra.mxu0 %v12174_v35  ;;  %1451 = vmatpush1.bf16.msra.mxu1 %v12175_v36  ;;  %v666_v32 = vrot.slane %v664_v26, 1  ;;  %v12221_v35 = vld [vmem:[#allocation7 + $0x608] ss:$16 sps:$4 sm:$0xff]   ;;  %v323_v9 = vld [vmem:[%s14550_s30 + $0x30] sm:$0xff]  ;;  %v12283_v25 = vld [vmem:[#allocation7 + $0x74c] ss:$16 sps:$4 sm:$0xff]  }
  0xc8   : > { %1366 = vmatprep.subr.bf16.mxu0 %v12176_v37  ;;  %1452 = vmatprep.subr.bf16.mxu1 %v12178_v38  ;;  %v679_v28 = vsel %vm655_vm1, %v674_v23, %v678_v21  ;;  %v662_v33 = vor.u32 %v661_v31, %v657_v24  ;;  %v12226_v37 = vld [vmem:[#allocation7 + $0x624] ss:$16 sps:$4 sm:$0xff]   ;;  %v12229_v38 = vld [vmem:[#allocation7 + $0x62c] ss:$16 sps:$4 sm:$0xff]   ;;  %v342_v12 = vrot.slane %v323_v9, 6  ;;  %p14212_p13 = pneg %p14211_p7  ;;  %s14213_s10 = sshll.u32 %s14295_s9, 4  ;;  %s14214_s10 = int_to_ptr.vmem [resolvable:$false] %s14213_s10 }
  0xc9   : > { %1380 = vmatprep.mubr.bf16.mxu0 %v679_v28  ;;  %1466 = vmatprep.mubr.bf16.mxu1 %v679_v28  ;;  %v12266_v14 = vld [vmem:[#allocation7 + $0x700] ss:$16 sps:$4 sm:$0xff]   ;;  %v12275_v20 = vld [vmem:[#allocation7 + $0x728] ss:$16 sps:$4 sm:$0xff]   ;;  %v12280_v23 = vld [vmem:[#allocation7 + $0x744] ss:$16 sps:$4 sm:$0xff]   ;;  %p14216_p1 = scmp.lt.s32.totalorder %s14719_s11, %s14214_s10 }
  0xca   : > { %v667_v36 = vsel %vm655_vm1, %v662_v33, %v666_v32  ;;  %368 = vst [vmem:[#allocation2 + $0x50] sm:$0x3] %v342_v12  ;;  %v12272_v19 = vld [vmem:[#allocation7 + $0x720] ss:$16 sps:$4 sm:$0xff]   ;;  %v12281_v31 = vld [vmem:[#allocation7 + $0x748] ss:$16 sps:$4 sm:$0xff]  }
  0xcb   : > { %1367 = vmatpush1.bf16.msra.mxu0 %v12180_v39  ;;  %1453 = vmatpush1.bf16.msra.mxu1 %v12181_v40  ;;  %v12224_v39 = vld [vmem:[#allocation7 + $0x620] ss:$16 sps:$4 sm:$0xff]   ;;  %v12227_v40 = vld [vmem:[#allocation7 + $0x628] ss:$16 sps:$4 sm:$0xff]   ;;  %v12286_v33 = vld [vmem:[#allocation7 + $0x764] ss:$16 sps:$4 sm:$0xff]  }
  0xcc   : > { %1368 = vmatprep.subr.bf16.mxu0 %v12182_v41  ;;  %1454 = vmatprep.subr.bf16.mxu1 %v12184_v42  ;;  %v12232_v41 = vld [vmem:[#allocation7 + $0x644] ss:$16 sps:$4 sm:$0xff]   ;;  %v12235_v42 = vld [vmem:[#allocation7 + $0x64c] ss:$16 sps:$4 sm:$0xff]   ;;  %s14215_s12 = scalar_lea.vmem %s14214_s10, 2048 }
  0xcd   : > { %v12325_v9 = vld [vmem:[#allocation7 + $0x2c] ss:$16 sps:$4 sm:$0xff]   ;;  %p14217_p2 = scmp.lt.s32.totalorder %s14215_s12, %s14209_s17 }
  0xcf   : > { %1369 = vmatpush1.bf16.msra.mxu0 %v12186_v43  ;;  %1455 = vmatpush1.bf16.msra.mxu1 %v12187_v44  ;;  %v12230_v43 = vld [vmem:[#allocation7 + $0x640] ss:$16 sps:$4 sm:$0xff]   ;;  %v12233_v44 = vld [vmem:[#allocation7 + $0x648] ss:$16 sps:$4 sm:$0xff]   ;;  %p14218_p0 = por %p14217_p2, %p14216_p1 }
  0xd0   : > { %1370 = vmatprep.subr.bf16.mxu0 %v12188_v45  ;;  %1456 = vmatprep.subr.bf16.mxu1 %v12190_v46  ;;  %v12238_v45 = vld [vmem:[#allocation7 + $0x664] ss:$16 sps:$4 sm:$0xff]   ;;  %v12241_v46 = vld [vmem:[#allocation7 + $0x66c] ss:$16 sps:$4 sm:$0xff]  }
  0xd1   : > { %p14219_p10 = pnand %p14218_p0, %p14212_p13 }
  0xd3   : > { %1371 = vmatpush1.bf16.msra.mxu0 %v12192_v50  ;;  %1457 = vmatpush1.bf16.msra.mxu1 %v12193_v51  ;;  %v12247_v50 = vld [vmem:[#allocation7 + $0x68c] ss:$16 sps:$4 sm:$0xff]   ;;  %v12242_v51 = vld [vmem:[#allocation7 + $0x680] ss:$16 sps:$4 sm:$0xff]  }
  0xd4   : > { %1372 = vmatprep.subr.bf16.mxu0 %v12194_v53  ;;  %1458 = vmatprep.subr.bf16.mxu1 %v12196_v54  ;;  %v12250_v53 = vld [vmem:[#allocation7 + $0x6a4] ss:$16 sps:$4 sm:$0xff]   ;;  %v12253_v54 = vld [vmem:[#allocation7 + $0x6ac] ss:$16 sps:$4 sm:$0xff]  }
  0xd7   : > { %1373 = vmatpush1.bf16.msra.mxu0 %v12198_v58  ;;  %1459 = vmatpush1.bf16.msra.mxu1 %v12199_v61  ;;  %v12256_v58 = vld [vmem:[#allocation7 + $0x6c4] ss:$16 sps:$4 sm:$0xff]   ;;  %v12257_v61 = vld [vmem:[#allocation7 + $0x6c8] ss:$16 sps:$4 sm:$0xff]  }
  0xd8   : > { %1374 = vmatprep.subr.bf16.mxu0 %v12200_v62  ;;  %1460 = vmatprep.subr.bf16.mxu1 %v12202_v63  ;;  %v12262_v62 = vld [vmem:[#allocation7 + $0x6e4] ss:$16 sps:$4 sm:$0xff]   ;;  %v12265_v63 = vld [vmem:[#allocation7 + $0x6ec] ss:$16 sps:$4 sm:$0xff]  }
  0xdb   : > { %1375 = vmatpush1.bf16.msra.mxu0 %v12204_v1  ;;  %1461 = vmatpush1.bf16.msra.mxu1 %v12205_v2  ;;  %v324_v1 = vld [vmem:[%s14550_s30 + $0x38] sm:$0xff]  ;;  %v337_v2 = vrot.slane %v320_v0, 6  ;;  %v12316_v0 = vld [vmem:[#allocation7 + $0x4] ss:$16 sps:$4 sm:$0xff]  }
  0xdc   : > { %1376 = vmatprep.subr.bf16.mxu0 %v12206_v4  ;;  %1462 = vmatprep.subr.bf16.mxu1 %v12208_v5  ;;  %v344_v4 = vrot.slane %v324_v1, 6  ;;  %v12263_v5 = vld [vmem:[#allocation7 + $0x6e8] ss:$16 sps:$4 sm:$0xff]  }
  0xdd   : > { %361 = vst [vmem:[#allocation2 + $0x18] sm:$0xfc] %v337_v2 }
  0xde   : > { %v14583_v7 = vsel %vm333_vm0, %v337_v2, %v344_v4  ;;  %369 = vst [vmem:[#allocation2 + $0x58] sm:$0x3] %v344_v4  ;;  %v12314_v4 = vld [vmem:[#allocation7] ss:$16 sps:$4 sm:$0xff]  }
  0xdf   : > { %1377 = vmatpush1.bf16.msra.mxu0 %v12210_v8  ;;  %1463 = vmatpush1.bf16.msra.mxu1 %v12211_v10  ;;  %v319_v8 = vld [vmem:[%s14550_s30 + $0x10] sm:$0xff]  ;;  %v12271_v10 = vld [vmem:[#allocation7 + $0x70c] ss:$16 sps:$4 sm:$0xff]   ;;  %365 = vst [vmem:[#allocation2 + $0x38] sm:$0xff] %v14583_v7 }
  0xe0   : > { %1378 = vmatprep.subr.bf16.mxu0 %v12212_v16  ;;  %1464 = vmatprep.subr.bf16.mxu1 %v12214_v17  ;;  %v336_v11 = vrot.slane %v319_v8, 6  ;;  %v12274_v16 = vld [vmem:[#allocation7 + $0x724] ss:$16 sps:$4 sm:$0xff]   ;;  %v12277_v17 = vld [vmem:[#allocation7 + $0x72c] ss:$16 sps:$4 sm:$0xff]  }
  0xe1   : > { %v12322_v8 = vld [vmem:[#allocation7 + $0x24] ss:$16 sps:$4 sm:$0xff]  }
  0xe2   : > { %v343_v13 = vsel %vm333_vm0, %v336_v11, %v342_v12  ;;  %360 = vst [vmem:[#allocation2 + $0x10] sm:$0xfc] %v336_v11  ;;  %v12323_v11 = vld [vmem:[#allocation7 + $0x28] ss:$16 sps:$4 sm:$0xff]   ;;  %v12328_v12 = vld [vmem:[#allocation7 + $0x44] ss:$16 sps:$4 sm:$0xff]  }
  0xe3   : > { %1379 = vmatpush1.bf16.msra.mxu0 %v12216_v22  ;;  %1465 = vmatpush1.bf16.msra.mxu1 %v12217_v27  ;;  %364 = vst [vmem:[#allocation2 + $0x30] sm:$0xff] %v343_v13 }
  0xe4   : > { %1391 = vmatprep.subr.bf16.mxu0 %v12220_v29  ;;  %1477 = vmatprep.subr.bf16.mxu1 %v12223_v30  ;;  %v513_v18 = vld [vmem:[#allocation2 + $0x18] sm:$0xfe]  ;;  %v12278_v30 = vld [vmem:[#allocation7 + $0x740] ss:$16 sps:$4 sm:$0xff]  }
  0xe5   : > { %v517_v21 = vld [vmem:[#allocation2 + $0x58] sm:$0x1]  ;;  %v521_v22 = vpack.c.bf16 %v14583_v7, %v513_v18  ;;  %v12334_v18 = vld [vmem:[#allocation7 + $0x64] ss:$16 sps:$4 sm:$0xff]  }
  0xe6   : > { %1381 = vmatmul.mubr.bf16.vlgmr.msra.gmra.mrb[0].mxu0 %v667_v36  ;;  %1467 = vmatmul.mubr.bf16.vlgmr.msra.gmra.mrb[0].mxu1 %v667_v36  ;;  %v525_v24 = vpack.c.bf16 %v517_v21, %v517_v21  ;;  %v12284_v36 = vld [vmem:[#allocation7 + $0x760] ss:$16 sps:$4 sm:$0xff]   ;;  %v12335_v21 = vld [vmem:[#allocation7 + $0x68] ss:$16 sps:$4 sm:$0xff]  }
  0xe7   : > { %1392 = vmatpush1.bf16.msra.mxu0 %v12218_v34  ;;  %1478 = vmatpush1.bf16.msra.mxu1 %v12221_v35  ;;  %v693_v26 = vshrl.u32 %v521_v22, 16  ;;  %v695_v27 = vshll.u32 %v521_v22, 16  ;;  %v12289_v34 = vld [vmem:[#allocation7 + $0x76c] ss:$16 sps:$4 sm:$0xff]   ;;  %v12340_v22 = vld [vmem:[#allocation7 + $0x84] ss:$16 sps:$4 sm:$0xff]  }
  0xe8   : > { %1393 = vmatprep.subr.bf16.mxu0 %v12226_v37  ;;  %1479 = vmatprep.subr.bf16.mxu1 %v12229_v38  ;;  %v700_v28 = vshll.u32 %v525_v24, 16  ;;  %v12287_v37 = vld [vmem:[#allocation7 + $0x768] ss:$16 sps:$4 sm:$0xff]   ;;  %v12292_v38 = vld [vmem:[#allocation7 + $0x784] ss:$16 sps:$4 sm:$0xff]  }
  0xe9   : > { %v697_v29 = vrot.slane %v695_v27, 1  ;;  %v12341_v24 = vld [vmem:[#allocation7 + $0x88] ss:$16 sps:$4 sm:$0xff]   ;;  %v12344_v27 = vld [vmem:[#allocation7 + $0xa0] ss:$16 sps:$4 sm:$0xff]  }
  0xea   : > { %v702_v32 = vrot.slane %v700_v28, 1  ;;  %v12347_v28 = vld [vmem:[#allocation7 + $0xa8] ss:$16 sps:$4 sm:$0xff]  }
  0xeb   : > { %1394 = vmatpush1.bf16.msra.mxu0 %v12224_v39  ;;  %1480 = vmatpush1.bf16.msra.mxu1 %v12227_v40  ;;  %v698_v35 = vor.u32 %v697_v29, %v693_v26  ;;  %v12295_v40 = vld [vmem:[#allocation7 + $0x78c] ss:$16 sps:$4 sm:$0xff]   ;;  %v12352_v29 = vld [vmem:[#allocation7 + $0xc4] ss:$16 sps:$4 sm:$0xff]  }
  0xec   : > { %1395 = vmatprep.subr.bf16.mxu0 %v12232_v41  ;;  %1481 = vmatprep.subr.bf16.mxu1 %v12235_v42  ;;  %v512_v41 = vld [vmem:[#allocation2 + $0x10] sm:$0xfe]  ;;  %v12349_v26 = vld [vmem:[#allocation7 + $0xac] ss:$16 sps:$4 sm:$0xff]  }
  0xed   : > { %v703_v39 = vsel %vm655_vm1, %v698_v35, %v702_v32  ;;  %v12290_v42 = vld [vmem:[#allocation7 + $0x780] ss:$16 sps:$4 sm:$0xff]   ;;  %v12353_v32 = vld [vmem:[#allocation7 + $0xc8] ss:$16 sps:$4 sm:$0xff]  }
  0xee   : > { %1423 = vmatprep.mubr.bf16.mxu0 %v703_v39  ;;  %1509 = vmatprep.mubr.bf16.mxu1 %v703_v39  ;;  %v12356_v35 = vld [vmem:[#allocation7 + $0xe0] ss:$16 sps:$4 sm:$0xff]  }
  0xef   : > { %1396 = vmatpush1.bf16.msra.mxu0 %v12230_v43  ;;  %1482 = vmatpush1.bf16.msra.mxu1 %v12233_v44  ;;  %v12293_v43 = vld [vmem:[#allocation7 + $0x788] ss:$16 sps:$4 sm:$0xff]   ;;  %v12298_v44 = vld [vmem:[#allocation7 + $0x7a4] ss:$16 sps:$4 sm:$0xff]   ;;  %v12362_v39 = vld [vmem:[#allocation7 + $0x100] ss:$16 sps:$4 sm:$0xff]  }
  0xf0   : > { %1397 = vmatprep.subr.bf16.mxu0 %v12238_v45  ;;  %1483 = vmatprep.subr.bf16.mxu1 %v12241_v46  ;;  %v12301_v45 = vld [vmem:[#allocation7 + $0x7ac] ss:$16 sps:$4 sm:$0xff]   ;;  %v520_v46 = vpack.c.bf16 %v343_v13, %v512_v41  ;;  %v12370_v41 = vld [vmem:[#allocation7 + $0x124] ss:$16 sps:$4 sm:$0xff]  }
  0xf1   : > { %v12331_v13 = vld [vmem:[#allocation7 + $0x4c] ss:$16 sps:$4 sm:$0xff]  }
  0xf3   : > { %1398 = vmatpush1.bf16.msra.mxu0 %v12236_v47  ;;  %1484 = vmatpush1.bf16.msra.mxu1 %v12239_v48  ;;  %v516_v47 = vld [vmem:[#allocation2 + $0x50] sm:$0x1] }
  0xf4   : > { %1399 = vmatprep.subr.bf16.mxu0 %v12244_v49  ;;  %1485 = vmatprep.subr.bf16.mxu1 %v12247_v50  ;;  %v12296_v48 = vld [vmem:[#allocation7 + $0x7a0] ss:$16 sps:$4 sm:$0xff]   ;;  %v12299_v49 = vld [vmem:[#allocation7 + $0x7a8] ss:$16 sps:$4 sm:$0xff]   ;;  %v12304_v50 = vld [vmem:[#allocation7 + $0x7c4] ss:$16 sps:$4 sm:$0xff]  }
  0xf7   : > { %1400 = vmatpush1.bf16.msra.mxu0 %v12242_v51  ;;  %1486 = vmatpush1.bf16.msra.mxu1 %v12245_v52  ;;  %v524_v51 = vpack.c.bf16 %v516_v47, %v516_v47  ;;  %v683_v52 = vshll.u32 %v520_v46, 16  ;;  %v12374_v47 = vld [vmem:[#allocation7 + $0x140] ss:$16 sps:$4 sm:$0xff]  }
  0xf8   : > { %1401 = vmatprep.subr.bf16.mxu0 %v12250_v53  ;;  %1487 = vmatprep.subr.bf16.mxu1 %v12253_v54  ;;  %v12307_v53 = vld [vmem:[#allocation7 + $0x7cc] ss:$16 sps:$4 sm:$0xff]   ;;  %v12302_v54 = vld [vmem:[#allocation7 + $0x7c0] ss:$16 sps:$4 sm:$0xff]  }
  0xfb   : > { %1402 = vmatpush1.bf16.msra.mxu0 %v12248_v56  ;;  %1488 = vmatpush1.bf16.msra.mxu1 %v12251_v57  ;;  %v12305_v56 = vld [vmem:[#allocation7 + $0x7c8] ss:$16 sps:$4 sm:$0xff]   ;;  %v12310_v57 = vld [vmem:[#allocation7 + $0x7e4] ss:$16 sps:$4 sm:$0xff]  }
  0xfc   : > { %1403 = vmatprep.subr.bf16.mxu0 %v12256_v58  ;;  %1489 = vmatprep.subr.bf16.mxu1 %v12259_v59  ;;  %v681_v58 = vshrl.u32 %v520_v46, 16  ;;  %v685_v59 = vrot.slane %v683_v52, 1  ;;  %v12379_v46 = vld [vmem:[#allocation7 + $0x14c] ss:$16 sps:$4 sm:$0xff]   ;;  %v12383_v52 = vld [vmem:[#allocation7 + $0x168] ss:$16 sps:$4 sm:$0xff]  }
  0xfe   : > { %v686_v1 = vor.u32 %v685_v59, %v681_v58  ;;  %v12394_v58 = vld [vmem:[#allocation7 + $0x1a4] ss:$16 sps:$4 sm:$0xff]   ;;  %v12397_v59 = vld [vmem:[#allocation7 + $0x1ac] ss:$16 sps:$4 sm:$0xff]  }
  0xff   : > { %1404 = vmatpush1.bf16.msra.mxu0 %v12254_v60  ;;  %1490 = vmatpush1.bf16.msra.mxu1 %v12257_v61  ;;  %v688_v60 = vshll.u32 %v524_v51, 16  ;;  %v12313_v61 = vld [vmem:[#allocation7 + $0x7ec] ss:$16 sps:$4 sm:$0xff]   ;;  %v12380_v51 = vld [vmem:[#allocation7 + $0x160] ss:$16 sps:$4 sm:$0xff]  }
 0x100   : > { %1405 = vmatprep.subr.bf16.mxu0 %v12262_v62  ;;  %1491 = vmatprep.subr.bf16.mxu1 %v12265_v63  ;;  %v12308_v62 = vld [vmem:[#allocation7 + $0x7e0] ss:$16 sps:$4 sm:$0xff]   ;;  %v12311_v63 = vld [vmem:[#allocation7 + $0x7e8] ss:$16 sps:$4 sm:$0xff]  }
 0x101   : > { %v690_v2 = vrot.slane %v688_v60, 1  ;;  %v12392_v60 = vld [vmem:[#allocation7 + $0x1a0] ss:$16 sps:$4 sm:$0xff]  }
 0x103   : > { %1406 = vmatpush1.bf16.msra.mxu0 %v12260_v3  ;;  %1492 = vmatpush1.bf16.msra.mxu1 %v12263_v5  ;;  %v12319_v3 = vld [vmem:[#allocation7 + $0xc] ss:$16 sps:$4 sm:$0xff]   ;;  %v12317_v5 = vld [vmem:[#allocation7 + $0x8] ss:$16 sps:$4 sm:$0xff]  }
 0x104   : > { %1407 = vmatprep.subr.bf16.mxu0 %v12268_v6  ;;  %1493 = vmatprep.subr.bf16.mxu1 %v12271_v10  ;;  %v691_v6 = vsel %vm655_vm1, %v686_v1, %v690_v2  ;;  %v12320_v10 = vld [vmem:[#allocation7 + $0x20] ss:$16 sps:$4 sm:$0xff]   ;;  %v12401_v1 = vld [vmem:[#allocation7 + $0x1c8] ss:$16 sps:$4 sm:$0xff]   ;;  %v12406_v2 = vld [vmem:[#allocation7 + $0x1e4] ss:$16 sps:$4 sm:$0xff]  }
 0x107   : > { %1408 = vmatpush1.bf16.msra.mxu0 %v12266_v14  ;;  %1494 = vmatpush1.bf16.msra.mxu1 %v12269_v15  ;;  %v371_v14 = vld [vmem:[#allocation2 + $0x8] sm:$0xff]  ;;  %v12326_v15 = vld [vmem:[#allocation7 + $0x40] ss:$16 sps:$4 sm:$0xff]  }
 0x108   : > { %1409 = vmatprep.subr.bf16.mxu0 %v12274_v16  ;;  %1495 = vmatprep.subr.bf16.mxu1 %v12277_v17  ;;  %v379_v16 = vpack.c.bf16 %v14571_v55, %v371_v14  ;;  %v12329_v17 = vld [vmem:[#allocation7 + $0x48] ss:$16 sps:$4 sm:$0xff]   ;;  %v12338_v55 = vld [vmem:[#allocation7 + $0x80] ss:$16 sps:$4 sm:$0xff]  }
 0x109   : > { %v373_v14 = vld [vmem:[#allocation2 + $0x18] sm:$0xff] }
 0x10b   : > { %1410 = vmatpush1.bf16.msra.mxu0 %v12272_v19  ;;  %1496 = vmatpush1.bf16.msra.mxu1 %v12275_v20  ;;  %v12337_v19 = vld [vmem:[#allocation7 + $0x6c] ss:$16 sps:$4 sm:$0xff]   ;;  %v12332_v20 = vld [vmem:[#allocation7 + $0x60] ss:$16 sps:$4 sm:$0xff]  }
 0x10c   : > { %1411 = vmatprep.subr.bf16.mxu0 %v12280_v23  ;;  %1497 = vmatprep.subr.bf16.mxu1 %v12283_v25  ;;  %v12343_v23 = vld [vmem:[#allocation7 + $0x8c] ss:$16 sps:$4 sm:$0xff]   ;;  %v12346_v25 = vld [vmem:[#allocation7 + $0xa4] ss:$16 sps:$4 sm:$0xff]  }
 0x10f   : > { %1412 = vmatpush1.bf16.msra.mxu0 %v12278_v30  ;;  %1498 = vmatpush1.bf16.msra.mxu1 %v12281_v31  ;;  %v12355_v30 = vld [vmem:[#allocation7 + $0xcc] ss:$16 sps:$4 sm:$0xff]   ;;  %v12350_v31 = vld [vmem:[#allocation7 + $0xc0] ss:$16 sps:$4 sm:$0xff]  }
 0x110   : > { %1413 = vmatprep.subr.bf16.mxu0 %v12286_v33  ;;  %1499 = vmatprep.subr.bf16.mxu1 %v12289_v34  ;;  %v12358_v33 = vld [vmem:[#allocation7 + $0xe4] ss:$16 sps:$4 sm:$0xff]   ;;  %v12361_v34 = vld [vmem:[#allocation7 + $0xec] ss:$16 sps:$4 sm:$0xff]  }
 0x113   : > { %1414 = vmatpush1.bf16.msra.mxu0 %v12284_v36  ;;  %1500 = vmatpush1.bf16.msra.mxu1 %v12287_v37  ;;  %v12359_v36 = vld [vmem:[#allocation7 + $0xe8] ss:$16 sps:$4 sm:$0xff]   ;;  %v12364_v37 = vld [vmem:[#allocation7 + $0x104] ss:$16 sps:$4 sm:$0xff]  }
 0x114   : > { %1415 = vmatprep.subr.bf16.mxu0 %v12292_v38  ;;  %1501 = vmatprep.subr.bf16.mxu1 %v12295_v40  ;;  %v12367_v38 = vld [vmem:[#allocation7 + $0x10c] ss:$16 sps:$4 sm:$0xff]   ;;  %v12365_v40 = vld [vmem:[#allocation7 + $0x108] ss:$16 sps:$4 sm:$0xff]  }
 0x117   : > { %1416 = vmatpush1.bf16.msra.mxu0 %v12290_v42  ;;  %1502 = vmatpush1.bf16.msra.mxu1 %v12293_v43  ;;  %v12373_v42 = vld [vmem:[#allocation7 + $0x12c] ss:$16 sps:$4 sm:$0xff]   ;;  %v12368_v43 = vld [vmem:[#allocation7 + $0x120] ss:$16 sps:$4 sm:$0xff]  }
 0x118   : > { %1417 = vmatprep.subr.bf16.mxu0 %v12298_v44  ;;  %1503 = vmatprep.subr.bf16.mxu1 %v12301_v45  ;;  %v12371_v44 = vld [vmem:[#allocation7 + $0x128] ss:$16 sps:$4 sm:$0xff]   ;;  %v12376_v45 = vld [vmem:[#allocation7 + $0x144] ss:$16 sps:$4 sm:$0xff]  }
 0x11b   : > { %1418 = vmatpush1.bf16.msra.mxu0 %v12296_v48  ;;  %1504 = vmatpush1.bf16.msra.mxu1 %v12299_v49  ;;  %v12377_v48 = vld [vmem:[#allocation7 + $0x148] ss:$16 sps:$4 sm:$0xff]   ;;  %v12382_v49 = vld [vmem:[#allocation7 + $0x164] ss:$16 sps:$4 sm:$0xff]  }
 0x11c   : > { %1419 = vmatprep.subr.bf16.mxu0 %v12304_v50  ;;  %1505 = vmatprep.subr.bf16.mxu1 %v12307_v53  ;;  %v12385_v50 = vld [vmem:[#allocation7 + $0x16c] ss:$16 sps:$4 sm:$0xff]   ;;  %v12388_v53 = vld [vmem:[#allocation7 + $0x184] ss:$16 sps:$4 sm:$0xff]  }
 0x11f   : > { %1420 = vmatpush1.bf16.msra.mxu0 %v12302_v54  ;;  %1506 = vmatpush1.bf16.msra.mxu1 %v12305_v56  ;;  %v12391_v54 = vld [vmem:[#allocation7 + $0x18c] ss:$16 sps:$4 sm:$0xff]   ;;  %v12386_v56 = vld [vmem:[#allocation7 + $0x180] ss:$16 sps:$4 sm:$0xff]  }
 0x120   : > { %1421 = vmatprep.subr.bf16.mxu0 %v12310_v57  ;;  %1507 = vmatprep.subr.bf16.mxu1 %v12313_v61  ;;  %v12389_v57 = vld [vmem:[#allocation7 + $0x188] ss:$16 sps:$4 sm:$0xff]  }
 0x121   : > { %v12395_v61 = vld [vmem:[#allocation7 + $0x1a8] ss:$16 sps:$4 sm:$0xff]  }
 0x123   : > { %1422 = vmatpush1.bf16.msra.mxu0 %v12308_v62  ;;  %1508 = vmatpush1.bf16.msra.mxu1 %v12311_v63  ;;  %v12400_v62 = vld [vmem:[#allocation7 + $0x1c4] ss:$16 sps:$4 sm:$0xff]   ;;  %v12403_v63 = vld [vmem:[#allocation7 + $0x1cc] ss:$16 sps:$4 sm:$0xff]  }
 0x124   : > { %2160 = vmatprep.subr.bf16.mxu0 %v12316_v0  ;;  %2246 = vmatprep.subr.bf16.mxu1 %v12319_v3  ;;  %v12398_v0 = vld [vmem:[#allocation7 + $0x1c0] ss:$16 sps:$4 sm:$0xff]   ;;  %v12409_v3 = vld [vmem:[#allocation7 + $0x1ec] ss:$16 sps:$4 sm:$0xff]  }
 0x126   : > { %1424 = vmatmul.mubr.bf16.vlgmr.msra.gmra.mrb[0].mxu0 %v691_v6  ;;  %1510 = vmatmul.mubr.bf16.vlgmr.msra.gmra.mrb[0].mxu1 %v691_v6  ;;  %v12412_v6 = vld [vmem:[#allocation7 + $0x204] ss:$16 sps:$4 sm:$0xff]  }
 0x127   : > { %2161 = vmatpush1.bf16.msra.mxu0 %v12314_v4  ;;  %2247 = vmatpush1.bf16.msra.mxu1 %v12317_v5  ;;  %v12404_v4 = vld [vmem:[#allocation7 + $0x1e0] ss:$16 sps:$4 sm:$0xff]   ;;  %v12407_v5 = vld [vmem:[#allocation7 + $0x1e8] ss:$16 sps:$4 sm:$0xff]  }
 0x128   : > { %2162 = vmatprep.subr.bf16.mxu0 %v12322_v8  ;;  %2248 = vmatprep.subr.bf16.mxu1 %v12325_v9  ;;  %v370_v8 = vld [vmem:[#allocation2] sm:$0xff]  ;;  %v12415_v9 = vld [vmem:[#allocation7 + $0x20c] ss:$16 sps:$4 sm:$0xff]  }
 0x129   : > { %2192 = vmatprep.mubr.bf16.mxu0 %v379_v16  ;;  %2278 = vmatprep.mubr.bf16.mxu1 %v379_v16  ;;  %v12421_v16 = vld [vmem:[#allocation7 + $0x22c] ss:$16 sps:$4 sm:$0xff]  }
 0x12b   : > { %2163 = vmatpush1.bf16.msra.mxu0 %v12320_v10  ;;  %2249 = vmatpush1.bf16.msra.mxu1 %v12323_v11  ;;  %v12410_v10 = vld [vmem:[#allocation7 + $0x200] ss:$16 sps:$4 sm:$0xff]   ;;  %v12413_v11 = vld [vmem:[#allocation7 + $0x208] ss:$16 sps:$4 sm:$0xff]  }
 0x12c   : > { %2164 = vmatprep.subr.bf16.mxu0 %v12328_v12  ;;  %2250 = vmatprep.subr.bf16.mxu1 %v12331_v13  ;;  %v14593_v12 = vld [vmem:[#allocation2 + $0x20] sm:$0xff] }
 0x12d   : > { %v378_v13 = vpack.c.bf16 %v14593_v12, %v370_v8  ;;  %v2333_v8 = vld [vmem:[#allocation2 + $0x8] sm:$0xfc] }
 0x12f   : > { %2165 = vmatpush1.bf16.msra.mxu0 %v12326_v15  ;;  %2251 = vmatpush1.bf16.msra.mxu1 %v12329_v17  ;;  %v12418_v15 = vld [vmem:[#allocation7 + $0x224] ss:$16 sps:$4 sm:$0xff]   ;;  %v381_v17 = vpack.c.bf16 %v14583_v7, %v373_v14  ;;  %v12433_v7 = vld [vmem:[#allocation7 + $0x26c] ss:$16 sps:$4 sm:$0xff]   ;;  %v12503_v14 = vld [vmem:[#allocation7 + $0x3e8] ss:$16 sps:$4 sm:$0xff]  }
 0x130   : > { %2166 = vmatprep.subr.bf16.mxu0 %v12334_v18  ;;  %2252 = vmatprep.subr.bf16.mxu1 %v12337_v19  ;;  %v12416_v18 = vld [vmem:[#allocation7 + $0x220] ss:$16 sps:$4 sm:$0xff]   ;;  %v12419_v19 = vld [vmem:[#allocation7 + $0x228] ss:$16 sps:$4 sm:$0xff]  }
 0x133   : > { %2167 = vmatpush1.bf16.msra.mxu0 %v12332_v20  ;;  %2253 = vmatpush1.bf16.msra.mxu1 %v12335_v21  ;;  %v12424_v20 = vld [vmem:[#allocation7 + $0x244] ss:$16 sps:$4 sm:$0xff]   ;;  %v12427_v21 = vld [vmem:[#allocation7 + $0x24c] ss:$16 sps:$4 sm:$0xff]  }
 0x134   : > { %2168 = vmatprep.subr.bf16.mxu0 %v12340_v22  ;;  %2254 = vmatprep.subr.bf16.mxu1 %v12343_v23  ;;  %v12422_v22 = vld [vmem:[#allocation7 + $0x240] ss:$16 sps:$4 sm:$0xff]   ;;  %v12425_v23 = vld [vmem:[#allocation7 + $0x248] ss:$16 sps:$4 sm:$0xff]  }
 0x137   : > { %2169 = vmatpush1.bf16.msra.mxu0 %v12338_v55  ;;  %2255 = vmatpush1.bf16.msra.mxu1 %v12341_v24  ;;  %v12430_v55 = vld [vmem:[#allocation7 + $0x264] ss:$16 sps:$4 sm:$0xff]   ;;  %v12428_v24 = vld [vmem:[#allocation7 + $0x260] ss:$16 sps:$4 sm:$0xff]  }
 0x138   : > { %2170 = vmatprep.subr.bf16.mxu0 %v12346_v25  ;;  %2256 = vmatprep.subr.bf16.mxu1 %v12349_v26  ;;  %v12431_v25 = vld [vmem:[#allocation7 + $0x268] ss:$16 sps:$4 sm:$0xff]   ;;  %v12436_v26 = vld [vmem:[#allocation7 + $0x284] ss:$16 sps:$4 sm:$0xff]  }
 0x13b   : > { %2171 = vmatpush1.bf16.msra.mxu0 %v12344_v27  ;;  %2257 = vmatpush1.bf16.msra.mxu1 %v12347_v28  ;;  %v12439_v27 = vld [vmem:[#allocation7 + $0x28c] ss:$16 sps:$4 sm:$0xff]   ;;  %v12434_v28 = vld [vmem:[#allocation7 + $0x280] ss:$16 sps:$4 sm:$0xff]  }
 0x13c   : > { %2172 = vmatprep.subr.bf16.mxu0 %v12352_v29  ;;  %2258 = vmatprep.subr.bf16.mxu1 %v12355_v30  ;;  %v12437_v29 = vld [vmem:[#allocation7 + $0x288] ss:$16 sps:$4 sm:$0xff]   ;;  %v12442_v30 = vld [vmem:[#allocation7 + $0x2a4] ss:$16 sps:$4 sm:$0xff]  }
 0x13f   : > { %2173 = vmatpush1.bf16.msra.mxu0 %v12350_v31  ;;  %2259 = vmatpush1.bf16.msra.mxu1 %v12353_v32  ;;  %v12445_v31 = vld [vmem:[#allocation7 + $0x2ac] ss:$16 sps:$4 sm:$0xff]   ;;  %v12440_v32 = vld [vmem:[#allocation7 + $0x2a0] ss:$16 sps:$4 sm:$0xff]  }
 0x140   : > { %2174 = vmatprep.subr.bf16.mxu0 %v12358_v33  ;;  %2260 = vmatprep.subr.bf16.mxu1 %v12361_v34  ;;  %v12443_v33 = vld [vmem:[#allocation7 + $0x2a8] ss:$16 sps:$4 sm:$0xff]   ;;  %v12448_v34 = vld [vmem:[#allocation7 + $0x2c4] ss:$16 sps:$4 sm:$0xff]  }
 0x143   : > { %2175 = vmatpush1.bf16.msra.mxu0 %v12356_v35  ;;  %2261 = vmatpush1.bf16.msra.mxu1 %v12359_v36  ;;  %v12451_v35 = vld [vmem:[#allocation7 + $0x2cc] ss:$16 sps:$4 sm:$0xff]   ;;  %v12446_v36 = vld [vmem:[#allocation7 + $0x2c0] ss:$16 sps:$4 sm:$0xff]  }
 0x144   : > { %2176 = vmatprep.subr.bf16.mxu0 %v12364_v37  ;;  %2262 = vmatprep.subr.bf16.mxu1 %v12367_v38  ;;  %v12449_v37 = vld [vmem:[#allocation7 + $0x2c8] ss:$16 sps:$4 sm:$0xff]   ;;  %v12454_v38 = vld [vmem:[#allocation7 + $0x2e4] ss:$16 sps:$4 sm:$0xff]  }
 0x147   : > { %2177 = vmatpush1.bf16.msra.mxu0 %v12362_v39  ;;  %2263 = vmatpush1.bf16.msra.mxu1 %v12365_v40  ;;  %v12457_v39 = vld [vmem:[#allocation7 + $0x2ec] ss:$16 sps:$4 sm:$0xff]   ;;  %v12452_v40 = vld [vmem:[#allocation7 + $0x2e0] ss:$16 sps:$4 sm:$0xff]  }
 0x148   : > { %2178 = vmatprep.subr.bf16.mxu0 %v12370_v41  ;;  %2264 = vmatprep.subr.bf16.mxu1 %v12373_v42  ;;  %v12455_v41 = vld [vmem:[#allocation7 + $0x2e8] ss:$16 sps:$4 sm:$0xff]   ;;  %v12460_v42 = vld [vmem:[#allocation7 + $0x304] ss:$16 sps:$4 sm:$0xff]  }
 0x14b   : > { %2179 = vmatpush1.bf16.msra.mxu0 %v12368_v43  ;;  %2265 = vmatpush1.bf16.msra.mxu1 %v12371_v44  ;;  %v12463_v43 = vld [vmem:[#allocation7 + $0x30c] ss:$16 sps:$4 sm:$0xff]   ;;  %v12458_v44 = vld [vmem:[#allocation7 + $0x300] ss:$16 sps:$4 sm:$0xff]  }
 0x14c   : > { %2180 = vmatprep.subr.bf16.mxu0 %v12376_v45  ;;  %2266 = vmatprep.subr.bf16.mxu1 %v12379_v46  ;;  %v12461_v45 = vld [vmem:[#allocation7 + $0x308] ss:$16 sps:$4 sm:$0xff]   ;;  %v12466_v46 = vld [vmem:[#allocation7 + $0x324] ss:$16 sps:$4 sm:$0xff]  }
 0x14f   : > { %2181 = vmatpush1.bf16.msra.mxu0 %v12374_v47  ;;  %2267 = vmatpush1.bf16.msra.mxu1 %v12377_v48  ;;  %v12469_v47 = vld [vmem:[#allocation7 + $0x32c] ss:$16 sps:$4 sm:$0xff]   ;;  %v12464_v48 = vld [vmem:[#allocation7 + $0x320] ss:$16 sps:$4 sm:$0xff]  }
 0x150   : > { %2182 = vmatprep.subr.bf16.mxu0 %v12382_v49  ;;  %2268 = vmatprep.subr.bf16.mxu1 %v12385_v50  ;;  %v12467_v49 = vld [vmem:[#allocation7 + $0x328] ss:$16 sps:$4 sm:$0xff]   ;;  %v12472_v50 = vld [vmem:[#allocation7 + $0x344] ss:$16 sps:$4 sm:$0xff]  }
 0x153   : > { %2183 = vmatpush1.bf16.msra.mxu0 %v12380_v51  ;;  %2269 = vmatpush1.bf16.msra.mxu1 %v12383_v52  ;;  %v12475_v51 = vld [vmem:[#allocation7 + $0x34c] ss:$16 sps:$4 sm:$0xff]   ;;  %v12470_v52 = vld [vmem:[#allocation7 + $0x340] ss:$16 sps:$4 sm:$0xff]  }
 0x154   : > { %2184 = vmatprep.subr.bf16.mxu0 %v12388_v53  ;;  %2270 = vmatprep.subr.bf16.mxu1 %v12391_v54  ;;  %v12473_v53 = vld [vmem:[#allocation7 + $0x348] ss:$16 sps:$4 sm:$0xff]   ;;  %v12478_v54 = vld [vmem:[#allocation7 + $0x364] ss:$16 sps:$4 sm:$0xff]  }
 0x157   : > { %2185 = vmatpush1.bf16.msra.mxu0 %v12386_v56  ;;  %2271 = vmatpush1.bf16.msra.mxu1 %v12389_v57  ;;  %v12481_v56 = vld [vmem:[#allocation7 + $0x36c] ss:$16 sps:$4 sm:$0xff]   ;;  %v12476_v57 = vld [vmem:[#allocation7 + $0x360] ss:$16 sps:$4 sm:$0xff]  }
 0x158   : > { %2186 = vmatprep.subr.bf16.mxu0 %v12394_v58  ;;  %2272 = vmatprep.subr.bf16.mxu1 %v12397_v59  ;;  %v12479_v58 = vld [vmem:[#allocation7 + $0x368] ss:$16 sps:$4 sm:$0xff]   ;;  %v12484_v59 = vld [vmem:[#allocation7 + $0x384] ss:$16 sps:$4 sm:$0xff]  }
 0x15b   : > { %2187 = vmatpush1.bf16.msra.mxu0 %v12392_v60  ;;  %2273 = vmatpush1.bf16.msra.mxu1 %v12395_v61  ;;  %v12487_v60 = vld [vmem:[#allocation7 + $0x38c] ss:$16 sps:$4 sm:$0xff]   ;;  %v12482_v61 = vld [vmem:[#allocation7 + $0x380] ss:$16 sps:$4 sm:$0xff]  }
 0x15c   : > { %2188 = vmatprep.subr.bf16.mxu0 %v12400_v62  ;;  %2274 = vmatprep.subr.bf16.mxu1 %v12403_v63  ;;  %v12485_v62 = vld [vmem:[#allocation7 + $0x388] ss:$16 sps:$4 sm:$0xff]   ;;  %v12490_v63 = vld [vmem:[#allocation7 + $0x3a4] ss:$16 sps:$4 sm:$0xff]  }
 0x15f   : > { %2189 = vmatpush1.bf16.msra.mxu0 %v12398_v0  ;;  %2275 = vmatpush1.bf16.msra.mxu1 %v12401_v1  ;;  %v12493_v0 = vld [vmem:[#allocation7 + $0x3ac] ss:$16 sps:$4 sm:$0xff]   ;;  %v12488_v1 = vld [vmem:[#allocation7 + $0x3a0] ss:$16 sps:$4 sm:$0xff]  }
 0x160   : > { %2190 = vmatprep.subr.bf16.mxu0 %v12406_v2  ;;  %2276 = vmatprep.subr.bf16.mxu1 %v12409_v3  ;;  %v12491_v2 = vld [vmem:[#allocation7 + $0x3a8] ss:$16 sps:$4 sm:$0xff]   ;;  %v12496_v3 = vld [vmem:[#allocation7 + $0x3c4] ss:$16 sps:$4 sm:$0xff]  }
 0x163   : > { %2191 = vmatpush1.bf16.msra.mxu0 %v12404_v4  ;;  %2277 = vmatpush1.bf16.msra.mxu1 %v12407_v5  ;;  %v12499_v4 = vld [vmem:[#allocation7 + $0x3cc] ss:$16 sps:$4 sm:$0xff]   ;;  %v12494_v5 = vld [vmem:[#allocation7 + $0x3c0] ss:$16 sps:$4 sm:$0xff]  }
 0x164   : > { %2203 = vmatprep.subr.bf16.mxu0 %v12412_v6  ;;  %2289 = vmatprep.subr.bf16.mxu1 %v12415_v9  ;;  %v12497_v6 = vld [vmem:[#allocation7 + $0x3c8] ss:$16 sps:$4 sm:$0xff]  }
 0x165   : > { %v2337_v9 = vld [vmem:[#allocation2 + $0x48] sm:$0x3] }
 0x166   : > { %2193 = vmatmul.mubr.bf16.vlgmr.msra.gmra.mrb[0].mxu0 %v378_v13  ;;  %2279 = vmatmul.mubr.bf16.vlgmr.msra.gmra.mrb[0].mxu1 %v378_v13  ;;  %v12500_v13 = vld [vmem:[#allocation7 + $0x3e0] ss:$16 sps:$4 sm:$0xff]  }
 0x167   : > { %2204 = vmatpush1.bf16.msra.mxu0 %v12410_v10  ;;  %2290 = vmatpush1.bf16.msra.mxu1 %v12413_v11  ;;  %v12502_v10 = vld [vmem:[#allocation7 + $0x3e4] ss:$16 sps:$4 sm:$0xff]   ;;  %v12505_v11 = vld [vmem:[#allocation7 + $0x3ec] ss:$16 sps:$4 sm:$0xff]  }
 0x168   : > { %2205 = vmatprep.subr.bf16.mxu0 %v12418_v15  ;;  %2291 = vmatprep.subr.bf16.mxu1 %v12421_v16  ;;  %v14597_v15 = vld [vmem:[#allocation2 + $0x28] sm:$0xff] }
 0x169   : > { %2235 = vmatprep.mubr.bf16.mxu0 %v381_v17  ;;  %2321 = vmatprep.mubr.bf16.mxu1 %v381_v17  ;;  %v2341_v16 = vpack.c.bf16 %v14597_v15, %v2333_v8  ;;  %v2345_v17 = vpack.c.bf16 %v2337_v9, %v2337_v9  ;;  %v12580_v8 = vld [vmem:[#allocation7 + $0x984] ss:$16 sps:$4 sm:$0xff]   ;;  %v12583_v9 = vld [vmem:[#allocation7 + $0x98c] ss:$16 sps:$4 sm:$0xff]  }
 0x16b   : > { %2206 = vmatpush1.bf16.msra.mxu0 %v12416_v18  ;;  %2292 = vmatpush1.bf16.msra.mxu1 %v12419_v19  ;;  %v372_v18 = vld [vmem:[#allocation2 + $0x10] sm:$0xff] }
 0x16c   : > { %2207 = vmatprep.subr.bf16.mxu0 %v12424_v20  ;;  %2293 = vmatprep.subr.bf16.mxu1 %v12427_v21  ;;  %v12508_v19 = vld [vmem:[#allocation7 + $0x804] ss:$16 sps:$4 sm:$0xff]   ;;  %v12511_v20 = vld [vmem:[#allocation7 + $0x80c] ss:$16 sps:$4 sm:$0xff]   ;;  %v12506_v21 = vld [vmem:[#allocation7 + $0x800] ss:$16 sps:$4 sm:$0xff]  }
 0x16f   : > { %2208 = vmatpush1.bf16.msra.mxu0 %v12422_v22  ;;  %2294 = vmatpush1.bf16.msra.mxu1 %v12425_v23  ;;  %v14600_v22 = vld [vmem:[#allocation2 + $0x30] sm:$0xff] }
 0x170   : > { %2209 = vmatprep.subr.bf16.mxu0 %v12430_v55  ;;  %2295 = vmatprep.subr.bf16.mxu1 %v12433_v7  ;;  %v380_v23 = vpack.c.bf16 %v14600_v22, %v372_v18  ;;  %v2489_v55 = vrot.slane %v2341_v16, 1  ;;  %v2490_v7 = vrot.slane %v2345_v17, 1  ;;  %v12584_v16 = vld [vmem:[#allocation7 + $0x9a0] ss:$16 sps:$4 sm:$0xff]   ;;  %v12587_v17 = vld [vmem:[#allocation7 + $0x9a8] ss:$16 sps:$4 sm:$0xff]  }
 0x171   : > { %v12592_v18 = vld [vmem:[#allocation7 + $0x9c4] ss:$16 sps:$4 sm:$0xff]  }
 0x173   : > { %2210 = vmatpush1.bf16.msra.mxu0 %v12428_v24  ;;  %2296 = vmatpush1.bf16.msra.mxu1 %v12431_v25  ;;  %v12509_v24 = vld [vmem:[#allocation7 + $0x808] ss:$16 sps:$4 sm:$0xff]   ;;  %v12514_v25 = vld [vmem:[#allocation7 + $0x824] ss:$16 sps:$4 sm:$0xff]  }
 0x174   : > { %2211 = vmatprep.subr.bf16.mxu0 %v12436_v26  ;;  %2297 = vmatprep.subr.bf16.mxu1 %v12439_v27  ;;  %v12517_v26 = vld [vmem:[#allocation7 + $0x82c] ss:$16 sps:$4 sm:$0xff]   ;;  %v12512_v27 = vld [vmem:[#allocation7 + $0x820] ss:$16 sps:$4 sm:$0xff]  }
 0x177   : > { %2212 = vmatpush1.bf16.msra.mxu0 %v12434_v28  ;;  %2298 = vmatpush1.bf16.msra.mxu1 %v12437_v29  ;;  %v2491_v28 = vsel %vm2485_vm2, %v2489_v55, %v2490_v7  ;;  %v12515_v29 = vld [vmem:[#allocation7 + $0x828] ss:$16 sps:$4 sm:$0xff]  }
 0x178   : > { %2213 = vmatprep.subr.bf16.mxu0 %v12442_v30  ;;  %2299 = vmatprep.subr.bf16.mxu1 %v12445_v31  ;;  %v12520_v30 = vld [vmem:[#allocation7 + $0x844] ss:$16 sps:$4 sm:$0xff]   ;;  %v12523_v31 = vld [vmem:[#allocation7 + $0x84c] ss:$16 sps:$4 sm:$0xff]   ;;  %v12593_v55 = vld [vmem:[#allocation7 + $0x9c8] ss:$16 sps:$4 sm:$0xff]  }
 0x17b   : > { %2214 = vmatpush1.bf16.msra.mxu0 %v12440_v32  ;;  %2300 = vmatpush1.bf16.msra.mxu1 %v12443_v33  ;;  %v12518_v32 = vld [vmem:[#allocation7 + $0x840] ss:$16 sps:$4 sm:$0xff]   ;;  %v12521_v33 = vld [vmem:[#allocation7 + $0x848] ss:$16 sps:$4 sm:$0xff]  }
 0x17c   : > { %2215 = vmatprep.subr.bf16.mxu0 %v12448_v34  ;;  %2301 = vmatprep.subr.bf16.mxu1 %v12451_v35  ;;  %v12526_v34 = vld [vmem:[#allocation7 + $0x864] ss:$16 sps:$4 sm:$0xff]   ;;  %v12529_v35 = vld [vmem:[#allocation7 + $0x86c] ss:$16 sps:$4 sm:$0xff]  }
 0x17f   : > { %2216 = vmatpush1.bf16.msra.mxu0 %v12446_v36  ;;  %2302 = vmatpush1.bf16.msra.mxu1 %v12449_v37  ;;  %v12524_v36 = vld [vmem:[#allocation7 + $0x860] ss:$16 sps:$4 sm:$0xff]   ;;  %v12527_v37 = vld [vmem:[#allocation7 + $0x868] ss:$16 sps:$4 sm:$0xff]  }
 0x180   : > { %2217 = vmatprep.subr.bf16.mxu0 %v12454_v38  ;;  %2303 = vmatprep.subr.bf16.mxu1 %v12457_v39  ;;  %v12532_v38 = vld [vmem:[#allocation7 + $0x884] ss:$16 sps:$4 sm:$0xff]   ;;  %v12535_v39 = vld [vmem:[#allocation7 + $0x88c] ss:$16 sps:$4 sm:$0xff]  }
 0x183   : > { %2218 = vmatpush1.bf16.msra.mxu0 %v12452_v40  ;;  %2304 = vmatpush1.bf16.msra.mxu1 %v12455_v41  ;;  %v12530_v40 = vld [vmem:[#allocation7 + $0x880] ss:$16 sps:$4 sm:$0xff]   ;;  %v12533_v41 = vld [vmem:[#allocation7 + $0x888] ss:$16 sps:$4 sm:$0xff]  }
 0x184   : > { %2219 = vmatprep.subr.bf16.mxu0 %v12460_v42  ;;  %2305 = vmatprep.subr.bf16.mxu1 %v12463_v43  ;;  %v12538_v42 = vld [vmem:[#allocation7 + $0x8a4] ss:$16 sps:$4 sm:$0xff]   ;;  %v12541_v43 = vld [vmem:[#allocation7 + $0x8ac] ss:$16 sps:$4 sm:$0xff]  }
 0x187   : > { %2220 = vmatpush1.bf16.msra.mxu0 %v12458_v44  ;;  %2306 = vmatpush1.bf16.msra.mxu1 %v12461_v45  ;;  %v12536_v44 = vld [vmem:[#allocation7 + $0x8a0] ss:$16 sps:$4 sm:$0xff]   ;;  %v12539_v45 = vld [vmem:[#allocation7 + $0x8a8] ss:$16 sps:$4 sm:$0xff]  }
 0x188   : > { %2221 = vmatprep.subr.bf16.mxu0 %v12466_v46  ;;  %2307 = vmatprep.subr.bf16.mxu1 %v12469_v47  ;;  %v12544_v46 = vld [vmem:[#allocation7 + $0x8c4] ss:$16 sps:$4 sm:$0xff]   ;;  %v12547_v47 = vld [vmem:[#allocation7 + $0x8cc] ss:$16 sps:$4 sm:$0xff]  }
 0x18b   : > { %2222 = vmatpush1.bf16.msra.mxu0 %v12464_v48  ;;  %2308 = vmatpush1.bf16.msra.mxu1 %v12467_v49  ;;  %v12542_v48 = vld [vmem:[#allocation7 + $0x8c0] ss:$16 sps:$4 sm:$0xff]   ;;  %v12545_v49 = vld [vmem:[#allocation7 + $0x8c8] ss:$16 sps:$4 sm:$0xff]  }
 0x18c   : > { %2223 = vmatprep.subr.bf16.mxu0 %v12472_v50  ;;  %2309 = vmatprep.subr.bf16.mxu1 %v12475_v51  ;;  %v12550_v50 = vld [vmem:[#allocation7 + $0x8e4] ss:$16 sps:$4 sm:$0xff]   ;;  %v12553_v51 = vld [vmem:[#allocation7 + $0x8ec] ss:$16 sps:$4 sm:$0xff]  }
 0x18f   : > { %2224 = vmatpush1.bf16.msra.mxu0 %v12470_v52  ;;  %2310 = vmatpush1.bf16.msra.mxu1 %v12473_v53  ;;  %v12548_v52 = vld [vmem:[#allocation7 + $0x8e0] ss:$16 sps:$4 sm:$0xff]   ;;  %v12551_v53 = vld [vmem:[#allocation7 + $0x8e8] ss:$16 sps:$4 sm:$0xff]  }
 0x190   : > { %2225 = vmatprep.subr.bf16.mxu0 %v12478_v54  ;;  %2311 = vmatprep.subr.bf16.mxu1 %v12481_v56  ;;  %v12556_v54 = vld [vmem:[#allocation7 + $0x904] ss:$16 sps:$4 sm:$0xff]   ;;  %v12559_v56 = vld [vmem:[#allocation7 + $0x90c] ss:$16 sps:$4 sm:$0xff]  }
 0x193   : > { %2226 = vmatpush1.bf16.msra.mxu0 %v12476_v57  ;;  %2312 = vmatpush1.bf16.msra.mxu1 %v12479_v58  ;;  %v12554_v57 = vld [vmem:[#allocation7 + $0x900] ss:$16 sps:$4 sm:$0xff]   ;;  %v12557_v58 = vld [vmem:[#allocation7 + $0x908] ss:$16 sps:$4 sm:$0xff]  }
 0x194   : > { %2227 = vmatprep.subr.bf16.mxu0 %v12484_v59  ;;  %2313 = vmatprep.subr.bf16.mxu1 %v12487_v60  ;;  %v12562_v59 = vld [vmem:[#allocation7 + $0x924] ss:$16 sps:$4 sm:$0xff]   ;;  %v12565_v60 = vld [vmem:[#allocation7 + $0x92c] ss:$16 sps:$4 sm:$0xff]  }
 0x197   : > { %2228 = vmatpush1.bf16.msra.mxu0 %v12482_v61  ;;  %2314 = vmatpush1.bf16.msra.mxu1 %v12485_v62  ;;  %v12560_v61 = vld [vmem:[#allocation7 + $0x920] ss:$16 sps:$4 sm:$0xff]   ;;  %v12563_v62 = vld [vmem:[#allocation7 + $0x928] ss:$16 sps:$4 sm:$0xff]  }
 0x198   : > { %2229 = vmatprep.subr.bf16.mxu0 %v12490_v63  ;;  %2315 = vmatprep.subr.bf16.mxu1 %v12493_v0  ;;  %v12568_v63 = vld [vmem:[#allocation7 + $0x944] ss:$16 sps:$4 sm:$0xff]   ;;  %v12571_v0 = vld [vmem:[#allocation7 + $0x94c] ss:$16 sps:$4 sm:$0xff]  }
 0x19b   : > { %2230 = vmatpush1.bf16.msra.mxu0 %v12488_v1  ;;  %2316 = vmatpush1.bf16.msra.mxu1 %v12491_v2  ;;  %v12566_v1 = vld [vmem:[#allocation7 + $0x940] ss:$16 sps:$4 sm:$0xff]   ;;  %v12569_v2 = vld [vmem:[#allocation7 + $0x948] ss:$16 sps:$4 sm:$0xff]  }
 0x19c   : > { %2231 = vmatprep.subr.bf16.mxu0 %v12496_v3  ;;  %2317 = vmatprep.subr.bf16.mxu1 %v12499_v4  ;;  %v12574_v3 = vld [vmem:[#allocation7 + $0x964] ss:$16 sps:$4 sm:$0xff]   ;;  %v12577_v4 = vld [vmem:[#allocation7 + $0x96c] ss:$16 sps:$4 sm:$0xff]  }
 0x19f   : > { %2232 = vmatpush1.bf16.msra.mxu0 %v12494_v5  ;;  %2318 = vmatpush1.bf16.msra.mxu1 %v12497_v6  ;;  %v12572_v5 = vld [vmem:[#allocation7 + $0x960] ss:$16 sps:$4 sm:$0xff]   ;;  %v12575_v6 = vld [vmem:[#allocation7 + $0x968] ss:$16 sps:$4 sm:$0xff]  }
 0x1a0   : > { %2233 = vmatprep.subr.bf16.mxu0 %v12502_v10  ;;  %2319 = vmatprep.subr.bf16.mxu1 %v12505_v11  ;;  %v12578_v10 = vld [vmem:[#allocation7 + $0x980] ss:$16 sps:$4 sm:$0xff]   ;;  %v12581_v11 = vld [vmem:[#allocation7 + $0x988] ss:$16 sps:$4 sm:$0xff]  }
 0x1a3   : > { %2234 = vmatpush1.bf16.msra.mxu0 %v12500_v13  ;;  %2320 = vmatpush1.bf16.msra.mxu1 %v12503_v14  ;;  %v12586_v13 = vld [vmem:[#allocation7 + $0x9a4] ss:$16 sps:$4 sm:$0xff]   ;;  %v12589_v14 = vld [vmem:[#allocation7 + $0x9ac] ss:$16 sps:$4 sm:$0xff]  }
 0x1a4   : > { %3142 = vmatprep.subr.bf16.mxu0 %v12508_v19  ;;  %3228 = vmatprep.subr.bf16.mxu1 %v12511_v20  ;;  %v12595_v19 = vld [vmem:[#allocation7 + $0x9cc] ss:$16 sps:$4 sm:$0xff]   ;;  %v2332_v20 = vld [vmem:[#allocation2] sm:$0xfc] }
 0x1a5   : > { %v2340_v7 = vpack.c.bf16 %v14593_v12, %v2332_v20  ;;  %v12604_v12 = vld [vmem:[#allocation7 + $0xa04] ss:$16 sps:$4 sm:$0xff]   ;;  %v12667_v20 = vld [vmem:[#allocation7 + $0xb4c] ss:$16 sps:$4 sm:$0xff]  }
 0x1a6   : > { %2236 = vmatmul.mubr.bf16.vlgmr.msra.gmra.mrb[0].mxu0 %v380_v23  ;;  %2322 = vmatmul.mubr.bf16.vlgmr.msra.gmra.mrb[0].mxu1 %v380_v23  ;;  %v12590_v23 = vld [vmem:[#allocation7 + $0x9c0] ss:$16 sps:$4 sm:$0xff]  }
 0x1a7   : > { %3143 = vmatpush1.bf16.msra.mxu0 %v12506_v21  ;;  %3229 = vmatpush1.bf16.msra.mxu1 %v12509_v24  ;;  %v2336_v21 = vld [vmem:[#allocation2 + $0x40] sm:$0x3] }
 0x1a8   : > { %3144 = vmatprep.subr.bf16.mxu0 %v12514_v25  ;;  %3230 = vmatprep.subr.bf16.mxu1 %v12517_v26  ;;  %v2344_v24 = vpack.c.bf16 %v2336_v21, %v2336_v21  ;;  %v2335_v25 = vld [vmem:[#allocation2 + $0x18] sm:$0xfc]  ;;  %v2339_v26 = vld [vmem:[#allocation2 + $0x58] sm:$0x3]  ;;  %v12662_v21 = vld [vmem:[#allocation7 + $0xb40] ss:$16 sps:$4 sm:$0xff]  }
 0x1a9   : > { %3174 = vmatprep.mubr.bf16.mxu0 %v2491_v28  ;;  %3260 = vmatprep.mubr.bf16.mxu1 %v2491_v28  ;;  %v12601_v28 = vld [vmem:[#allocation7 + $0x9ec] ss:$16 sps:$4 sm:$0xff]  }
 0x1ab   : > { %3145 = vmatpush1.bf16.msra.mxu0 %v12512_v27  ;;  %3231 = vmatpush1.bf16.msra.mxu1 %v12515_v29  ;;  %v12598_v27 = vld [vmem:[#allocation7 + $0x9e4] ss:$16 sps:$4 sm:$0xff]   ;;  %v14605_v29 = vld [vmem:[#allocation2 + $0x38] sm:$0xff] }
 0x1ac   : > { %3146 = vmatprep.subr.bf16.mxu0 %v12520_v30  ;;  %3232 = vmatprep.subr.bf16.mxu1 %v12523_v31  ;;  %v2343_v30 = vpack.c.bf16 %v14605_v29, %v2335_v25  ;;  %v2347_v31 = vpack.c.bf16 %v2339_v26, %v2339_v26  ;;  %v12671_v25 = vld [vmem:[#allocation7 + $0xb68] ss:$16 sps:$4 sm:$0xff]   ;;  %v12676_v26 = vld [vmem:[#allocation7 + $0xb84] ss:$16 sps:$4 sm:$0xff]  }
 0x1af   : > { %3147 = vmatpush1.bf16.msra.mxu0 %v12518_v32  ;;  %3233 = vmatpush1.bf16.msra.mxu1 %v12521_v33  ;;  %v12596_v32 = vld [vmem:[#allocation7 + $0x9e0] ss:$16 sps:$4 sm:$0xff]   ;;  %v12599_v33 = vld [vmem:[#allocation7 + $0x9e8] ss:$16 sps:$4 sm:$0xff]  }
 0x1b0   : > { %3148 = vmatprep.subr.bf16.mxu0 %v12526_v34  ;;  %3234 = vmatprep.subr.bf16.mxu1 %v12529_v35  ;;  %v2486_v34 = vrot.slane %v2340_v7, 1  ;;  %v2487_v35 = vrot.slane %v2344_v24, 1  ;;  %v12673_v7 = vld [vmem:[#allocation7 + $0xb6c] ss:$16 sps:$4 sm:$0xff]   ;;  %v12668_v24 = vld [vmem:[#allocation7 + $0xb60] ss:$16 sps:$4 sm:$0xff]  }
 0x1b3   : > { %3149 = vmatpush1.bf16.msra.mxu0 %v12524_v36  ;;  %3235 = vmatpush1.bf16.msra.mxu1 %v12527_v37  ;;  %v12607_v36 = vld [vmem:[#allocation7 + $0xa0c] ss:$16 sps:$4 sm:$0xff]   ;;  %v2495_v37 = vrot.slane %v2343_v30, 1  ;;  %v12674_v30 = vld [vmem:[#allocation7 + $0xb80] ss:$16 sps:$4 sm:$0xff]  }
 0x1b4   : > { %3150 = vmatprep.subr.bf16.mxu0 %v12532_v38  ;;  %3236 = vmatprep.subr.bf16.mxu1 %v12535_v39  ;;  %v2496_v38 = vrot.slane %v2347_v31, 1  ;;  %v12602_v39 = vld [vmem:[#allocation7 + $0xa00] ss:$16 sps:$4 sm:$0xff]   ;;  %v12677_v31 = vld [vmem:[#allocation7 + $0xb88] ss:$16 sps:$4 sm:$0xff]  }
 0x1b7   : > { %3151 = vmatpush1.bf16.msra.mxu0 %v12530_v40  ;;  %3237 = vmatpush1.bf16.msra.mxu1 %v12533_v41  ;;  %v12605_v40 = vld [vmem:[#allocation7 + $0xa08] ss:$16 sps:$4 sm:$0xff]   ;;  %v2488_v41 = vsel %vm2485_vm2, %v2486_v34, %v2487_v35  ;;  %v12685_v34 = vld [vmem:[#allocation7 + $0xbac] ss:$16 sps:$4 sm:$0xff]   ;;  %v12680_v35 = vld [vmem:[#allocation7 + $0xba0] ss:$16 sps:$4 sm:$0xff]  }
 0x1b8   : > { %3152 = vmatprep.subr.bf16.mxu0 %v12538_v42  ;;  %3238 = vmatprep.subr.bf16.mxu1 %v12541_v43  ;;  %v12610_v42 = vld [vmem:[#allocation7 + $0xa24] ss:$16 sps:$4 sm:$0xff]   ;;  %v12613_v43 = vld [vmem:[#allocation7 + $0xa2c] ss:$16 sps:$4 sm:$0xff]  }
 0x1bb   : > { %3153 = vmatpush1.bf16.msra.mxu0 %v12536_v44  ;;  %3239 = vmatpush1.bf16.msra.mxu1 %v12539_v45  ;;  %v2497_v44 = vsel %vm2485_vm2, %v2495_v37, %v2496_v38  ;;  %v12608_v45 = vld [vmem:[#allocation7 + $0xa20] ss:$16 sps:$4 sm:$0xff]   ;;  %v12688_v38 = vld [vmem:[#allocation7 + $0xbc4] ss:$16 sps:$4 sm:$0xff]  }
 0x1bc   : > { %3154 = vmatprep.subr.bf16.mxu0 %v12544_v46  ;;  %3240 = vmatprep.subr.bf16.mxu1 %v12547_v47  ;;  %v12611_v46 = vld [vmem:[#allocation7 + $0xa28] ss:$16 sps:$4 sm:$0xff]   ;;  %v12616_v47 = vld [vmem:[#allocation7 + $0xa44] ss:$16 sps:$4 sm:$0xff]  }
 0x1bf   : > { %3155 = vmatpush1.bf16.msra.mxu0 %v12542_v48  ;;  %3241 = vmatpush1.bf16.msra.mxu1 %v12545_v49  ;;  %v12619_v48 = vld [vmem:[#allocation7 + $0xa4c] ss:$16 sps:$4 sm:$0xff]   ;;  %v12614_v49 = vld [vmem:[#allocation7 + $0xa40] ss:$16 sps:$4 sm:$0xff]  }
 0x1c0   : > { %3156 = vmatprep.subr.bf16.mxu0 %v12550_v50  ;;  %3242 = vmatprep.subr.bf16.mxu1 %v12553_v51  ;;  %v12617_v50 = vld [vmem:[#allocation7 + $0xa48] ss:$16 sps:$4 sm:$0xff]   ;;  %v12622_v51 = vld [vmem:[#allocation7 + $0xa64] ss:$16 sps:$4 sm:$0xff]  }
 0x1c3   : > { %3157 = vmatpush1.bf16.msra.mxu0 %v12548_v52  ;;  %3243 = vmatpush1.bf16.msra.mxu1 %v12551_v53  ;;  %v12625_v52 = vld [vmem:[#allocation7 + $0xa6c] ss:$16 sps:$4 sm:$0xff]   ;;  %v12620_v53 = vld [vmem:[#allocation7 + $0xa60] ss:$16 sps:$4 sm:$0xff]  }
 0x1c4   : > { %3158 = vmatprep.subr.bf16.mxu0 %v12556_v54  ;;  %3244 = vmatprep.subr.bf16.mxu1 %v12559_v56  ;;  %v12623_v54 = vld [vmem:[#allocation7 + $0xa68] ss:$16 sps:$4 sm:$0xff]   ;;  %v12628_v56 = vld [vmem:[#allocation7 + $0xa84] ss:$16 sps:$4 sm:$0xff]  }
 0x1c7   : > { %3159 = vmatpush1.bf16.msra.mxu0 %v12554_v57  ;;  %3245 = vmatpush1.bf16.msra.mxu1 %v12557_v58  ;;  %v12631_v57 = vld [vmem:[#allocation7 + $0xa8c] ss:$16 sps:$4 sm:$0xff]   ;;  %v12626_v58 = vld [vmem:[#allocation7 + $0xa80] ss:$16 sps:$4 sm:$0xff]  }
 0x1c8   : > { %3160 = vmatprep.subr.bf16.mxu0 %v12562_v59  ;;  %3246 = vmatprep.subr.bf16.mxu1 %v12565_v60  ;;  %v12629_v59 = vld [vmem:[#allocation7 + $0xa88] ss:$16 sps:$4 sm:$0xff]   ;;  %v12634_v60 = vld [vmem:[#allocation7 + $0xaa4] ss:$16 sps:$4 sm:$0xff]  }
 0x1cb   : > { %3161 = vmatpush1.bf16.msra.mxu0 %v12560_v61  ;;  %3247 = vmatpush1.bf16.msra.mxu1 %v12563_v62  ;;  %v12637_v61 = vld [vmem:[#allocation7 + $0xaac] ss:$16 sps:$4 sm:$0xff]   ;;  %v12632_v62 = vld [vmem:[#allocation7 + $0xaa0] ss:$16 sps:$4 sm:$0xff]  }
 0x1cc   : > { %3162 = vmatprep.subr.bf16.mxu0 %v12568_v63  ;;  %3248 = vmatprep.subr.bf16.mxu1 %v12571_v0  ;;  %v12635_v63 = vld [vmem:[#allocation7 + $0xaa8] ss:$16 sps:$4 sm:$0xff]   ;;  %v12640_v0 = vld [vmem:[#allocation7 + $0xac4] ss:$16 sps:$4 sm:$0xff]  }
 0x1cf   : > { %3163 = vmatpush1.bf16.msra.mxu0 %v12566_v1  ;;  %3249 = vmatpush1.bf16.msra.mxu1 %v12569_v2  ;;  %v12643_v1 = vld [vmem:[#allocation7 + $0xacc] ss:$16 sps:$4 sm:$0xff]   ;;  %v12638_v2 = vld [vmem:[#allocation7 + $0xac0] ss:$16 sps:$4 sm:$0xff]  }
 0x1d0   : > { %3164 = vmatprep.subr.bf16.mxu0 %v12574_v3  ;;  %3250 = vmatprep.subr.bf16.mxu1 %v12577_v4  ;;  %v12641_v3 = vld [vmem:[#allocation7 + $0xac8] ss:$16 sps:$4 sm:$0xff]   ;;  %v12646_v4 = vld [vmem:[#allocation7 + $0xae4] ss:$16 sps:$4 sm:$0xff]  }
 0x1d3   : > { %3165 = vmatpush1.bf16.msra.mxu0 %v12572_v5  ;;  %3251 = vmatpush1.bf16.msra.mxu1 %v12575_v6  ;;  %v12649_v5 = vld [vmem:[#allocation7 + $0xaec] ss:$16 sps:$4 sm:$0xff]   ;;  %v12644_v6 = vld [vmem:[#allocation7 + $0xae0] ss:$16 sps:$4 sm:$0xff]  }
 0x1d4   : > { %3166 = vmatprep.subr.bf16.mxu0 %v12580_v8  ;;  %3252 = vmatprep.subr.bf16.mxu1 %v12583_v9  ;;  %v12647_v8 = vld [vmem:[#allocation7 + $0xae8] ss:$16 sps:$4 sm:$0xff]   ;;  %v12652_v9 = vld [vmem:[#allocation7 + $0xb04] ss:$16 sps:$4 sm:$0xff]  }
 0x1d7   : > { %3167 = vmatpush1.bf16.msra.mxu0 %v12578_v10  ;;  %3253 = vmatpush1.bf16.msra.mxu1 %v12581_v11  ;;  %v12655_v10 = vld [vmem:[#allocation7 + $0xb0c] ss:$16 sps:$4 sm:$0xff]   ;;  %v12650_v11 = vld [vmem:[#allocation7 + $0xb00] ss:$16 sps:$4 sm:$0xff]  }
 0x1d8   : > { %3168 = vmatprep.subr.bf16.mxu0 %v12586_v13  ;;  %3254 = vmatprep.subr.bf16.mxu1 %v12589_v14  ;;  %v12653_v13 = vld [vmem:[#allocation7 + $0xb08] ss:$16 sps:$4 sm:$0xff]   ;;  %v12658_v14 = vld [vmem:[#allocation7 + $0xb24] ss:$16 sps:$4 sm:$0xff]  }
 0x1db   : > { %3169 = vmatpush1.bf16.msra.mxu0 %v12584_v16  ;;  %3255 = vmatpush1.bf16.msra.mxu1 %v12587_v17  ;;  %v12661_v16 = vld [vmem:[#allocation7 + $0xb2c] ss:$16 sps:$4 sm:$0xff]   ;;  %v12656_v17 = vld [vmem:[#allocation7 + $0xb20] ss:$16 sps:$4 sm:$0xff]  }
 0x1dc   : > { %3170 = vmatprep.subr.bf16.mxu0 %v12592_v18  ;;  %3256 = vmatprep.subr.bf16.mxu1 %v12595_v19  ;;  %v12659_v18 = vld [vmem:[#allocation7 + $0xb28] ss:$16 sps:$4 sm:$0xff]   ;;  %v12664_v19 = vld [vmem:[#allocation7 + $0xb44] ss:$16 sps:$4 sm:$0xff]  }
 0x1df   : > { %3171 = vmatpush1.bf16.msra.mxu0 %v12590_v23  ;;  %3257 = vmatpush1.bf16.msra.mxu1 %v12593_v55  ;;  %v12665_v23 = vld [vmem:[#allocation7 + $0xb48] ss:$16 sps:$4 sm:$0xff]   ;;  %v12670_v55 = vld [vmem:[#allocation7 + $0xb64] ss:$16 sps:$4 sm:$0xff]  }
 0x1e0   : > { %3172 = vmatprep.subr.bf16.mxu0 %v12598_v27  ;;  %3258 = vmatprep.subr.bf16.mxu1 %v12601_v28  ;;  %v12679_v27 = vld [vmem:[#allocation7 + $0xb8c] ss:$16 sps:$4 sm:$0xff]  }
 0x1e1   : > { %v3323_v28 = vld [vmem:[#allocation2 + $0x8] sm:$0xf8] }
 0x1e3   : > { %3173 = vmatpush1.bf16.msra.mxu0 %v12596_v32  ;;  %3259 = vmatpush1.bf16.msra.mxu1 %v12599_v33  ;;  %v3327_v32 = vld [vmem:[#allocation2 + $0x48] sm:$0x7]  ;;  %v12682_v33 = vld [vmem:[#allocation7 + $0xba4] ss:$16 sps:$4 sm:$0xff]  }
 0x1e4   : > { %3185 = vmatprep.subr.bf16.mxu0 %v12604_v12  ;;  %3271 = vmatprep.subr.bf16.mxu1 %v12607_v36  ;;  %v12683_v12 = vld [vmem:[#allocation7 + $0xba8] ss:$16 sps:$4 sm:$0xff]   ;;  %v3331_v36 = vpack.c.bf16 %v14597_v15, %v3323_v28  ;;  %v3335_v37 = vpack.c.bf16 %v3327_v32, %v3327_v32  ;;  %v12740_v32 = vld [vmem:[#allocation7 + $0xce0] ss:$16 sps:$4 sm:$0xff]  }
 0x1e5   : > { %v12737_v28 = vld [vmem:[#allocation7 + $0xcc8] ss:$16 sps:$4 sm:$0xff]  }
 0x1e6   : > { %3175 = vmatmul.mubr.bf16.vlgmr.msra.gmra.mrb[0].mxu0 %v2488_v41  ;;  %3261 = vmatmul.mubr.bf16.vlgmr.msra.gmra.mrb[0].mxu1 %v2488_v41  ;;  %v2338_v41 = vld [vmem:[#allocation2 + $0x50] sm:$0x3] }
 0x1e7   : > { %3186 = vmatpush1.bf16.msra.mxu0 %v12602_v39  ;;  %3272 = vmatpush1.bf16.msra.mxu1 %v12605_v40  ;;  %v12691_v39 = vld [vmem:[#allocation7 + $0xbcc] ss:$16 sps:$4 sm:$0xff]   ;;  %v2334_v40 = vld [vmem:[#allocation2 + $0x10] sm:$0xfc]  ;;  %v2346_v15 = vpack.c.bf16 %v2338_v41, %v2338_v41 }
 0x1e8   : > { %3187 = vmatprep.subr.bf16.mxu0 %v12610_v42  ;;  %3273 = vmatprep.subr.bf16.mxu1 %v12613_v43  ;;  %v3486_v42 = vshrl.u32 %v3331_v36, 16  ;;  %v3489_v43 = vshll.u32 %v3331_v36, 16  ;;  %v12749_v36 = vld [vmem:[#allocation7 + $0xd08] ss:$16 sps:$4 sm:$0xff]   ;;  %v12760_v41 = vld [vmem:[#allocation7 + $0xd44] ss:$16 sps:$4 sm:$0xff]  }
 0x1e9   : > { %3217 = vmatprep.mubr.bf16.mxu0 %v2497_v44  ;;  %3303 = vmatprep.mubr.bf16.mxu1 %v2497_v44  ;;  %v3494_v44 = vshrl.u32 %v3335_v37, 16 }
 0x1eb   : > { %3188 = vmatpush1.bf16.msra.mxu0 %v12608_v45  ;;  %3274 = vmatpush1.bf16.msra.mxu1 %v12611_v46  ;;  %v3497_v45 = vshll.u32 %v3335_v37, 16  ;;  %v12686_v46 = vld [vmem:[#allocation7 + $0xbc0] ss:$16 sps:$4 sm:$0xff]   ;;  %v12754_v37 = vld [vmem:[#allocation7 + $0xd24] ss:$16 sps:$4 sm:$0xff]  }
 0x1ec   : > { %3189 = vmatprep.subr.bf16.mxu0 %v12616_v47  ;;  %3275 = vmatprep.subr.bf16.mxu1 %v12619_v48  ;;  %v12689_v47 = vld [vmem:[#allocation7 + $0xbc8] ss:$16 sps:$4 sm:$0xff]   ;;  %v2342_v48 = vpack.c.bf16 %v14600_v22, %v2334_v40 }
 0x1ed   : > { %v12755_v40 = vld [vmem:[#allocation7 + $0xd28] ss:$16 sps:$4 sm:$0xff]  }
 0x1ef   : > { %3190 = vmatpush1.bf16.msra.mxu0 %v12614_v49  ;;  %3276 = vmatpush1.bf16.msra.mxu1 %v12617_v50  ;;  %v12694_v49 = vld [vmem:[#allocation7 + $0xbe4] ss:$16 sps:$4 sm:$0xff]   ;;  %v12697_v50 = vld [vmem:[#allocation7 + $0xbec] ss:$16 sps:$4 sm:$0xff]  }
 0x1f0   : > { %3191 = vmatprep.subr.bf16.mxu0 %v12622_v51  ;;  %3277 = vmatprep.subr.bf16.mxu1 %v12625_v52  ;;  %v3488_v51 = vrot.slane %v3486_v42, 1  ;;  %v3491_v52 = vrot.slane %v3489_v43, 2  ;;  %v12763_v42 = vld [vmem:[#allocation7 + $0xd4c] ss:$16 sps:$4 sm:$0xff]   ;;  %v12758_v43 = vld [vmem:[#allocation7 + $0xd40] ss:$16 sps:$4 sm:$0xff]  }
 0x1f2   : > { %v3492_v22 = vor.u32 %v3491_v52, %v3488_v51  ;;  %v3326_v51 = vld [vmem:[#allocation2 + $0x40] sm:$0x7]  ;;  %v3325_v52 = vld [vmem:[#allocation2 + $0x18] sm:$0xf8] }
 0x1f3   : > { %3192 = vmatpush1.bf16.msra.mxu0 %v12620_v53  ;;  %3278 = vmatpush1.bf16.msra.mxu1 %v12623_v54  ;;  %v3496_v53 = vrot.slane %v3494_v44, 1  ;;  %v3499_v54 = vrot.slane %v3497_v45, 2  ;;  %v12761_v44 = vld [vmem:[#allocation7 + $0xd48] ss:$16 sps:$4 sm:$0xff]   ;;  %v12766_v45 = vld [vmem:[#allocation7 + $0xd64] ss:$16 sps:$4 sm:$0xff]  }
 0x1f4   : > { %3193 = vmatprep.subr.bf16.mxu0 %v12628_v56  ;;  %3279 = vmatprep.subr.bf16.mxu1 %v12631_v57  ;;  %v12692_v56 = vld [vmem:[#allocation7 + $0xbe0] ss:$16 sps:$4 sm:$0xff]   ;;  %v12695_v57 = vld [vmem:[#allocation7 + $0xbe8] ss:$16 sps:$4 sm:$0xff]  }
 0x1f7   : > { %3194 = vmatpush1.bf16.msra.mxu0 %v12626_v58  ;;  %3280 = vmatpush1.bf16.msra.mxu1 %v12629_v59  ;;  %v2492_v58 = vrot.slane %v2342_v48, 1  ;;  %v2493_v59 = vrot.slane %v2346_v15, 1  ;;  %v12767_v48 = vld [vmem:[#allocation7 + $0xd68] ss:$16 sps:$4 sm:$0xff]   ;;  %v12772_v15 = vld [vmem:[#allocation7 + $0xd84] ss:$16 sps:$4 sm:$0xff]  }
 0x1f8   : > { %3195 = vmatprep.subr.bf16.mxu0 %v12634_v60  ;;  %3281 = vmatprep.subr.bf16.mxu1 %v12637_v61  ;;  %v12700_v60 = vld [vmem:[#allocation7 + $0xc04] ss:$16 sps:$4 sm:$0xff]   ;;  %v12703_v61 = vld [vmem:[#allocation7 + $0xc0c] ss:$16 sps:$4 sm:$0xff]  }
 0x1fb   : > { %3196 = vmatpush1.bf16.msra.mxu0 %v12632_v62  ;;  %3282 = vmatpush1.bf16.msra.mxu1 %v12635_v63  ;;  %v3500_v62 = vor.u32 %v3499_v54, %v3496_v53  ;;  %v12698_v63 = vld [vmem:[#allocation7 + $0xc00] ss:$16 sps:$4 sm:$0xff]   ;;  %v12773_v54 = vld [vmem:[#allocation7 + $0xd88] ss:$16 sps:$4 sm:$0xff]  }
 0x1fc   : > { %3197 = vmatprep.subr.bf16.mxu0 %v12640_v0  ;;  %3283 = vmatprep.subr.bf16.mxu1 %v12643_v1  ;;  %v12701_v0 = vld [vmem:[#allocation7 + $0xc08] ss:$16 sps:$4 sm:$0xff]   ;;  %v2494_v1 = vsel %vm2485_vm2, %v2492_v58, %v2493_v59  ;;  %v12770_v53 = vld [vmem:[#allocation7 + $0xd80] ss:$16 sps:$4 sm:$0xff]   ;;  %v3334_v58 = vpack.c.bf16 %v3326_v51, %v3326_v51  ;;  %v12826_v51 = vld [vmem:[#allocation7 + $0xea4] ss:$16 sps:$4 sm:$0xff]  }
 0x1fd   : > { %v3329_v59 = vld [vmem:[#allocation2 + $0x58] sm:$0x7] }
 0x1ff   : > { %3198 = vmatpush1.bf16.msra.mxu0 %v12638_v2  ;;  %3284 = vmatpush1.bf16.msra.mxu1 %v12641_v3  ;;  %v12706_v2 = vld [vmem:[#allocation7 + $0xc24] ss:$16 sps:$4 sm:$0xff]   ;;  %v12709_v3 = vld [vmem:[#allocation7 + $0xc2c] ss:$16 sps:$4 sm:$0xff]  }
 0x200   : > { %3199 = vmatprep.subr.bf16.mxu0 %v12646_v4  ;;  %3285 = vmatprep.subr.bf16.mxu1 %v12649_v5  ;;  %v3501_v4 = vsel %vm3467_vm3, %v3492_v22, %v3500_v62  ;;  %v12704_v5 = vld [vmem:[#allocation7 + $0xc20] ss:$16 sps:$4 sm:$0xff]   ;;  %v12779_v62 = vld [vmem:[#allocation7 + $0xda8] ss:$16 sps:$4 sm:$0xff]  }
 0x201   : > { %v12776_v22 = vld [vmem:[#allocation7 + $0xda0] ss:$16 sps:$4 sm:$0xff]  }
 0x203   : > { %3200 = vmatpush1.bf16.msra.mxu0 %v12644_v6  ;;  %3286 = vmatpush1.bf16.msra.mxu1 %v12647_v8  ;;  %v12707_v6 = vld [vmem:[#allocation7 + $0xc28] ss:$16 sps:$4 sm:$0xff]   ;;  %v12712_v8 = vld [vmem:[#allocation7 + $0xc44] ss:$16 sps:$4 sm:$0xff]  }
 0x204   : > { %3201 = vmatprep.subr.bf16.mxu0 %v12652_v9  ;;  %3287 = vmatprep.subr.bf16.mxu1 %v12655_v10  ;;  %v12715_v9 = vld [vmem:[#allocation7 + $0xc4c] ss:$16 sps:$4 sm:$0xff]   ;;  %v12710_v10 = vld [vmem:[#allocation7 + $0xc40] ss:$16 sps:$4 sm:$0xff]  }
 0x207   : > { %3202 = vmatpush1.bf16.msra.mxu0 %v12650_v11  ;;  %3288 = vmatpush1.bf16.msra.mxu1 %v12653_v13  ;;  %v12713_v11 = vld [vmem:[#allocation7 + $0xc48] ss:$16 sps:$4 sm:$0xff]   ;;  %v12718_v13 = vld [vmem:[#allocation7 + $0xc64] ss:$16 sps:$4 sm:$0xff]  }
 0x208   : > { %3203 = vmatprep.subr.bf16.mxu0 %v12658_v14  ;;  %3289 = vmatprep.subr.bf16.mxu1 %v12661_v16  ;;  %v12721_v14 = vld [vmem:[#allocation7 + $0xc6c] ss:$16 sps:$4 sm:$0xff]   ;;  %v12716_v16 = vld [vmem:[#allocation7 + $0xc60] ss:$16 sps:$4 sm:$0xff]  }
 0x20b   : > { %3204 = vmatpush1.bf16.msra.mxu0 %v12656_v17  ;;  %3290 = vmatpush1.bf16.msra.mxu1 %v12659_v18  ;;  %v12719_v17 = vld [vmem:[#allocation7 + $0xc68] ss:$16 sps:$4 sm:$0xff]   ;;  %v12724_v18 = vld [vmem:[#allocation7 + $0xc84] ss:$16 sps:$4 sm:$0xff]  }
 0x20c   : > { %3205 = vmatprep.subr.bf16.mxu0 %v12664_v19  ;;  %3291 = vmatprep.subr.bf16.mxu1 %v12667_v20  ;;  %v12727_v19 = vld [vmem:[#allocation7 + $0xc8c] ss:$16 sps:$4 sm:$0xff]   ;;  %v12722_v20 = vld [vmem:[#allocation7 + $0xc80] ss:$16 sps:$4 sm:$0xff]  }
 0x20f   : > { %3206 = vmatpush1.bf16.msra.mxu0 %v12662_v21  ;;  %3292 = vmatpush1.bf16.msra.mxu1 %v12665_v23  ;;  %v12725_v21 = vld [vmem:[#allocation7 + $0xc88] ss:$16 sps:$4 sm:$0xff]   ;;  %v12730_v23 = vld [vmem:[#allocation7 + $0xca4] ss:$16 sps:$4 sm:$0xff]  }
 0x210   : > { %3207 = vmatprep.subr.bf16.mxu0 %v12670_v55  ;;  %3293 = vmatprep.subr.bf16.mxu1 %v12673_v7  ;;  %v12733_v55 = vld [vmem:[#allocation7 + $0xcac] ss:$16 sps:$4 sm:$0xff]   ;;  %v12728_v7 = vld [vmem:[#allocation7 + $0xca0] ss:$16 sps:$4 sm:$0xff]  }
 0x213   : > { %3208 = vmatpush1.bf16.msra.mxu0 %v12668_v24  ;;  %3294 = vmatpush1.bf16.msra.mxu1 %v12671_v25  ;;  %v12731_v24 = vld [vmem:[#allocation7 + $0xca8] ss:$16 sps:$4 sm:$0xff]   ;;  %v12736_v25 = vld [vmem:[#allocation7 + $0xcc4] ss:$16 sps:$4 sm:$0xff]  }
 0x214   : > { %3209 = vmatprep.subr.bf16.mxu0 %v12676_v26  ;;  %3295 = vmatprep.subr.bf16.mxu1 %v12679_v27  ;;  %v12739_v26 = vld [vmem:[#allocation7 + $0xccc] ss:$16 sps:$4 sm:$0xff]   ;;  %v12734_v27 = vld [vmem:[#allocation7 + $0xcc0] ss:$16 sps:$4 sm:$0xff]  }
 0x217   : > { %3210 = vmatpush1.bf16.msra.mxu0 %v12674_v30  ;;  %3296 = vmatpush1.bf16.msra.mxu1 %v12677_v31  ;;  %v12742_v30 = vld [vmem:[#allocation7 + $0xce4] ss:$16 sps:$4 sm:$0xff]   ;;  %v12745_v31 = vld [vmem:[#allocation7 + $0xcec] ss:$16 sps:$4 sm:$0xff]  }
 0x218   : > { %3211 = vmatprep.subr.bf16.mxu0 %v12682_v33  ;;  %3297 = vmatprep.subr.bf16.mxu1 %v12685_v34  ;;  %v12743_v33 = vld [vmem:[#allocation7 + $0xce8] ss:$16 sps:$4 sm:$0xff]   ;;  %v12748_v34 = vld [vmem:[#allocation7 + $0xd04] ss:$16 sps:$4 sm:$0xff]  }
 0x21b   : > { %3212 = vmatpush1.bf16.msra.mxu0 %v12680_v35  ;;  %3298 = vmatpush1.bf16.msra.mxu1 %v12683_v12  ;;  %v12751_v35 = vld [vmem:[#allocation7 + $0xd0c] ss:$16 sps:$4 sm:$0xff]   ;;  %v12746_v12 = vld [vmem:[#allocation7 + $0xd00] ss:$16 sps:$4 sm:$0xff]  }
 0x21c   : > { %3213 = vmatprep.subr.bf16.mxu0 %v12688_v38  ;;  %3299 = vmatprep.subr.bf16.mxu1 %v12691_v39  ;;  %v12757_v38 = vld [vmem:[#allocation7 + $0xd2c] ss:$16 sps:$4 sm:$0xff]   ;;  %v12752_v39 = vld [vmem:[#allocation7 + $0xd20] ss:$16 sps:$4 sm:$0xff]  }
 0x21f   : > { %3214 = vmatpush1.bf16.msra.mxu0 %v12686_v46  ;;  %3300 = vmatpush1.bf16.msra.mxu1 %v12689_v47  ;;  %v12769_v46 = vld [vmem:[#allocation7 + $0xd6c] ss:$16 sps:$4 sm:$0xff]   ;;  %v12764_v47 = vld [vmem:[#allocation7 + $0xd60] ss:$16 sps:$4 sm:$0xff]  }
 0x220   : > { %3215 = vmatprep.subr.bf16.mxu0 %v12694_v49  ;;  %3301 = vmatprep.subr.bf16.mxu1 %v12697_v50  ;;  %v12775_v49 = vld [vmem:[#allocation7 + $0xd8c] ss:$16 sps:$4 sm:$0xff]   ;;  %v3322_v50 = vld [vmem:[#allocation2] sm:$0xf8] }
 0x223   : > { %3216 = vmatpush1.bf16.msra.mxu0 %v12692_v56  ;;  %3302 = vmatpush1.bf16.msra.mxu1 %v12695_v57  ;;  %v14046_v56 = vld [vmem:[#allocation2 + $0x20] sm:$0xff] }
 0x224   : > { %4180 = vmatprep.subr.bf16.mxu0 %v12700_v60  ;;  %4266 = vmatprep.subr.bf16.mxu1 %v12703_v61  ;;  %v3330_v57 = vpack.c.bf16 %v14046_v56, %v3322_v50  ;;  %v12778_v60 = vld [vmem:[#allocation7 + $0xda4] ss:$16 sps:$4 sm:$0xff]   ;;  %v12781_v61 = vld [vmem:[#allocation7 + $0xdac] ss:$16 sps:$4 sm:$0xff]   ;;  %v12821_v50 = vld [vmem:[#allocation7 + $0xe88] ss:$16 sps:$4 sm:$0xff]  }
 0x225   : > { %v12832_v56 = vld [vmem:[#allocation7 + $0xec4] ss:$16 sps:$4 sm:$0xff]  }
 0x226   : > { %3218 = vmatmul.mubr.bf16.vlgmr.msra.gmra.mrb[0].mxu0 %v2494_v1  ;;  %3304 = vmatmul.mubr.bf16.vlgmr.msra.gmra.mrb[0].mxu1 %v2494_v1  ;;  %v3469_v1 = vshrl.u32 %v3330_v57, 16 }
 0x227   : > { %4181 = vmatpush1.bf16.msra.mxu0 %v12698_v63  ;;  %4267 = vmatpush1.bf16.msra.mxu1 %v12701_v0  ;;  %v3333_v63 = vpack.c.bf16 %v14605_v29, %v3325_v52  ;;  %v3337_v0 = vpack.c.bf16 %v3329_v59, %v3329_v59  ;;  %v12829_v52 = vld [vmem:[#allocation7 + $0xeac] ss:$16 sps:$4 sm:$0xff]   ;;  %v12833_v59 = vld [vmem:[#allocation7 + $0xec8] ss:$16 sps:$4 sm:$0xff]  }
 0x228   : > { %4182 = vmatprep.subr.bf16.mxu0 %v12706_v2  ;;  %4268 = vmatprep.subr.bf16.mxu1 %v12709_v3  ;;  %v3472_v2 = vshll.u32 %v3330_v57, 16  ;;  %v3477_v3 = vshrl.u32 %v3334_v58, 16  ;;  %v3471_v29 = vrot.slane %v3469_v1, 1  ;;  %v12835_v57 = vld [vmem:[#allocation7 + $0xecc] ss:$16 sps:$4 sm:$0xff]  }
 0x229   : > { %4212 = vmatprep.mubr.bf16.mxu0 %v3501_v4  ;;  %4298 = vmatprep.mubr.bf16.mxu1 %v3501_v4  ;;  %v3480_v4 = vshll.u32 %v3334_v58, 16  ;;  %v12830_v58 = vld [vmem:[#allocation7 + $0xec0] ss:$16 sps:$4 sm:$0xff]  }
 0x22a   : > { %v12842_v1 = vld [vmem:[#allocation7 + $0xf00] ss:$16 sps:$4 sm:$0xff]  }
 0x22b   : > { %4183 = vmatpush1.bf16.msra.mxu0 %v12704_v5  ;;  %4269 = vmatpush1.bf16.msra.mxu1 %v12707_v6  ;;  %v12784_v5 = vld [vmem:[#allocation7 + $0xdc4] ss:$16 sps:$4 sm:$0xff]   ;;  %v12787_v6 = vld [vmem:[#allocation7 + $0xdcc] ss:$16 sps:$4 sm:$0xff]  }
 0x22c   : > { %4184 = vmatprep.subr.bf16.mxu0 %v12712_v8  ;;  %4270 = vmatprep.subr.bf16.mxu1 %v12715_v9  ;;  %v12782_v8 = vld [vmem:[#allocation7 + $0xdc0] ss:$16 sps:$4 sm:$0xff]   ;;  %v12785_v9 = vld [vmem:[#allocation7 + $0xdc8] ss:$16 sps:$4 sm:$0xff]  }
 0x22f   : > { %4185 = vmatpush1.bf16.msra.mxu0 %v12710_v10  ;;  %4271 = vmatpush1.bf16.msra.mxu1 %v12713_v11  ;;  %v3520_v10 = vshrl.u32 %v3333_v63, 16  ;;  %v3523_v11 = vshll.u32 %v3333_v63, 16  ;;  %v12844_v63 = vld [vmem:[#allocation7 + $0xf04] ss:$16 sps:$4 sm:$0xff]  }
 0x230   : > { %4186 = vmatprep.subr.bf16.mxu0 %v12718_v13  ;;  %4272 = vmatprep.subr.bf16.mxu1 %v12721_v14  ;;  %v3528_v13 = vshrl.u32 %v3337_v0, 16  ;;  %v3531_v14 = vshll.u32 %v3337_v0, 16  ;;  %v12847_v0 = vld [vmem:[#allocation7 + $0xf0c] ss:$16 sps:$4 sm:$0xff]  }
 0x233   : > { %4187 = vmatpush1.bf16.msra.mxu0 %v12716_v16  ;;  %4273 = vmatpush1.bf16.msra.mxu1 %v12719_v17  ;;  %v3474_v16 = vrot.slane %v3472_v2, 2  ;;  %v3479_v17 = vrot.slane %v3477_v3, 1  ;;  %v12845_v2 = vld [vmem:[#allocation7 + $0xf08] ss:$16 sps:$4 sm:$0xff]   ;;  %v12850_v3 = vld [vmem:[#allocation7 + $0xf24] ss:$16 sps:$4 sm:$0xff]  }
 0x234   : > { %4188 = vmatprep.subr.bf16.mxu0 %v12724_v18  ;;  %4274 = vmatprep.subr.bf16.mxu1 %v12727_v19  ;;  %v3482_v18 = vrot.slane %v3480_v4, 2  ;;  %v12790_v19 = vld [vmem:[#allocation7 + $0xde4] ss:$16 sps:$4 sm:$0xff]   ;;  %v12853_v4 = vld [vmem:[#allocation7 + $0xf2c] ss:$16 sps:$4 sm:$0xff]  }
 0x237   : > { %4189 = vmatpush1.bf16.msra.mxu0 %v12722_v20  ;;  %4275 = vmatpush1.bf16.msra.mxu1 %v12725_v21  ;;  %v12793_v20 = vld [vmem:[#allocation7 + $0xdec] ss:$16 sps:$4 sm:$0xff]   ;;  %v3522_v21 = vrot.slane %v3520_v10, 1  ;;  %v12854_v10 = vld [vmem:[#allocation7 + $0xf40] ss:$16 sps:$4 sm:$0xff]  }
 0x238   : > { %4190 = vmatprep.subr.bf16.mxu0 %v12730_v23  ;;  %4276 = vmatprep.subr.bf16.mxu1 %v12733_v55  ;;  %v3525_v23 = vrot.slane %v3523_v11, 2  ;;  %v3530_v55 = vrot.slane %v3528_v13, 1  ;;  %v12857_v11 = vld [vmem:[#allocation7 + $0xf48] ss:$16 sps:$4 sm:$0xff]   ;;  %v12862_v13 = vld [vmem:[#allocation7 + $0xf64] ss:$16 sps:$4 sm:$0xff]  }
 0x23b   : > { %4191 = vmatpush1.bf16.msra.mxu0 %v12728_v7  ;;  %4277 = vmatpush1.bf16.msra.mxu1 %v12731_v24  ;;  %v3533_v7 = vrot.slane %v3531_v14, 2  ;;  %v12788_v24 = vld [vmem:[#allocation7 + $0xde0] ss:$16 sps:$4 sm:$0xff]   ;;  %v12865_v14 = vld [vmem:[#allocation7 + $0xf6c] ss:$16 sps:$4 sm:$0xff]  }
 0x23c   : > { %4192 = vmatprep.subr.bf16.mxu0 %v12736_v25  ;;  %4278 = vmatprep.subr.bf16.mxu1 %v12739_v26  ;;  %v12791_v25 = vld [vmem:[#allocation7 + $0xde8] ss:$16 sps:$4 sm:$0xff]   ;;  %v3475_v26 = vor.u32 %v3474_v16, %v3471_v29  ;;  %v12860_v29 = vld [vmem:[#allocation7 + $0xf60] ss:$16 sps:$4 sm:$0xff]  }
 0x23d   : > { %v12863_v16 = vld [vmem:[#allocation7 + $0xf68] ss:$16 sps:$4 sm:$0xff]  }
 0x23f   : > { %4193 = vmatpush1.bf16.msra.mxu0 %v12734_v27  ;;  %4279 = vmatpush1.bf16.msra.mxu1 %v12737_v28  ;;  %v3483_v27 = vor.u32 %v3482_v18, %v3479_v17  ;;  %v12796_v28 = vld [vmem:[#allocation7 + $0xe04] ss:$16 sps:$4 sm:$0xff]   ;;  %v3328_v18 = vld [vmem:[#allocation2 + $0x50] sm:$0x7] }
 0x240   : > { %4194 = vmatprep.subr.bf16.mxu0 %v12742_v30  ;;  %4280 = vmatprep.subr.bf16.mxu1 %v12745_v31  ;;  %v12799_v30 = vld [vmem:[#allocation7 + $0xe0c] ss:$16 sps:$4 sm:$0xff]   ;;  %v3526_v31 = vor.u32 %v3525_v23, %v3522_v21  ;;  %v3324_v17 = vld [vmem:[#allocation2 + $0x10] sm:$0xf8] }
 0x241   : > { %v14047_v21 = vld [vmem:[#allocation2 + $0x30] sm:$0xff] }
 0x242   : > { %v3332_v23 = vpack.c.bf16 %v14047_v21, %v3324_v17  ;;  %v12928_v17 = vld [vmem:[#allocation7 + $0x10c4] ss:$16 sps:$4 sm:$0xff]  }
 0x243   : > { %4195 = vmatpush1.bf16.msra.mxu0 %v12740_v32  ;;  %4281 = vmatpush1.bf16.msra.mxu1 %v12743_v33  ;;  %v3534_v32 = vor.u32 %v3533_v7, %v3530_v55  ;;  %v12794_v33 = vld [vmem:[#allocation7 + $0xe00] ss:$16 sps:$4 sm:$0xff]   ;;  %v3336_v55 = vpack.c.bf16 %v3328_v18, %v3328_v18  ;;  %v12931_v18 = vld [vmem:[#allocation7 + $0x10cc] ss:$16 sps:$4 sm:$0xff]   ;;  %v12934_v21 = vld [vmem:[#allocation7 + $0x10e4] ss:$16 sps:$4 sm:$0xff]  }
 0x244   : > { %4196 = vmatprep.subr.bf16.mxu0 %v12748_v34  ;;  %4282 = vmatprep.subr.bf16.mxu1 %v12751_v35  ;;  %v12797_v34 = vld [vmem:[#allocation7 + $0xe08] ss:$16 sps:$4 sm:$0xff]   ;;  %v3484_v35 = vsel %vm3467_vm3, %v3475_v26, %v3483_v27  ;;  %v12866_v7 = vld [vmem:[#allocation7 + $0xf80] ss:$16 sps:$4 sm:$0xff]   ;;  %v12877_v26 = vld [vmem:[#allocation7 + $0xfac] ss:$16 sps:$4 sm:$0xff]  }
 0x245   : > { %v3503_v27 = vshrl.u32 %v3332_v23, 16 }
 0x247   : > { %4197 = vmatpush1.bf16.msra.mxu0 %v12746_v12  ;;  %4283 = vmatpush1.bf16.msra.mxu1 %v12749_v36  ;;  %v12802_v12 = vld [vmem:[#allocation7 + $0xe24] ss:$16 sps:$4 sm:$0xff]   ;;  %v12805_v36 = vld [vmem:[#allocation7 + $0xe2c] ss:$16 sps:$4 sm:$0xff]  }
 0x248   : > { %4198 = vmatprep.subr.bf16.mxu0 %v12754_v37  ;;  %4284 = vmatprep.subr.bf16.mxu1 %v12757_v38  ;;  %v3535_v37 = vsel %vm3467_vm3, %v3526_v31, %v3534_v32  ;;  %v12800_v38 = vld [vmem:[#allocation7 + $0xe20] ss:$16 sps:$4 sm:$0xff]   ;;  %v12875_v32 = vld [vmem:[#allocation7 + $0xfa8] ss:$16 sps:$4 sm:$0xff]  }
 0x249   : > { %v12872_v31 = vld [vmem:[#allocation7 + $0xfa0] ss:$16 sps:$4 sm:$0xff]  }
 0x24b   : > { %4199 = vmatpush1.bf16.msra.mxu0 %v12752_v39  ;;  %4285 = vmatpush1.bf16.msra.mxu1 %v12755_v40  ;;  %v12803_v39 = vld [vmem:[#allocation7 + $0xe28] ss:$16 sps:$4 sm:$0xff]   ;;  %v12808_v40 = vld [vmem:[#allocation7 + $0xe44] ss:$16 sps:$4 sm:$0xff]  }
 0x24c   : > { %4200 = vmatprep.subr.bf16.mxu0 %v12760_v41  ;;  %4286 = vmatprep.subr.bf16.mxu1 %v12763_v42  ;;  %v12811_v41 = vld [vmem:[#allocation7 + $0xe4c] ss:$16 sps:$4 sm:$0xff]   ;;  %v12806_v42 = vld [vmem:[#allocation7 + $0xe40] ss:$16 sps:$4 sm:$0xff]  }
 0x24f   : > { %4201 = vmatpush1.bf16.msra.mxu0 %v12758_v43  ;;  %4287 = vmatpush1.bf16.msra.mxu1 %v12761_v44  ;;  %v12809_v43 = vld [vmem:[#allocation7 + $0xe48] ss:$16 sps:$4 sm:$0xff]   ;;  %v12814_v44 = vld [vmem:[#allocation7 + $0xe64] ss:$16 sps:$4 sm:$0xff]  }
 0x250   : > { %4202 = vmatprep.subr.bf16.mxu0 %v12766_v45  ;;  %4288 = vmatprep.subr.bf16.mxu1 %v12769_v46  ;;  %v12817_v45 = vld [vmem:[#allocation7 + $0xe6c] ss:$16 sps:$4 sm:$0xff]   ;;  %v12812_v46 = vld [vmem:[#allocation7 + $0xe60] ss:$16 sps:$4 sm:$0xff]  }
 0x253   : > { %4203 = vmatpush1.bf16.msra.mxu0 %v12764_v47  ;;  %4289 = vmatpush1.bf16.msra.mxu1 %v12767_v48  ;;  %v12815_v47 = vld [vmem:[#allocation7 + $0xe68] ss:$16 sps:$4 sm:$0xff]   ;;  %v12820_v48 = vld [vmem:[#allocation7 + $0xe84] ss:$16 sps:$4 sm:$0xff]  }
 0x254   : > { %4204 = vmatprep.subr.bf16.mxu0 %v12772_v15  ;;  %4290 = vmatprep.subr.bf16.mxu1 %v12775_v49  ;;  %v12823_v15 = vld [vmem:[#allocation7 + $0xe8c] ss:$16 sps:$4 sm:$0xff]   ;;  %v12818_v49 = vld [vmem:[#allocation7 + $0xe80] ss:$16 sps:$4 sm:$0xff]  }
 0x257   : > { %4205 = vmatpush1.bf16.msra.mxu0 %v12770_v53  ;;  %4291 = vmatpush1.bf16.msra.mxu1 %v12773_v54  ;;  %v12824_v53 = vld [vmem:[#allocation7 + $0xea0] ss:$16 sps:$4 sm:$0xff]   ;;  %v12827_v54 = vld [vmem:[#allocation7 + $0xea8] ss:$16 sps:$4 sm:$0xff]  }
 0x258   : > { %4206 = vmatprep.subr.bf16.mxu0 %v12778_v60  ;;  %4292 = vmatprep.subr.bf16.mxu1 %v12781_v61  ;;  %v12838_v60 = vld [vmem:[#allocation7 + $0xee4] ss:$16 sps:$4 sm:$0xff]   ;;  %v12841_v61 = vld [vmem:[#allocation7 + $0xeec] ss:$16 sps:$4 sm:$0xff]  }
 0x25b   : > { %4207 = vmatpush1.bf16.msra.mxu0 %v12776_v22  ;;  %4293 = vmatpush1.bf16.msra.mxu1 %v12779_v62  ;;  %v12836_v22 = vld [vmem:[#allocation7 + $0xee0] ss:$16 sps:$4 sm:$0xff]   ;;  %v12839_v62 = vld [vmem:[#allocation7 + $0xee8] ss:$16 sps:$4 sm:$0xff]  }
 0x25c   : > { %4208 = vmatprep.subr.bf16.mxu0 %v12784_v5  ;;  %4294 = vmatprep.subr.bf16.mxu1 %v12787_v6  ;;  %v12848_v5 = vld [vmem:[#allocation7 + $0xf20] ss:$16 sps:$4 sm:$0xff]   ;;  %v12851_v6 = vld [vmem:[#allocation7 + $0xf28] ss:$16 sps:$4 sm:$0xff]  }
 0x25f   : > { %4209 = vmatpush1.bf16.msra.mxu0 %v12782_v8  ;;  %4295 = vmatpush1.bf16.msra.mxu1 %v12785_v9  ;;  %v12856_v8 = vld [vmem:[#allocation7 + $0xf44] ss:$16 sps:$4 sm:$0xff]   ;;  %v12859_v9 = vld [vmem:[#allocation7 + $0xf4c] ss:$16 sps:$4 sm:$0xff]  }
 0x260   : > { %4210 = vmatprep.subr.bf16.mxu0 %v12790_v19  ;;  %4296 = vmatprep.subr.bf16.mxu1 %v12793_v20  ;;  %v12868_v19 = vld [vmem:[#allocation7 + $0xf84] ss:$16 sps:$4 sm:$0xff]   ;;  %v12871_v20 = vld [vmem:[#allocation7 + $0xf8c] ss:$16 sps:$4 sm:$0xff]  }
 0x263   : > { %4211 = vmatpush1.bf16.msra.mxu0 %v12788_v24  ;;  %4297 = vmatpush1.bf16.msra.mxu1 %v12791_v25  ;;  %v12869_v24 = vld [vmem:[#allocation7 + $0xf88] ss:$16 sps:$4 sm:$0xff]   ;;  %v12874_v25 = vld [vmem:[#allocation7 + $0xfa4] ss:$16 sps:$4 sm:$0xff]  }
 0x264   : > { %4223 = vmatprep.subr.bf16.mxu0 %v12796_v28  ;;  %4309 = vmatprep.subr.bf16.mxu1 %v12799_v30  ;;  %v3506_v28 = vshll.u32 %v3332_v23, 16  ;;  %v3511_v30 = vshrl.u32 %v3336_v55, 16  ;;  %v12937_v23 = vld [vmem:[#allocation7 + $0x10ec] ss:$16 sps:$4 sm:$0xff]  }
 0x266   : > { %4213 = vmatmul.mubr.bf16.vlgmr.msra.gmra.mrb[0].mxu0 %v3484_v35  ;;  %4299 = vmatmul.mubr.bf16.vlgmr.msra.gmra.mrb[0].mxu1 %v3484_v35  ;;  %v12883_v35 = vld [vmem:[#allocation7 + $0xfcc] ss:$16 sps:$4 sm:$0xff]  }
 0x267   : > { %4224 = vmatpush1.bf16.msra.mxu0 %v12794_v33  ;;  %4310 = vmatpush1.bf16.msra.mxu1 %v12797_v34  ;;  %v3514_v33 = vshll.u32 %v3336_v55, 16  ;;  %v12880_v34 = vld [vmem:[#allocation7 + $0xfc4] ss:$16 sps:$4 sm:$0xff]   ;;  %v12932_v55 = vld [vmem:[#allocation7 + $0x10e0] ss:$16 sps:$4 sm:$0xff]  }
 0x268   : > { %4225 = vmatprep.subr.bf16.mxu0 %v12802_v12  ;;  %4311 = vmatprep.subr.bf16.mxu1 %v12805_v36  ;;  %v12878_v12 = vld [vmem:[#allocation7 + $0xfc0] ss:$16 sps:$4 sm:$0xff]   ;;  %v12881_v36 = vld [vmem:[#allocation7 + $0xfc8] ss:$16 sps:$4 sm:$0xff]  }
 0x269   : > { %4255 = vmatprep.mubr.bf16.mxu0 %v3535_v37  ;;  %4341 = vmatprep.mubr.bf16.mxu1 %v3535_v37  ;;  %v3505_v37 = vrot.slane %v3503_v27, 1  ;;  %v12941_v27 = vld [vmem:[#allocation7 + $0x1108] ss:$16 sps:$4 sm:$0xff]  }
 0x26b   : > { %4226 = vmatpush1.bf16.msra.mxu0 %v12800_v38  ;;  %4312 = vmatpush1.bf16.msra.mxu1 %v12803_v39  ;;  %v3508_v38 = vrot.slane %v3506_v28, 2  ;;  %v3513_v39 = vrot.slane %v3511_v30, 1  ;;  %v12946_v28 = vld [vmem:[#allocation7 + $0x1124] ss:$16 sps:$4 sm:$0xff]   ;;  %v12949_v30 = vld [vmem:[#allocation7 + $0x112c] ss:$16 sps:$4 sm:$0xff]  }
 0x26c   : > { %4227 = vmatprep.subr.bf16.mxu0 %v12808_v40  ;;  %4313 = vmatprep.subr.bf16.mxu1 %v12811_v41  ;;  %v3516_v40 = vrot.slane %v3514_v33, 2  ;;  %v4361_v41 = vld [vmem:[#allocation2 + $0x8] sm:$0xf0]  ;;  %v12952_v33 = vld [vmem:[#allocation7 + $0x1144] ss:$16 sps:$4 sm:$0xff]  }
 0x26f   : > { %4228 = vmatpush1.bf16.msra.mxu0 %v12806_v42  ;;  %4314 = vmatpush1.bf16.msra.mxu1 %v12809_v43  ;;  %v4365_v42 = vld [vmem:[#allocation2 + $0x48] sm:$0xf]  ;;  %v12886_v43 = vld [vmem:[#allocation7 + $0xfe4] ss:$16 sps:$4 sm:$0xff]  }
 0x270   : > { %4229 = vmatprep.subr.bf16.mxu0 %v12814_v44  ;;  %4315 = vmatprep.subr.bf16.mxu1 %v12817_v45  ;;  %v12889_v44 = vld [vmem:[#allocation7 + $0xfec] ss:$16 sps:$4 sm:$0xff]  }
 0x271   : > { %v14048_v45 = vld [vmem:[#allocation2 + $0x28] sm:$0xff] }
 0x273   : > { %4230 = vmatpush1.bf16.msra.mxu0 %v12812_v46  ;;  %4316 = vmatpush1.bf16.msra.mxu1 %v12815_v47  ;;  %v4369_v46 = vpack.c.bf16 %v14048_v45, %v4361_v41  ;;  %v4373_v47 = vpack.c.bf16 %v4365_v42, %v4365_v42  ;;  %v12967_v41 = vld [vmem:[#allocation7 + $0x118c] ss:$16 sps:$4 sm:$0xff]   ;;  %v12962_v42 = vld [vmem:[#allocation7 + $0x1180] ss:$16 sps:$4 sm:$0xff]  }
 0x274   : > { %4231 = vmatprep.subr.bf16.mxu0 %v12820_v48  ;;  %4317 = vmatprep.subr.bf16.mxu1 %v12823_v15  ;;  %v12884_v48 = vld [vmem:[#allocation7 + $0xfe0] ss:$16 sps:$4 sm:$0xff]   ;;  %v12887_v15 = vld [vmem:[#allocation7 + $0xfe8] ss:$16 sps:$4 sm:$0xff]   ;;  %v12973_v45 = vld [vmem:[#allocation7 + $0x11ac] ss:$16 sps:$4 sm:$0xff]  }
 0x277   : > { %4232 = vmatpush1.bf16.msra.mxu0 %v12818_v49  ;;  %4318 = vmatpush1.bf16.msra.mxu1 %v12821_v50  ;;  %v3509_v49 = vor.u32 %v3508_v38, %v3505_v37  ;;  %v3517_v50 = vor.u32 %v3516_v40, %v3513_v39  ;;  %v12961_v37 = vld [vmem:[#allocation7 + $0x116c] ss:$16 sps:$4 sm:$0xff]   ;;  %v12956_v38 = vld [vmem:[#allocation7 + $0x1160] ss:$16 sps:$4 sm:$0xff]   ;;  %v12959_v39 = vld [vmem:[#allocation7 + $0x1168] ss:$16 sps:$4 sm:$0xff]  }
 0x278   : > { %4233 = vmatprep.subr.bf16.mxu0 %v12826_v51  ;;  %4319 = vmatprep.subr.bf16.mxu1 %v12829_v52  ;;  %v12892_v51 = vld [vmem:[#allocation7 + $0x1004] ss:$16 sps:$4 sm:$0xff]   ;;  %v12895_v52 = vld [vmem:[#allocation7 + $0x100c] ss:$16 sps:$4 sm:$0xff]  }
 0x279   : > { %v12964_v40 = vld [vmem:[#allocation7 + $0x1184] ss:$16 sps:$4 sm:$0xff]  }
 0x27b   : > { %4234 = vmatpush1.bf16.msra.mxu0 %v12824_v53  ;;  %4320 = vmatpush1.bf16.msra.mxu1 %v12827_v54  ;;  %v12890_v53 = vld [vmem:[#allocation7 + $0x1000] ss:$16 sps:$4 sm:$0xff]   ;;  %v12893_v54 = vld [vmem:[#allocation7 + $0x1008] ss:$16 sps:$4 sm:$0xff]  }
 0x27c   : > { %4235 = vmatprep.subr.bf16.mxu0 %v12832_v56  ;;  %4321 = vmatprep.subr.bf16.mxu1 %v12835_v57  ;;  %v12898_v56 = vld [vmem:[#allocation7 + $0x1024] ss:$16 sps:$4 sm:$0xff]   ;;  %v12901_v57 = vld [vmem:[#allocation7 + $0x102c] ss:$16 sps:$4 sm:$0xff]  }
 0x27f   : > { %4236 = vmatpush1.bf16.msra.mxu0 %v12830_v58  ;;  %4322 = vmatpush1.bf16.msra.mxu1 %v12833_v59  ;;  %v4517_v58 = vrot.slane %v4369_v46, 2  ;;  %v4518_v59 = vrot.slane %v4373_v47, 2  ;;  %v12968_v46 = vld [vmem:[#allocation7 + $0x11a0] ss:$16 sps:$4 sm:$0xff]   ;;  %v12971_v47 = vld [vmem:[#allocation7 + $0x11a8] ss:$16 sps:$4 sm:$0xff]  }
 0x280   : > { %4237 = vmatprep.subr.bf16.mxu0 %v12838_v60  ;;  %4323 = vmatprep.subr.bf16.mxu1 %v12841_v61  ;;  %v3518_v60 = vsel %vm3467_vm3, %v3509_v49, %v3517_v50  ;;  %v4360_v49 = vld [vmem:[#allocation2] sm:$0xf0]  ;;  %v4364_v50 = vld [vmem:[#allocation2 + $0x40] sm:$0xf] }
 0x281   : > { %v4519_v61 = vsel %vm4513_vm4, %v4517_v58, %v4518_v59  ;;  %v14049_v58 = vld [vmem:[#allocation2 + $0x20] sm:$0xff] }
 0x282   : > { %v4368_v59 = vpack.c.bf16 %v14049_v58, %v4360_v49  ;;  %v13046_v49 = vld [vmem:[#allocation7 + $0x1340] ss:$16 sps:$4 sm:$0xff]  }
 0x283   : > { %4238 = vmatpush1.bf16.msra.mxu0 %v12836_v22  ;;  %4324 = vmatpush1.bf16.msra.mxu1 %v12839_v62  ;;  %v12896_v22 = vld [vmem:[#allocation7 + $0x1020] ss:$16 sps:$4 sm:$0xff]   ;;  %v12899_v62 = vld [vmem:[#allocation7 + $0x1028] ss:$16 sps:$4 sm:$0xff]  }
 0x284   : > { %4239 = vmatprep.subr.bf16.mxu0 %v12844_v63  ;;  %4325 = vmatprep.subr.bf16.mxu1 %v12847_v0  ;;  %v12904_v63 = vld [vmem:[#allocation7 + $0x1044] ss:$16 sps:$4 sm:$0xff]   ;;  %v12907_v0 = vld [vmem:[#allocation7 + $0x104c] ss:$16 sps:$4 sm:$0xff]   ;;  %v13058_v58 = vld [vmem:[#allocation7 + $0x1380] ss:$16 sps:$4 sm:$0xff]  }
 0x287   : > { %4240 = vmatpush1.bf16.msra.mxu0 %v12842_v1  ;;  %4326 = vmatpush1.bf16.msra.mxu1 %v12845_v2  ;;  %v12902_v1 = vld [vmem:[#allocation7 + $0x1040] ss:$16 sps:$4 sm:$0xff]   ;;  %v12905_v2 = vld [vmem:[#allocation7 + $0x1048] ss:$16 sps:$4 sm:$0xff]  }
 0x288   : > { %4241 = vmatprep.subr.bf16.mxu0 %v12850_v3  ;;  %4327 = vmatprep.subr.bf16.mxu1 %v12853_v4  ;;  %v12910_v3 = vld [vmem:[#allocation7 + $0x1064] ss:$16 sps:$4 sm:$0xff]   ;;  %v12913_v4 = vld [vmem:[#allocation7 + $0x106c] ss:$16 sps:$4 sm:$0xff]  }
 0x28b   : > { %4242 = vmatpush1.bf16.msra.mxu0 %v12848_v5  ;;  %4328 = vmatpush1.bf16.msra.mxu1 %v12851_v6  ;;  %v12908_v5 = vld [vmem:[#allocation7 + $0x1060] ss:$16 sps:$4 sm:$0xff]   ;;  %v12911_v6 = vld [vmem:[#allocation7 + $0x1068] ss:$16 sps:$4 sm:$0xff]  }
 0x28c   : > { %4243 = vmatprep.subr.bf16.mxu0 %v12856_v8  ;;  %4329 = vmatprep.subr.bf16.mxu1 %v12859_v9  ;;  %v12916_v8 = vld [vmem:[#allocation7 + $0x1084] ss:$16 sps:$4 sm:$0xff]   ;;  %v12919_v9 = vld [vmem:[#allocation7 + $0x108c] ss:$16 sps:$4 sm:$0xff]  }
 0x28f   : > { %4244 = vmatpush1.bf16.msra.mxu0 %v12854_v10  ;;  %4330 = vmatpush1.bf16.msra.mxu1 %v12857_v11  ;;  %v12914_v10 = vld [vmem:[#allocation7 + $0x1080] ss:$16 sps:$4 sm:$0xff]   ;;  %v12917_v11 = vld [vmem:[#allocation7 + $0x1088] ss:$16 sps:$4 sm:$0xff]  }
 0x290   : > { %4245 = vmatprep.subr.bf16.mxu0 %v12862_v13  ;;  %4331 = vmatprep.subr.bf16.mxu1 %v12865_v14  ;;  %v12922_v13 = vld [vmem:[#allocation7 + $0x10a4] ss:$16 sps:$4 sm:$0xff]   ;;  %v12925_v14 = vld [vmem:[#allocation7 + $0x10ac] ss:$16 sps:$4 sm:$0xff]  }
 0x293   : > { %4246 = vmatpush1.bf16.msra.mxu0 %v12860_v29  ;;  %4332 = vmatpush1.bf16.msra.mxu1 %v12863_v16  ;;  %v12920_v29 = vld [vmem:[#allocation7 + $0x10a0] ss:$16 sps:$4 sm:$0xff]   ;;  %v12923_v16 = vld [vmem:[#allocation7 + $0x10a8] ss:$16 sps:$4 sm:$0xff]  }
 0x294   : > { %4247 = vmatprep.subr.bf16.mxu0 %v12868_v19  ;;  %4333 = vmatprep.subr.bf16.mxu1 %v12871_v20  ;;  %v12926_v19 = vld [vmem:[#allocation7 + $0x10c0] ss:$16 sps:$4 sm:$0xff]   ;;  %v12929_v20 = vld [vmem:[#allocation7 + $0x10c8] ss:$16 sps:$4 sm:$0xff]  }
 0x297   : > { %4248 = vmatpush1.bf16.msra.mxu0 %v12866_v7  ;;  %4334 = vmatpush1.bf16.msra.mxu1 %v12869_v24  ;;  %v12935_v7 = vld [vmem:[#allocation7 + $0x10e8] ss:$16 sps:$4 sm:$0xff]   ;;  %v12940_v24 = vld [vmem:[#allocation7 + $0x1104] ss:$16 sps:$4 sm:$0xff]  }
 0x298   : > { %4249 = vmatprep.subr.bf16.mxu0 %v12874_v25  ;;  %4335 = vmatprep.subr.bf16.mxu1 %v12877_v26  ;;  %v12943_v25 = vld [vmem:[#allocation7 + $0x110c] ss:$16 sps:$4 sm:$0xff]   ;;  %v12938_v26 = vld [vmem:[#allocation7 + $0x1100] ss:$16 sps:$4 sm:$0xff]  }
 0x29b   : > { %4250 = vmatpush1.bf16.msra.mxu0 %v12872_v31  ;;  %4336 = vmatpush1.bf16.msra.mxu1 %v12875_v32  ;;  %v12944_v31 = vld [vmem:[#allocation7 + $0x1120] ss:$16 sps:$4 sm:$0xff]   ;;  %v12947_v32 = vld [vmem:[#allocation7 + $0x1128] ss:$16 sps:$4 sm:$0xff]  }
 0x29c   : > { %4251 = vmatprep.subr.bf16.mxu0 %v12880_v34  ;;  %4337 = vmatprep.subr.bf16.mxu1 %v12883_v35  ;;  %v12955_v34 = vld [vmem:[#allocation7 + $0x114c] ss:$16 sps:$4 sm:$0xff]   ;;  %v12950_v35 = vld [vmem:[#allocation7 + $0x1140] ss:$16 sps:$4 sm:$0xff]  }
 0x29f   : > { %4252 = vmatpush1.bf16.msra.mxu0 %v12878_v12  ;;  %4338 = vmatpush1.bf16.msra.mxu1 %v12881_v36  ;;  %v12953_v12 = vld [vmem:[#allocation7 + $0x1148] ss:$16 sps:$4 sm:$0xff]   ;;  %v12958_v36 = vld [vmem:[#allocation7 + $0x1164] ss:$16 sps:$4 sm:$0xff]  }
 0x2a0   : > { %4253 = vmatprep.subr.bf16.mxu0 %v12886_v43  ;;  %4339 = vmatprep.subr.bf16.mxu1 %v12889_v44  ;;  %v12965_v43 = vld [vmem:[#allocation7 + $0x1188] ss:$16 sps:$4 sm:$0xff]   ;;  %v12970_v44 = vld [vmem:[#allocation7 + $0x11a4] ss:$16 sps:$4 sm:$0xff]  }
 0x2a3   : > { %4254 = vmatpush1.bf16.msra.mxu0 %v12884_v48  ;;  %4340 = vmatpush1.bf16.msra.mxu1 %v12887_v15  ;;  %v12976_v48 = vld [vmem:[#allocation7 + $0x11c4] ss:$16 sps:$4 sm:$0xff]   ;;  %v12979_v15 = vld [vmem:[#allocation7 + $0x11cc] ss:$16 sps:$4 sm:$0xff]  }
 0x2a4   : > { %5170 = vmatprep.subr.bf16.mxu0 %v12892_v51  ;;  %5256 = vmatprep.subr.bf16.mxu1 %v12895_v52  ;;  %v12974_v51 = vld [vmem:[#allocation7 + $0x11c0] ss:$16 sps:$4 sm:$0xff]   ;;  %v12977_v52 = vld [vmem:[#allocation7 + $0x11c8] ss:$16 sps:$4 sm:$0xff]  }
 0x2a6   : > { %4256 = vmatmul.mubr.bf16.vlgmr.msra.gmra.mrb[0].mxu0 %v3518_v60  ;;  %4342 = vmatmul.mubr.bf16.vlgmr.msra.gmra.mrb[0].mxu1 %v3518_v60  ;;  %v4372_v60 = vpack.c.bf16 %v4364_v50, %v4364_v50  ;;  %v13049_v50 = vld [vmem:[#allocation7 + $0x1348] ss:$16 sps:$4 sm:$0xff]  }
 0x2a7   : > { %5171 = vmatpush1.bf16.msra.mxu0 %v12890_v53  ;;  %5257 = vmatpush1.bf16.msra.mxu1 %v12893_v54  ;;  %v4363_v53 = vld [vmem:[#allocation2 + $0x18] sm:$0xf0]  ;;  %v4367_v54 = vld [vmem:[#allocation2 + $0x58] sm:$0xf] }
 0x2a8   : > { %5172 = vmatprep.subr.bf16.mxu0 %v12898_v56  ;;  %5258 = vmatprep.subr.bf16.mxu1 %v12901_v57  ;;  %v12982_v56 = vld [vmem:[#allocation7 + $0x11e4] ss:$16 sps:$4 sm:$0xff]   ;;  %v12985_v57 = vld [vmem:[#allocation7 + $0x11ec] ss:$16 sps:$4 sm:$0xff]  }
 0x2a9   : > { %5202 = vmatprep.mubr.bf16.mxu0 %v4519_v61  ;;  %5288 = vmatprep.mubr.bf16.mxu1 %v4519_v61  ;;  %v12980_v61 = vld [vmem:[#allocation7 + $0x11e0] ss:$16 sps:$4 sm:$0xff]  }
 0x2ab   : > { %5173 = vmatpush1.bf16.msra.mxu0 %v12896_v22  ;;  %5259 = vmatpush1.bf16.msra.mxu1 %v12899_v62  ;;  %v12983_v22 = vld [vmem:[#allocation7 + $0x11e8] ss:$16 sps:$4 sm:$0xff]   ;;  %v12988_v62 = vld [vmem:[#allocation7 + $0x1204] ss:$16 sps:$4 sm:$0xff]  }
 0x2ac   : > { %5174 = vmatprep.subr.bf16.mxu0 %v12904_v63  ;;  %5260 = vmatprep.subr.bf16.mxu1 %v12907_v0  ;;  %v12991_v63 = vld [vmem:[#allocation7 + $0x120c] ss:$16 sps:$4 sm:$0xff]  }
 0x2ad   : > { %v14050_v0 = vld [vmem:[#allocation2 + $0x38] sm:$0xff] }
 0x2af   : > { %5175 = vmatpush1.bf16.msra.mxu0 %v12902_v1  ;;  %5261 = vmatpush1.bf16.msra.mxu1 %v12905_v2  ;;  %v4371_v1 = vpack.c.bf16 %v14050_v0, %v4363_v53  ;;  %v4375_v2 = vpack.c.bf16 %v4367_v54, %v4367_v54  ;;  %v13052_v53 = vld [vmem:[#allocation7 + $0x1360] ss:$16 sps:$4 sm:$0xff]   ;;  %v13055_v54 = vld [vmem:[#allocation7 + $0x1368] ss:$16 sps:$4 sm:$0xff]   ;;  %v13075_v0 = vld [vmem:[#allocation7 + $0x13cc] ss:$16 sps:$4 sm:$0xff]  }
 0x2b0   : > { %5176 = vmatprep.subr.bf16.mxu0 %v12910_v3  ;;  %5262 = vmatprep.subr.bf16.mxu1 %v12913_v4  ;;  %v4514_v3 = vrot.slane %v4368_v59, 2  ;;  %v4515_v4 = vrot.slane %v4372_v60, 2  ;;  %v13061_v59 = vld [vmem:[#allocation7 + $0x1388] ss:$16 sps:$4 sm:$0xff]   ;;  %v13066_v60 = vld [vmem:[#allocation7 + $0x13a4] ss:$16 sps:$4 sm:$0xff]  }
 0x2b3   : > { %5177 = vmatpush1.bf16.msra.mxu0 %v12908_v5  ;;  %5263 = vmatpush1.bf16.msra.mxu1 %v12911_v6  ;;  %v12986_v5 = vld [vmem:[#allocation7 + $0x1200] ss:$16 sps:$4 sm:$0xff]   ;;  %v12989_v6 = vld [vmem:[#allocation7 + $0x1208] ss:$16 sps:$4 sm:$0xff]  }
 0x2b4   : > { %5178 = vmatprep.subr.bf16.mxu0 %v12916_v8  ;;  %5264 = vmatprep.subr.bf16.mxu1 %v12919_v9  ;;  %v12994_v8 = vld [vmem:[#allocation7 + $0x1224] ss:$16 sps:$4 sm:$0xff]   ;;  %v12997_v9 = vld [vmem:[#allocation7 + $0x122c] ss:$16 sps:$4 sm:$0xff]  }
 0x2b7   : > { %5179 = vmatpush1.bf16.msra.mxu0 %v12914_v10  ;;  %5265 = vmatpush1.bf16.msra.mxu1 %v12917_v11  ;;  %v4523_v10 = vrot.slane %v4371_v1, 2  ;;  %v4524_v11 = vrot.slane %v4375_v2, 2  ;;  %v4362_v1 = vld [vmem:[#allocation2 + $0x10] sm:$0xf0]  ;;  %v4366_v2 = vld [vmem:[#allocation2 + $0x50] sm:$0xf] }
 0x2b8   : > { %5180 = vmatprep.subr.bf16.mxu0 %v12922_v13  ;;  %5266 = vmatprep.subr.bf16.mxu1 %v12925_v14  ;;  %v4516_v13 = vsel %vm4513_vm4, %v4514_v3, %v4515_v4  ;;  %v12992_v14 = vld [vmem:[#allocation7 + $0x1220] ss:$16 sps:$4 sm:$0xff]   ;;  %v13073_v4 = vld [vmem:[#allocation7 + $0x13c8] ss:$16 sps:$4 sm:$0xff]  }
 0x2b9   : > { %v13070_v3 = vld [vmem:[#allocation7 + $0x13c0] ss:$16 sps:$4 sm:$0xff]  }
 0x2bb   : > { %5181 = vmatpush1.bf16.msra.mxu0 %v12920_v29  ;;  %5267 = vmatpush1.bf16.msra.mxu1 %v12923_v16  ;;  %v12995_v29 = vld [vmem:[#allocation7 + $0x1228] ss:$16 sps:$4 sm:$0xff]   ;;  %v13000_v16 = vld [vmem:[#allocation7 + $0x1244] ss:$16 sps:$4 sm:$0xff]  }
 0x2bc   : > { %5182 = vmatprep.subr.bf16.mxu0 %v12928_v17  ;;  %5268 = vmatprep.subr.bf16.mxu1 %v12931_v18  ;;  %v13003_v17 = vld [vmem:[#allocation7 + $0x124c] ss:$16 sps:$4 sm:$0xff]   ;;  %v4525_v18 = vsel %vm4513_vm4, %v4523_v10, %v4524_v11  ;;  %v4374_v10 = vpack.c.bf16 %v4366_v2, %v4366_v2  ;;  %v13076_v11 = vld [vmem:[#allocation7 + $0x13e0] ss:$16 sps:$4 sm:$0xff]   ;;  %v13157_v2 = vld [vmem:[#allocation9 + $0x588] ss:$16 sps:$4 sm:$0xff]  }
 0x2bf   : > { %5183 = vmatpush1.bf16.msra.mxu0 %v12926_v19  ;;  %5269 = vmatpush1.bf16.msra.mxu1 %v12929_v20  ;;  %v12998_v19 = vld [vmem:[#allocation7 + $0x1240] ss:$16 sps:$4 sm:$0xff]   ;;  %v13001_v20 = vld [vmem:[#allocation7 + $0x1248] ss:$16 sps:$4 sm:$0xff]  }
 0x2c0   : > { %5184 = vmatprep.subr.bf16.mxu0 %v12934_v21  ;;  %5270 = vmatprep.subr.bf16.mxu1 %v12937_v23  ;;  %v13006_v21 = vld [vmem:[#allocation7 + $0x1264] ss:$16 sps:$4 sm:$0xff]   ;;  %v13009_v23 = vld [vmem:[#allocation7 + $0x126c] ss:$16 sps:$4 sm:$0xff]  }
 0x2c3   : > { %5185 = vmatpush1.bf16.msra.mxu0 %v12932_v55  ;;  %5271 = vmatpush1.bf16.msra.mxu1 %v12935_v7  ;;  %v13004_v55 = vld [vmem:[#allocation7 + $0x1260] ss:$16 sps:$4 sm:$0xff]   ;;  %v13007_v7 = vld [vmem:[#allocation7 + $0x1268] ss:$16 sps:$4 sm:$0xff]  }
 0x2c4   : > { %5186 = vmatprep.subr.bf16.mxu0 %v12940_v24  ;;  %5272 = vmatprep.subr.bf16.mxu1 %v12943_v25  ;;  %v13012_v24 = vld [vmem:[#allocation7 + $0x1284] ss:$16 sps:$4 sm:$0xff]   ;;  %v13015_v25 = vld [vmem:[#allocation7 + $0x128c] ss:$16 sps:$4 sm:$0xff]  }
 0x2c7   : > { %5187 = vmatpush1.bf16.msra.mxu0 %v12938_v26  ;;  %5273 = vmatpush1.bf16.msra.mxu1 %v12941_v27  ;;  %v13010_v26 = vld [vmem:[#allocation7 + $0x1280] ss:$16 sps:$4 sm:$0xff]   ;;  %v13013_v27 = vld [vmem:[#allocation7 + $0x1288] ss:$16 sps:$4 sm:$0xff]  }
 0x2c8   : > { %5188 = vmatprep.subr.bf16.mxu0 %v12946_v28  ;;  %5274 = vmatprep.subr.bf16.mxu1 %v12949_v30  ;;  %v13018_v28 = vld [vmem:[#allocation7 + $0x12a4] ss:$16 sps:$4 sm:$0xff]   ;;  %v13021_v30 = vld [vmem:[#allocation7 + $0x12ac] ss:$16 sps:$4 sm:$0xff]  }
 0x2cb   : > { %5189 = vmatpush1.bf16.msra.mxu0 %v12944_v31  ;;  %5275 = vmatpush1.bf16.msra.mxu1 %v12947_v32  ;;  %v13016_v31 = vld [vmem:[#allocation7 + $0x12a0] ss:$16 sps:$4 sm:$0xff]   ;;  %v13019_v32 = vld [vmem:[#allocation7 + $0x12a8] ss:$16 sps:$4 sm:$0xff]  }
 0x2cc   : > { %5190 = vmatprep.subr.bf16.mxu0 %v12952_v33  ;;  %5276 = vmatprep.subr.bf16.mxu1 %v12955_v34  ;;  %v13024_v33 = vld [vmem:[#allocation7 + $0x12c4] ss:$16 sps:$4 sm:$0xff]   ;;  %v13027_v34 = vld [vmem:[#allocation7 + $0x12cc] ss:$16 sps:$4 sm:$0xff]  }
 0x2cf   : > { %5191 = vmatpush1.bf16.msra.mxu0 %v12950_v35  ;;  %5277 = vmatpush1.bf16.msra.mxu1 %v12953_v12  ;;  %v13022_v35 = vld [vmem:[#allocation7 + $0x12c0] ss:$16 sps:$4 sm:$0xff]   ;;  %v13025_v12 = vld [vmem:[#allocation7 + $0x12c8] ss:$16 sps:$4 sm:$0xff]  }
 0x2d0   : > { %5192 = vmatprep.subr.bf16.mxu0 %v12958_v36  ;;  %5278 = vmatprep.subr.bf16.mxu1 %v12961_v37  ;;  %v13030_v36 = vld [vmem:[#allocation7 + $0x12e4] ss:$16 sps:$4 sm:$0xff]   ;;  %v13033_v37 = vld [vmem:[#allocation7 + $0x12ec] ss:$16 sps:$4 sm:$0xff]  }
 0x2d3   : > { %5193 = vmatpush1.bf16.msra.mxu0 %v12956_v38  ;;  %5279 = vmatpush1.bf16.msra.mxu1 %v12959_v39  ;;  %v13028_v38 = vld [vmem:[#allocation7 + $0x12e0] ss:$16 sps:$4 sm:$0xff]   ;;  %v13031_v39 = vld [vmem:[#allocation7 + $0x12e8] ss:$16 sps:$4 sm:$0xff]  }
 0x2d4   : > { %5194 = vmatprep.subr.bf16.mxu0 %v12964_v40  ;;  %5280 = vmatprep.subr.bf16.mxu1 %v12967_v41  ;;  %v13036_v40 = vld [vmem:[#allocation7 + $0x1304] ss:$16 sps:$4 sm:$0xff]   ;;  %v13039_v41 = vld [vmem:[#allocation7 + $0x130c] ss:$16 sps:$4 sm:$0xff]  }
 0x2d7   : > { %5195 = vmatpush1.bf16.msra.mxu0 %v12962_v42  ;;  %5281 = vmatpush1.bf16.msra.mxu1 %v12965_v43  ;;  %v13034_v42 = vld [vmem:[#allocation7 + $0x1300] ss:$16 sps:$4 sm:$0xff]   ;;  %v13037_v43 = vld [vmem:[#allocation7 + $0x1308] ss:$16 sps:$4 sm:$0xff]  }
 0x2d8   : > { %5196 = vmatprep.subr.bf16.mxu0 %v12970_v44  ;;  %5282 = vmatprep.subr.bf16.mxu1 %v12973_v45  ;;  %v13042_v44 = vld [vmem:[#allocation7 + $0x1324] ss:$16 sps:$4 sm:$0xff]   ;;  %v13045_v45 = vld [vmem:[#allocation7 + $0x132c] ss:$16 sps:$4 sm:$0xff]  }
 0x2db   : > { %5197 = vmatpush1.bf16.msra.mxu0 %v12968_v46  ;;  %5283 = vmatpush1.bf16.msra.mxu1 %v12971_v47  ;;  %v13040_v46 = vld [vmem:[#allocation7 + $0x1320] ss:$16 sps:$4 sm:$0xff]   ;;  %v13043_v47 = vld [vmem:[#allocation7 + $0x1328] ss:$16 sps:$4 sm:$0xff]  }
 0x2dc   : > { %5198 = vmatprep.subr.bf16.mxu0 %v12976_v48  ;;  %5284 = vmatprep.subr.bf16.mxu1 %v12979_v15  ;;  %v13048_v48 = vld [vmem:[#allocation7 + $0x1344] ss:$16 sps:$4 sm:$0xff]   ;;  %v13051_v15 = vld [vmem:[#allocation7 + $0x134c] ss:$16 sps:$4 sm:$0xff]  }
 0x2df   : > { %5199 = vmatpush1.bf16.msra.mxu0 %v12974_v51  ;;  %5285 = vmatpush1.bf16.msra.mxu1 %v12977_v52  ;;  %v13054_v51 = vld [vmem:[#allocation7 + $0x1364] ss:$16 sps:$4 sm:$0xff]   ;;  %v13057_v52 = vld [vmem:[#allocation7 + $0x136c] ss:$16 sps:$4 sm:$0xff]  }
 0x2e0   : > { %5200 = vmatprep.subr.bf16.mxu0 %v12982_v56  ;;  %5286 = vmatprep.subr.bf16.mxu1 %v12985_v57  ;;  %v13060_v56 = vld [vmem:[#allocation7 + $0x1384] ss:$16 sps:$4 sm:$0xff]   ;;  %v13063_v57 = vld [vmem:[#allocation7 + $0x138c] ss:$16 sps:$4 sm:$0xff]  }
 0x2e3   : > { %5201 = vmatpush1.bf16.msra.mxu0 %v12980_v61  ;;  %5287 = vmatpush1.bf16.msra.mxu1 %v12983_v22  ;;  %v13069_v61 = vld [vmem:[#allocation7 + $0x13ac] ss:$16 sps:$4 sm:$0xff]   ;;  %v13064_v22 = vld [vmem:[#allocation7 + $0x13a0] ss:$16 sps:$4 sm:$0xff]  }
 0x2e4   : > { %5213 = vmatprep.subr.bf16.mxu0 %v12988_v62  ;;  %5299 = vmatprep.subr.bf16.mxu1 %v12991_v63  ;;  %v13067_v62 = vld [vmem:[#allocation7 + $0x13a8] ss:$16 sps:$4 sm:$0xff]   ;;  %v13072_v63 = vld [vmem:[#allocation7 + $0x13c4] ss:$16 sps:$4 sm:$0xff]  }
 0x2e6   : > { %5203 = vmatmul.mubr.bf16.vlgmr.msra.gmra.mrb[0].mxu0 %v4516_v13  ;;  %5289 = vmatmul.mubr.bf16.vlgmr.msra.gmra.mrb[0].mxu1 %v4516_v13  ;;  %v13079_v13 = vld [vmem:[#allocation7 + $0x13e8] ss:$16 sps:$4 sm:$0xff]  }
 0x2e7   : > { %5214 = vmatpush1.bf16.msra.mxu0 %v12986_v5  ;;  %5300 = vmatpush1.bf16.msra.mxu1 %v12989_v6  ;;  %v13078_v5 = vld [vmem:[#allocation7 + $0x13e4] ss:$16 sps:$4 sm:$0xff]   ;;  %v13081_v6 = vld [vmem:[#allocation7 + $0x13ec] ss:$16 sps:$4 sm:$0xff]  }
 0x2e8   : > { %5215 = vmatprep.subr.bf16.mxu0 %v12994_v8  ;;  %5301 = vmatprep.subr.bf16.mxu1 %v12997_v9  ;;  %v14051_v8 = vld [vmem:[#allocation2 + $0x30] sm:$0xff] }
 0x2e9   : > { %5245 = vmatprep.mubr.bf16.mxu0 %v4525_v18  ;;  %5331 = vmatprep.mubr.bf16.mxu1 %v4525_v18  ;;  %v4370_v9 = vpack.c.bf16 %v14051_v8, %v4362_v1  ;;  %v13082_v18 = vld [vmem:[#allocation9 + $0x400] ss:$16 sps:$4 sm:$0xff]   ;;  %v13168_v8 = vld [vmem:[#allocation9 + $0x5c4] ss:$16 sps:$4 sm:$0xff]  }
 0x2ea   : > { %v13154_v1 = vld [vmem:[#allocation9 + $0x580] ss:$16 sps:$4 sm:$0xff]  }
 0x2eb   : > { %5216 = vmatpush1.bf16.msra.mxu0 %v12992_v14  ;;  %5302 = vmatpush1.bf16.msra.mxu1 %v12995_v29  ;;  %v13084_v14 = vld [vmem:[#allocation9 + $0x404] ss:$16 sps:$4 sm:$0xff]   ;;  %v13087_v29 = vld [vmem:[#allocation9 + $0x40c] ss:$16 sps:$4 sm:$0xff]  }
 0x2ec   : > { %5217 = vmatprep.subr.bf16.mxu0 %v13000_v16  ;;  %5303 = vmatprep.subr.bf16.mxu1 %v13003_v17  ;;  %v4520_v16 = vrot.slane %v4370_v9, 2  ;;  %v4521_v17 = vrot.slane %v4374_v10, 2  ;;  %v13171_v9 = vld [vmem:[#allocation9 + $0x5cc] ss:$16 sps:$4 sm:$0xff]   ;;  %v13166_v10 = vld [vmem:[#allocation9 + $0x5c0] ss:$16 sps:$4 sm:$0xff]  }
 0x2ef   : > { %5218 = vmatpush1.bf16.msra.mxu0 %v12998_v19  ;;  %5304 = vmatpush1.bf16.msra.mxu1 %v13001_v20  ;;  %v13085_v19 = vld [vmem:[#allocation9 + $0x408] ss:$16 sps:$4 sm:$0xff]   ;;  %v13090_v20 = vld [vmem:[#allocation9 + $0x424] ss:$16 sps:$4 sm:$0xff]  }
 0x2f0   : > { %5219 = vmatprep.subr.bf16.mxu0 %v13006_v21  ;;  %5305 = vmatprep.subr.bf16.mxu1 %v13009_v23  ;;  %v13093_v21 = vld [vmem:[#allocation9 + $0x42c] ss:$16 sps:$4 sm:$0xff]   ;;  %v4522_v23 = vsel %vm4513_vm4, %v4520_v16, %v4521_v17  ;;  %v13175_v16 = vld [vmem:[#allocation9 + $0x5e8] ss:$16 sps:$4 sm:$0xff]   ;;  %v13180_v17 = vld [vmem:[#allocation9 + $0x604] ss:$16 sps:$4 sm:$0xff]  }
 0x2f3   : > { %5220 = vmatpush1.bf16.msra.mxu0 %v13004_v55  ;;  %5306 = vmatpush1.bf16.msra.mxu1 %v13007_v7  ;;  %v13088_v55 = vld [vmem:[#allocation9 + $0x420] ss:$16 sps:$4 sm:$0xff]   ;;  %v13091_v7 = vld [vmem:[#allocation9 + $0x428] ss:$16 sps:$4 sm:$0xff]  }
 0x2f4   : > { %5221 = vmatprep.subr.bf16.mxu0 %v13012_v24  ;;  %5307 = vmatprep.subr.bf16.mxu1 %v13015_v25  ;;  %v13096_v24 = vld [vmem:[#allocation9 + $0x444] ss:$16 sps:$4 sm:$0xff]   ;;  %v13099_v25 = vld [vmem:[#allocation9 + $0x44c] ss:$16 sps:$4 sm:$0xff]  }
 0x2f7   : > { %5222 = vmatpush1.bf16.msra.mxu0 %v13010_v26  ;;  %5308 = vmatpush1.bf16.msra.mxu1 %v13013_v27  ;;  %v13094_v26 = vld [vmem:[#allocation9 + $0x440] ss:$16 sps:$4 sm:$0xff]   ;;  %v13097_v27 = vld [vmem:[#allocation9 + $0x448] ss:$16 sps:$4 sm:$0xff]  }
 0x2f8   : > { %5223 = vmatprep.subr.bf16.mxu0 %v13018_v28  ;;  %5309 = vmatprep.subr.bf16.mxu1 %v13021_v30  ;;  %v13102_v28 = vld [vmem:[#allocation9 + $0x464] ss:$16 sps:$4 sm:$0xff]   ;;  %v13105_v30 = vld [vmem:[#allocation9 + $0x46c] ss:$16 sps:$4 sm:$0xff]  }
 0x2fb   : > { %5224 = vmatpush1.bf16.msra.mxu0 %v13016_v31  ;;  %5310 = vmatpush1.bf16.msra.mxu1 %v13019_v32  ;;  %v13100_v31 = vld [vmem:[#allocation9 + $0x460] ss:$16 sps:$4 sm:$0xff]   ;;  %v13103_v32 = vld [vmem:[#allocation9 + $0x468] ss:$16 sps:$4 sm:$0xff]  }
 0x2fc   : > { %5225 = vmatprep.subr.bf16.mxu0 %v13024_v33  ;;  %5311 = vmatprep.subr.bf16.mxu1 %v13027_v34  ;;  %v13108_v33 = vld [vmem:[#allocation9 + $0x484] ss:$16 sps:$4 sm:$0xff]   ;;  %v13111_v34 = vld [vmem:[#allocation9 + $0x48c] ss:$16 sps:$4 sm:$0xff]  }
 0x2ff   : > { %5226 = vmatpush1.bf16.msra.mxu0 %v13022_v35  ;;  %5312 = vmatpush1.bf16.msra.mxu1 %v13025_v12  ;;  %v13106_v35 = vld [vmem:[#allocation9 + $0x480] ss:$16 sps:$4 sm:$0xff]   ;;  %v13109_v12 = vld [vmem:[#allocation9 + $0x488] ss:$16 sps:$4 sm:$0xff]  }
 0x300   : > { %5227 = vmatprep.subr.bf16.mxu0 %v13030_v36  ;;  %5313 = vmatprep.subr.bf16.mxu1 %v13033_v37  ;;  %v13114_v36 = vld [vmem:[#allocation9 + $0x4a4] ss:$16 sps:$4 sm:$0xff]   ;;  %v13117_v37 = vld [vmem:[#allocation9 + $0x4ac] ss:$16 sps:$4 sm:$0xff]  }
 0x303   : > { %5228 = vmatpush1.bf16.msra.mxu0 %v13028_v38  ;;  %5314 = vmatpush1.bf16.msra.mxu1 %v13031_v39  ;;  %v13112_v38 = vld [vmem:[#allocation9 + $0x4a0] ss:$16 sps:$4 sm:$0xff]   ;;  %v13115_v39 = vld [vmem:[#allocation9 + $0x4a8] ss:$16 sps:$4 sm:$0xff]  }
 0x304   : > { %5229 = vmatprep.subr.bf16.mxu0 %v13036_v40  ;;  %5315 = vmatprep.subr.bf16.mxu1 %v13039_v41  ;;  %v13120_v40 = vld [vmem:[#allocation9 + $0x4c4] ss:$16 sps:$4 sm:$0xff]   ;;  %v13123_v41 = vld [vmem:[#allocation9 + $0x4cc] ss:$16 sps:$4 sm:$0xff]  }
 0x307   : > { %5230 = vmatpush1.bf16.msra.mxu0 %v13034_v42  ;;  %5316 = vmatpush1.bf16.msra.mxu1 %v13037_v43  ;;  %v13118_v42 = vld [vmem:[#allocation9 + $0x4c0] ss:$16 sps:$4 sm:$0xff]   ;;  %v13121_v43 = vld [vmem:[#allocation9 + $0x4c8] ss:$16 sps:$4 sm:$0xff]  }
 0x308   : > { %5231 = vmatprep.subr.bf16.mxu0 %v13042_v44  ;;  %5317 = vmatprep.subr.bf16.mxu1 %v13045_v45  ;;  %v13126_v44 = vld [vmem:[#allocation9 + $0x4e4] ss:$16 sps:$4 sm:$0xff]   ;;  %v13129_v45 = vld [vmem:[#allocation9 + $0x4ec] ss:$16 sps:$4 sm:$0xff]  }
 0x30b   : > { %5232 = vmatpush1.bf16.msra.mxu0 %v13040_v46  ;;  %5318 = vmatpush1.bf16.msra.mxu1 %v13043_v47  ;;  %v13124_v46 = vld [vmem:[#allocation9 + $0x4e0] ss:$16 sps:$4 sm:$0xff]   ;;  %v13127_v47 = vld [vmem:[#allocation9 + $0x4e8] ss:$16 sps:$4 sm:$0xff]  }
 0x30c   : > { %5233 = vmatprep.subr.bf16.mxu0 %v13048_v48  ;;  %5319 = vmatprep.subr.bf16.mxu1 %v13051_v15  ;;  %v13132_v48 = vld [vmem:[#allocation9 + $0x504] ss:$16 sps:$4 sm:$0xff]   ;;  %v13135_v15 = vld [vmem:[#allocation9 + $0x50c] ss:$16 sps:$4 sm:$0xff]  }
 0x30f   : > { %5234 = vmatpush1.bf16.msra.mxu0 %v13046_v49  ;;  %5320 = vmatpush1.bf16.msra.mxu1 %v13049_v50  ;;  %v13130_v49 = vld [vmem:[#allocation9 + $0x500] ss:$16 sps:$4 sm:$0xff]   ;;  %v13133_v50 = vld [vmem:[#allocation9 + $0x508] ss:$16 sps:$4 sm:$0xff]  }
 0x310   : > { %5235 = vmatprep.subr.bf16.mxu0 %v13054_v51  ;;  %5321 = vmatprep.subr.bf16.mxu1 %v13057_v52  ;;  %v13138_v51 = vld [vmem:[#allocation9 + $0x524] ss:$16 sps:$4 sm:$0xff]   ;;  %v13141_v52 = vld [vmem:[#allocation9 + $0x52c] ss:$16 sps:$4 sm:$0xff]  }
 0x313   : > { %5236 = vmatpush1.bf16.msra.mxu0 %v13052_v53  ;;  %5322 = vmatpush1.bf16.msra.mxu1 %v13055_v54  ;;  %v13136_v53 = vld [vmem:[#allocation9 + $0x520] ss:$16 sps:$4 sm:$0xff]   ;;  %v13139_v54 = vld [vmem:[#allocation9 + $0x528] ss:$16 sps:$4 sm:$0xff]  }
 0x314   : > { %5237 = vmatprep.subr.bf16.mxu0 %v13060_v56  ;;  %5323 = vmatprep.subr.bf16.mxu1 %v13063_v57  ;;  %v13144_v56 = vld [vmem:[#allocation9 + $0x544] ss:$16 sps:$4 sm:$0xff]   ;;  %v13147_v57 = vld [vmem:[#allocation9 + $0x54c] ss:$16 sps:$4 sm:$0xff]  }
 0x317   : > { %5238 = vmatpush1.bf16.msra.mxu0 %v13058_v58  ;;  %5324 = vmatpush1.bf16.msra.mxu1 %v13061_v59  ;;  %v13142_v58 = vld [vmem:[#allocation9 + $0x540] ss:$16 sps:$4 sm:$0xff]   ;;  %v13145_v59 = vld [vmem:[#allocation9 + $0x548] ss:$16 sps:$4 sm:$0xff]  }
 0x318   : > { %5239 = vmatprep.subr.bf16.mxu0 %v13066_v60  ;;  %5325 = vmatprep.subr.bf16.mxu1 %v13069_v61  ;;  %v13150_v60 = vld [vmem:[#allocation9 + $0x564] ss:$16 sps:$4 sm:$0xff]   ;;  %v13153_v61 = vld [vmem:[#allocation9 + $0x56c] ss:$16 sps:$4 sm:$0xff]  }
 0x31b   : > { %5240 = vmatpush1.bf16.msra.mxu0 %v13064_v22  ;;  %5326 = vmatpush1.bf16.msra.mxu1 %v13067_v62  ;;  %v13148_v22 = vld [vmem:[#allocation9 + $0x560] ss:$16 sps:$4 sm:$0xff]   ;;  %v13151_v62 = vld [vmem:[#allocation9 + $0x568] ss:$16 sps:$4 sm:$0xff]  }
 0x31c   : > { %5241 = vmatprep.subr.bf16.mxu0 %v13072_v63  ;;  %5327 = vmatprep.subr.bf16.mxu1 %v13075_v0  ;;  %v13156_v63 = vld [vmem:[#allocation9 + $0x584] ss:$16 sps:$4 sm:$0xff]   ;;  %v13159_v0 = vld [vmem:[#allocation9 + $0x58c] ss:$16 sps:$4 sm:$0xff]  }
 0x31f   : > { %5242 = vmatpush1.bf16.msra.mxu0 %v13070_v3  ;;  %5328 = vmatpush1.bf16.msra.mxu1 %v13073_v4  ;;  %v13160_v3 = vld [vmem:[#allocation9 + $0x5a0] ss:$16 sps:$4 sm:$0xff]   ;;  %v13162_v4 = vld [vmem:[#allocation9 + $0x5a4] ss:$16 sps:$4 sm:$0xff]  }
 0x320   : > { %5243 = vmatprep.subr.bf16.mxu0 %v13078_v5  ;;  %5329 = vmatprep.subr.bf16.mxu1 %v13081_v6  ;;  %v13163_v5 = vld [vmem:[#allocation9 + $0x5a8] ss:$16 sps:$4 sm:$0xff]   ;;  %v13165_v6 = vld [vmem:[#allocation9 + $0x5ac] ss:$16 sps:$4 sm:$0xff]  }
 0x323   : > { %5244 = vmatpush1.bf16.msra.mxu0 %v13076_v11  ;;  %5330 = vmatpush1.bf16.msra.mxu1 %v13079_v13  ;;  %v13169_v11 = vld [vmem:[#allocation9 + $0x5c8] ss:$16 sps:$4 sm:$0xff]   ;;  %v13174_v13 = vld [vmem:[#allocation9 + $0x5e4] ss:$16 sps:$4 sm:$0xff]  }
 0x324   : > { %6409 = vmatprep.subr.bf16.mxu0 %v13084_v14  ;;  %6495 = vmatprep.subr.bf16.mxu1 %v13087_v29  ;;  %v13177_v14 = vld [vmem:[#allocation9 + $0x5ec] ss:$16 sps:$4 sm:$0xff]   ;;  %v13172_v29 = vld [vmem:[#allocation9 + $0x5e0] ss:$16 sps:$4 sm:$0xff]  }
 0x326   : > { %5246 = vmatmul.mubr.bf16.vlgmr.msra.gmra.mrb[0].mxu0 %v4522_v23  ;;  %5332 = vmatmul.mubr.bf16.vlgmr.msra.gmra.mrb[0].mxu1 %v4522_v23 }
 0x327   : > { %6410 = vmatpush1.bf16.msra.mxu0 %v13082_v18  ;;  %6496 = vmatpush1.bf16.msra.mxu1 %v13085_v19  ;;  %v13183_v18 = vld [vmem:[#allocation9 + $0x60c] ss:$16 sps:$4 sm:$0xff]   ;;  %v5352_v19 = vlaneseq }
 0x328   : > { %6411 = vmatprep.subr.bf16.mxu0 %v13090_v20  ;;  %6497 = vmatprep.subr.bf16.mxu1 %v13093_v21 }
 0x329   : > { %v14622_v20 = vshrl.u32 %v5352_v19, 7 }
 0x32b   : > { %6412 = vmatpush1.bf16.msra.mxu0 %v13088_v55  ;;  %6498 = vmatpush1.bf16.msra.mxu1 %v13091_v7  ;;  %v5354_v21 = vsub.s32 0, %v14622_v20  ;;  %v5362_v23 = vsub.s32 2, %v14622_v20  ;;  %v5350_v55 = vld [vmem:[#allocation10] sm:$0xf]  ;;  %v5358_v7 = vsub.s32 1, %v14622_v20 }
 0x32c   : > { %6413 = vmatprep.subr.bf16.mxu0 %v13096_v24  ;;  %6499 = vmatprep.subr.bf16.mxu1 %v13099_v25  ;;  %v5366_v24 = vsub.s32 3, %v14622_v20 }
 0x32d   : > { %v5355_v25 = vrot.slane %v5350_v55, %v5354_v21 }
 0x32f   : > { %6414 = vmatpush1.bf16.msra.mxu0 %v13094_v26  ;;  %6500 = vmatpush1.bf16.msra.mxu1 %v13097_v27  ;;  %v5363_v26 = vrot.slane %v5350_v55, %v5362_v23  ;;  %v5359_v27 = vrot.slane %v5350_v55, %v5358_v7 }
 0x330   : > { %6415 = vmatprep.subr.bf16.mxu0 %v13102_v28  ;;  %6501 = vmatprep.subr.bf16.mxu1 %v13105_v30  ;;  %v5367_v28 = vrot.slane %v5350_v55, %v5366_v24 }
 0x333   : > { %6416 = vmatpush1.bf16.msra.mxu0 %v13100_v31  ;;  %6502 = vmatpush1.bf16.msra.mxu1 %v13103_v32 }
 0x334   : > { %6417 = vmatprep.subr.bf16.mxu0 %v13108_v33  ;;  %6503 = vmatprep.subr.bf16.mxu1 %v13111_v34 }
 0x337   : > { %6418 = vmatpush1.bf16.msra.mxu0 %v13106_v35  ;;  %6504 = vmatpush1.bf16.msra.mxu1 %v13109_v12 }
 0x338   : > { %6419 = vmatprep.subr.bf16.mxu0 %v13114_v36  ;;  %6505 = vmatprep.subr.bf16.mxu1 %v13117_v37 }
 0x33b   : > { %6420 = vmatpush1.bf16.msra.mxu0 %v13112_v38  ;;  %6506 = vmatpush1.bf16.msra.mxu1 %v13115_v39 }
 0x33c   : > { %6421 = vmatprep.subr.bf16.mxu0 %v13120_v40  ;;  %6507 = vmatprep.subr.bf16.mxu1 %v13123_v41 }
 0x33f   : > { %6422 = vmatpush1.bf16.msra.mxu0 %v13118_v42  ;;  %6508 = vmatpush1.bf16.msra.mxu1 %v13121_v43 }
 0x340   : > { %6423 = vmatprep.subr.bf16.mxu0 %v13126_v44  ;;  %6509 = vmatprep.subr.bf16.mxu1 %v13129_v45 }
 0x343   : > { %6424 = vmatpush1.bf16.msra.mxu0 %v13124_v46  ;;  %6510 = vmatpush1.bf16.msra.mxu1 %v13127_v47 }
 0x344   : > { %6425 = vmatprep.subr.bf16.mxu0 %v13132_v48  ;;  %6511 = vmatprep.subr.bf16.mxu1 %v13135_v15 }
 0x347   : > { %6426 = vmatpush1.bf16.msra.mxu0 %v13130_v49  ;;  %6512 = vmatpush1.bf16.msra.mxu1 %v13133_v50 }
 0x348   : > { %6427 = vmatprep.subr.bf16.mxu0 %v13138_v51  ;;  %6513 = vmatprep.subr.bf16.mxu1 %v13141_v52 }
 0x34b   : > { %6428 = vmatpush1.bf16.msra.mxu0 %v13136_v53  ;;  %6514 = vmatpush1.bf16.msra.mxu1 %v13139_v54 }
 0x34c   : > { %6429 = vmatprep.subr.bf16.mxu0 %v13144_v56  ;;  %6515 = vmatprep.subr.bf16.mxu1 %v13147_v57 }
 0x34f   : > { %6430 = vmatpush1.bf16.msra.mxu0 %v13142_v58  ;;  %6516 = vmatpush1.bf16.msra.mxu1 %v13145_v59 }
 0x350   : > { %6431 = vmatprep.subr.bf16.mxu0 %v13150_v60  ;;  %6517 = vmatprep.subr.bf16.mxu1 %v13153_v61 }
 0x353   : > { %6432 = vmatpush1.bf16.msra.mxu0 %v13148_v22  ;;  %6518 = vmatpush1.bf16.msra.mxu1 %v13151_v62 }
 0x354   : > { %6433 = vmatprep.subr.bf16.mxu0 %v13156_v63  ;;  %6519 = vmatprep.subr.bf16.mxu1 %v13159_v0 }
 0x357   : > { %6434 = vmatpush1.bf16.msra.mxu0 %v13154_v1  ;;  %6520 = vmatpush1.bf16.msra.mxu1 %v13157_v2 }
 0x358   : > { %6435 = vmatprep.subr.bf16.mxu0 %v13162_v4  ;;  %6521 = vmatprep.subr.bf16.mxu1 %v13165_v6 }
 0x35b   : > { %6436 = vmatpush1.bf16.msra.mxu0 %v13160_v3  ;;  %6522 = vmatpush1.bf16.msra.mxu1 %v13163_v5 }
 0x35c   : > { %6437 = vmatprep.subr.bf16.mxu0 %v13168_v8  ;;  %6523 = vmatprep.subr.bf16.mxu1 %v13171_v9 }
 0x35f   : > { %6438 = vmatpush1.bf16.msra.mxu0 %v13166_v10  ;;  %6524 = vmatpush1.bf16.msra.mxu1 %v13169_v11 }
 0x360   : > { %6439 = vmatprep.subr.bf16.mxu0 %v13174_v13  ;;  %6525 = vmatprep.subr.bf16.mxu1 %v13177_v14 }
 0x363   : > { %6440 = vmatpush1.bf16.msra.mxu0 %v13172_v29  ;;  %6526 = vmatpush1.bf16.msra.mxu1 %v13175_v16 }
 0x364   : > { %6452 = vmatprep.subr.bf16.mxu0 %v13180_v17  ;;  %6538 = vmatprep.subr.bf16.mxu1 %v13183_v18 }
 0x3f9   : > { %v5247_v30 = vpop.f32.mrb[0].mxu0  ;;  %v5333_v31 = vpop.f32.mrb[0].mxu1 }
 0x3fa   : > { %v5372_v32 = vadd.f32 %v5355_v25, %v5247_v30  ;;  %v5374_v33 = vadd.f32 %v5363_v26, %v5333_v31  ;;  %v5249_v34 = vpop.f32.mrb[1].mxu0  ;;  %v5335_v35 = vpop.f32.mrb[1].mxu1 }
 0x3fb   : > { %v5373_v12 = vadd.f32 %v5359_v27, %v5249_v34  ;;  %v5375_v36 = vadd.f32 %v5367_v28, %v5335_v35  ;;  %v5251_v37 = vpop.f32.mrb[2].mxu0  ;;  %v5337_v38 = vpop.f32.mrb[2].mxu1  ;;  %v13178_v35 = vld [vmem:[#allocation9 + $0x600] ss:$16 sps:$4 sm:$0xff]  }
 0x3fc   : > { %v5380_v39 = vmax.f32 %v5372_v32, 0.0  ;;  %v5382_v40 = vmax.f32 %v5374_v33, 0.0  ;;  %v5376_v41 = vadd.f32 %v5355_v25, %v5251_v37  ;;  %v5378_v42 = vadd.f32 %v5363_v26, %v5337_v38  ;;  %v5253_v43 = vpop.f32.mrb[3].mxu0  ;;  %v5339_v44 = vpop.f32.mrb[3].mxu1 }
 0x3fd   : > { %v5381_v45 = vmax.f32 %v5373_v12, 0.0  ;;  %v5383_v46 = vmax.f32 %v5375_v36, 0.0  ;;  %v5377_v47 = vadd.f32 %v5359_v27, %v5253_v43  ;;  %v5379_v48 = vadd.f32 %v5367_v28, %v5339_v44  ;;  %v13181_v12 = vld [vmem:[#allocation9 + $0x608] ss:$16 sps:$4 sm:$0xff]   ;;  %v13184_v43 = vld [vmem:[#allocation9 + $0x620] ss:$16 sps:$4 sm:$0xff]  }
 0x3fe   : > { %v5396_v15 = vrot.slane %v5380_v39, 6  ;;  %v5398_v49 = vrot.slane %v5382_v40, 6  ;;  %v5384_v50 = vmax.f32 %v5376_v41, 0.0  ;;  %v5386_v51 = vmax.f32 %v5378_v42, 0.0  ;;  %v13186_v40 = vld [vmem:[#allocation9 + $0x624] ss:$16 sps:$4 sm:$0xff]  }
 0x3ff   : > { %v5397_v52 = vrot.slane %v5381_v45, 6  ;;  %v5399_v53 = vrot.slane %v5383_v46, 6  ;;  %v5385_v54 = vmax.f32 %v5377_v47, 0.0  ;;  %v5387_v56 = vmax.f32 %v5379_v48, 0.0  ;;  %v13189_v41 = vld [vmem:[#allocation9 + $0x62c] ss:$16 sps:$4 sm:$0xff]  }
 0x400   : > { %5420 = vst [vmem:[#allocation3] sm:$0xfc] %v5396_v15  ;;  %5422 = vst [vmem:[#allocation3 + $0x10] sm:$0xfc] %v5398_v49  ;;  %v5400_v57 = vrot.slane %v5384_v50, 6  ;;  %v5404_v58 = vrot.slane %v5386_v51, 6 }
 0x401   : > { %5421 = vst [vmem:[#allocation3 + $0x8] sm:$0xfc] %v5397_v52  ;;  %5423 = vst [vmem:[#allocation3 + $0x18] sm:$0xfc] %v5399_v53  ;;  %v5402_v59 = vrot.slane %v5385_v54, 6  ;;  %v5406_v60 = vrot.slane %v5387_v56, 6 }
 0x402   : > { %v14637_v61 = vsel %vm333_vm0, %v5396_v15, %v5400_v57  ;;  %5428 = vst [vmem:[#allocation3 + $0x40] sm:$0x3] %v5400_v57  ;;  %v14640_v22 = vsel %vm333_vm0, %v5398_v49, %v5404_v58  ;;  %5430 = vst [vmem:[#allocation3 + $0x50] sm:$0x3] %v5404_v58  ;;  %v13187_v44 = vld [vmem:[#allocation9 + $0x628] ss:$16 sps:$4 sm:$0xff]  }
 0x403   : > { %5424 = vst [vmem:[#allocation3 + $0x20] sm:$0xff] %v14637_v61  ;;  %5426 = vst [vmem:[#allocation3 + $0x30] sm:$0xff] %v14640_v22  ;;  %v14645_v62 = vsel %vm333_vm0, %v5397_v52, %v5402_v59  ;;  %v14648_v63 = vsel %vm333_vm0, %v5399_v53, %v5406_v60  ;;  %v13192_v45 = vld [vmem:[#allocation9 + $0x644] ss:$16 sps:$4 sm:$0xff]   ;;  %v13195_v46 = vld [vmem:[#allocation9 + $0x64c] ss:$16 sps:$4 sm:$0xff]  }
 0x404   : > { %5429 = vst [vmem:[#allocation3 + $0x48] sm:$0x3] %v5402_v59  ;;  %5431 = vst [vmem:[#allocation3 + $0x58] sm:$0x3] %v5406_v60  ;;  %v13190_v47 = vld [vmem:[#allocation9 + $0x640] ss:$16 sps:$4 sm:$0xff]  }
 0x405   : > { %5425 = vst [vmem:[#allocation3 + $0x28] sm:$0xff] %v14645_v62  ;;  %5427 = vst [vmem:[#allocation3 + $0x38] sm:$0xff] %v14648_v63  ;;  %v13193_v48 = vld [vmem:[#allocation9 + $0x648] ss:$16 sps:$4 sm:$0xff]   ;;  %v13198_v15 = vld [vmem:[#allocation9 + $0x664] ss:$16 sps:$4 sm:$0xff]  }
 0x406   : > { %v13201_v49 = vld [vmem:[#allocation9 + $0x66c] ss:$16 sps:$4 sm:$0xff]   ;;  %v13196_v50 = vld [vmem:[#allocation9 + $0x660] ss:$16 sps:$4 sm:$0xff]   ;;  %v13199_v51 = vld [vmem:[#allocation9 + $0x668] ss:$16 sps:$4 sm:$0xff]  }
 0x407   : > { %v5572_v0 = vld [vmem:[#allocation3] sm:$0xfe]  ;;  %v13207_v53 = vld [vmem:[#allocation9 + $0x68c] ss:$16 sps:$4 sm:$0xff]   ;;  %v13205_v56 = vld [vmem:[#allocation9 + $0x688] ss:$16 sps:$4 sm:$0xff]  }
 0x408   : > { %v5573_v1 = vld [vmem:[#allocation3 + $0x8] sm:$0xfe]  ;;  %v5580_v2 = vpack.c.bf16 %v14637_v61, %v5572_v0  ;;  %v5575_v3 = vld [vmem:[#allocation3 + $0x18] sm:$0xfe]  ;;  %v13204_v52 = vld [vmem:[#allocation9 + $0x684] ss:$16 sps:$4 sm:$0xff]  }
 0x409   : > { %v5581_v4 = vpack.c.bf16 %v14645_v62, %v5573_v1  ;;  %v5576_v5 = vld [vmem:[#allocation3 + $0x40] sm:$0x1]  ;;  %v5583_v6 = vpack.c.bf16 %v14648_v63, %v5575_v3  ;;  %v13210_v57 = vld [vmem:[#allocation9 + $0x6a4] ss:$16 sps:$4 sm:$0xff]   ;;  %v13213_v58 = vld [vmem:[#allocation9 + $0x6ac] ss:$16 sps:$4 sm:$0xff]  }
 0x40a   : > { %v5584_v9 = vpack.c.bf16 %v5576_v5, %v5576_v5  ;;  %v5720_v10 = vshll.u32 %v5580_v2, 16  ;;  %v5718_v16 = vshrl.u32 %v5580_v2, 16  ;;  %v13202_v54 = vld [vmem:[#allocation9 + $0x680] ss:$16 sps:$4 sm:$0xff]   ;;  %v13211_v60 = vld [vmem:[#allocation9 + $0x6a8] ss:$16 sps:$4 sm:$0xff]  }
 0x40b   : > { %v5577_v8 = vld [vmem:[#allocation3 + $0x48] sm:$0x1]  ;;  %v5579_v11 = vld [vmem:[#allocation3 + $0x58] sm:$0x1]  ;;  %v5732_v14 = vshll.u32 %v5581_v4, 16  ;;  %v5756_v19 = vshll.u32 %v5583_v6, 16 }
 0x40c   : > { %v5585_v13 = vpack.c.bf16 %v5577_v8, %v5577_v8  ;;  %v5587_v29 = vpack.c.bf16 %v5579_v11, %v5579_v11  ;;  %v5722_v17 = vrot.slane %v5720_v10, 1  ;;  %v5725_v18 = vshll.u32 %v5584_v9, 16  ;;  %v13208_v59 = vld [vmem:[#allocation9 + $0x6a0] ss:$16 sps:$4 sm:$0xff]   ;;  %v13216_v0 = vld [vmem:[#allocation9 + $0x6c4] ss:$16 sps:$4 sm:$0xff]  }
 0x40d   : > { %v5730_v55 = vshrl.u32 %v5581_v4, 16  ;;  %v5734_v25 = vrot.slane %v5732_v14, 1  ;;  %v5754_v31 = vshrl.u32 %v5583_v6, 16  ;;  %v5758_v32 = vrot.slane %v5756_v19, 1  ;;  %v13219_v1 = vld [vmem:[#allocation9 + $0x6cc] ss:$16 sps:$4 sm:$0xff]  }
 0x40e   : > { %v5737_v26 = vshll.u32 %v5585_v13, 16  ;;  %v5761_v27 = vshll.u32 %v5587_v29, 16  ;;  %v5723_v28 = vor.u32 %v5722_v17, %v5718_v16  ;;  %v5727_v30 = vrot.slane %v5725_v18, 1  ;;  %v13214_v2 = vld [vmem:[#allocation9 + $0x6c0] ss:$16 sps:$4 sm:$0xff]  }
 0x40f   : > { %v5735_v33 = vor.u32 %v5734_v25, %v5730_v55  ;;  %v5759_v36 = vor.u32 %v5758_v32, %v5754_v31  ;;  %v13217_v3 = vld [vmem:[#allocation9 + $0x6c8] ss:$16 sps:$4 sm:$0xff]   ;;  %v13222_v4 = vld [vmem:[#allocation9 + $0x6e4] ss:$16 sps:$4 sm:$0xff]   ;;  %v13225_v5 = vld [vmem:[#allocation9 + $0x6ec] ss:$16 sps:$4 sm:$0xff]  }
 0x410   : > { %v5739_v34 = vrot.slane %v5737_v26, 1  ;;  %v5763_v37 = vrot.slane %v5761_v27, 1  ;;  %v5728_v39 = vsel %vm655_vm1, %v5723_v28, %v5727_v30  ;;  %v13220_v6 = vld [vmem:[#allocation9 + $0x6e0] ss:$16 sps:$4 sm:$0xff]   ;;  %v13223_v8 = vld [vmem:[#allocation9 + $0x6e8] ss:$16 sps:$4 sm:$0xff]  }
 0x411   : > { %v13228_v9 = vld [vmem:[#allocation9 + $0x704] ss:$16 sps:$4 sm:$0xff]   ;;  %v13231_v10 = vld [vmem:[#allocation9 + $0x70c] ss:$16 sps:$4 sm:$0xff]   ;;  %v13226_v11 = vld [vmem:[#allocation9 + $0x700] ss:$16 sps:$4 sm:$0xff]  }
 0x412   : > { %v5740_v38 = vsel %vm655_vm1, %v5735_v33, %v5739_v34  ;;  %v5764_v42 = vsel %vm655_vm1, %v5759_v36, %v5763_v37  ;;  %v13229_v13 = vld [vmem:[#allocation9 + $0x708] ss:$16 sps:$4 sm:$0xff]   ;;  %v13234_v14 = vld [vmem:[#allocation9 + $0x724] ss:$16 sps:$4 sm:$0xff]   ;;  %v13237_v29 = vld [vmem:[#allocation9 + $0x72c] ss:$16 sps:$4 sm:$0xff]  }
 0x413   : > { %6441 = vmatprep.mubr.bf16.mxu0 %v5740_v38  ;;  %6527 = vmatprep.mubr.bf16.mxu1 %v5740_v38  ;;  %v13232_v16 = vld [vmem:[#allocation9 + $0x720] ss:$16 sps:$4 sm:$0xff]   ;;  %v13235_v17 = vld [vmem:[#allocation9 + $0x728] ss:$16 sps:$4 sm:$0xff]   ;;  %v13240_v18 = vld [vmem:[#allocation9 + $0x744] ss:$16 sps:$4 sm:$0xff]  }
 0x414   : > { %6442 = vmatmul.mubr.bf16.vlgmr.msra.gmra.mrb[4].mxu0 %v5728_v39  ;;  %6528 = vmatmul.mubr.bf16.vlgmr.msra.gmra.mrb[4].mxu1 %v5728_v39  ;;  %v13243_v19 = vld [vmem:[#allocation9 + $0x74c] ss:$16 sps:$4 sm:$0xff]   ;;  %v13238_v55 = vld [vmem:[#allocation9 + $0x740] ss:$16 sps:$4 sm:$0xff]   ;;  %v13241_v25 = vld [vmem:[#allocation9 + $0x748] ss:$16 sps:$4 sm:$0xff]  }
 0x415   : > { %6453 = vmatpush1.bf16.msra.mxu0 %v13178_v35  ;;  %6539 = vmatpush1.bf16.msra.mxu1 %v13181_v12  ;;  %v13246_v26 = vld [vmem:[#allocation9 + $0x764] ss:$16 sps:$4 sm:$0xff]   ;;  %v13249_v27 = vld [vmem:[#allocation9 + $0x76c] ss:$16 sps:$4 sm:$0xff]   ;;  %v13244_v28 = vld [vmem:[#allocation9 + $0x760] ss:$16 sps:$4 sm:$0xff]  }
 0x416   : > { %6484 = vmatprep.mubr.bf16.mxu0 %v5764_v42  ;;  %6570 = vmatprep.mubr.bf16.mxu1 %v5764_v42  ;;  %v13247_v30 = vld [vmem:[#allocation9 + $0x768] ss:$16 sps:$4 sm:$0xff]   ;;  %v13252_v31 = vld [vmem:[#allocation9 + $0x784] ss:$16 sps:$4 sm:$0xff]   ;;  %v13255_v32 = vld [vmem:[#allocation9 + $0x78c] ss:$16 sps:$4 sm:$0xff]  }
 0x417   : > { %6454 = vmatprep.subr.bf16.mxu0 %v13186_v40  ;;  %6540 = vmatprep.subr.bf16.mxu1 %v13189_v41  ;;  %v5574_v33 = vld [vmem:[#allocation3 + $0x10] sm:$0xfe]  ;;  %v13253_v35 = vld [vmem:[#allocation9 + $0x788] ss:$16 sps:$4 sm:$0xff]   ;;  %v13261_v36 = vld [vmem:[#allocation9 + $0x7ac] ss:$16 sps:$4 sm:$0xff]  }
 0x418   : > { %v13250_v34 = vld [vmem:[#allocation9 + $0x780] ss:$16 sps:$4 sm:$0xff]   ;;  %v13258_v12 = vld [vmem:[#allocation9 + $0x7a4] ss:$16 sps:$4 sm:$0xff]   ;;  %v5582_v37 = vpack.c.bf16 %v14640_v22, %v5574_v33  ;;  %v13259_v40 = vld [vmem:[#allocation9 + $0x7a8] ss:$16 sps:$4 sm:$0xff]  }
 0x419   : > { %6455 = vmatpush1.bf16.msra.mxu0 %v13184_v43  ;;  %6541 = vmatpush1.bf16.msra.mxu1 %v13187_v44  ;;  %v5578_v38 = vld [vmem:[#allocation3 + $0x50] sm:$0x1]  ;;  %v13264_v41 = vld [vmem:[#allocation9 + $0x7c4] ss:$16 sps:$4 sm:$0xff]   ;;  %v13267_v42 = vld [vmem:[#allocation9 + $0x7cc] ss:$16 sps:$4 sm:$0xff]  }
 0x41a   : > { %6456 = vmatprep.subr.bf16.mxu0 %v13192_v45  ;;  %6542 = vmatprep.subr.bf16.mxu1 %v13195_v46  ;;  %v13256_v39 = vld [vmem:[#allocation9 + $0x7a0] ss:$16 sps:$4 sm:$0xff]   ;;  %v5586_v43 = vpack.c.bf16 %v5578_v38, %v5578_v38  ;;  %v5744_v44 = vshll.u32 %v5582_v37, 16  ;;  %v13265_v46 = vld [vmem:[#allocation9 + $0x7c8] ss:$16 sps:$4 sm:$0xff]  }
 0x41b   : > { %v13262_v45 = vld [vmem:[#allocation9 + $0x7c0] ss:$16 sps:$4 sm:$0xff]   ;;  %v13318_v33 = vld [vmem:[#allocation9 + $0xe4] ss:$16 sps:$4 sm:$0xff]  }
 0x41c   : > { %v13322_v38 = vld [vmem:[#allocation9 + $0x100] ss:$16 sps:$4 sm:$0xff]  }
 0x41d   : > { %6457 = vmatpush1.bf16.msra.mxu0 %v13190_v47  ;;  %6543 = vmatpush1.bf16.msra.mxu1 %v13193_v48  ;;  %v13270_v47 = vld [vmem:[#allocation9 + $0x7e4] ss:$16 sps:$4 sm:$0xff]   ;;  %v13273_v48 = vld [vmem:[#allocation9 + $0x7ec] ss:$16 sps:$4 sm:$0xff]  }
 0x41e   : > { %6458 = vmatprep.subr.bf16.mxu0 %v13198_v15  ;;  %6544 = vmatprep.subr.bf16.mxu1 %v13201_v49  ;;  %v5746_v15 = vrot.slane %v5744_v44, 1  ;;  %v5749_v49 = vshll.u32 %v5586_v43, 16  ;;  %v13331_v43 = vld [vmem:[#allocation9 + $0x128] ss:$16 sps:$4 sm:$0xff]   ;;  %v13336_v44 = vld [vmem:[#allocation9 + $0x144] ss:$16 sps:$4 sm:$0xff]  }
 0x421   : > { %6459 = vmatpush1.bf16.msra.mxu0 %v13196_v50  ;;  %6545 = vmatpush1.bf16.msra.mxu1 %v13199_v51  ;;  %v13268_v50 = vld [vmem:[#allocation9 + $0x7e0] ss:$16 sps:$4 sm:$0xff]   ;;  %v13271_v51 = vld [vmem:[#allocation9 + $0x7e8] ss:$16 sps:$4 sm:$0xff]  }
 0x422   : > { %6460 = vmatprep.subr.bf16.mxu0 %v13204_v52  ;;  %6546 = vmatprep.subr.bf16.mxu1 %v13207_v53  ;;  %v5742_v52 = vshrl.u32 %v5582_v37, 16  ;;  %v13276_v53 = vld [vmem:[#allocation9 + $0x4] ss:$16 sps:$4 sm:$0xff]   ;;  %v13327_v37 = vld [vmem:[#allocation9 + $0x10c] ss:$16 sps:$4 sm:$0xff]  }
 0x425   : > { %6461 = vmatpush1.bf16.msra.mxu0 %v13202_v54  ;;  %6547 = vmatpush1.bf16.msra.mxu1 %v13205_v56  ;;  %v13279_v54 = vld [vmem:[#allocation9 + $0xc] ss:$16 sps:$4 sm:$0xff]   ;;  %v5747_v56 = vor.u32 %v5746_v15, %v5742_v52 }
 0x426   : > { %6462 = vmatprep.subr.bf16.mxu0 %v13210_v57  ;;  %6548 = vmatprep.subr.bf16.mxu1 %v13213_v58  ;;  %v5751_v57 = vrot.slane %v5749_v49, 1  ;;  %v5433_v58 = vld [vmem:[#allocation3 + $0x8] sm:$0xff]  ;;  %v13340_v49 = vld [vmem:[#allocation9 + $0x160] ss:$16 sps:$4 sm:$0xff]  }
 0x427   : > { %v13345_v15 = vld [vmem:[#allocation9 + $0x16c] ss:$16 sps:$4 sm:$0xff]  }
 0x428   : > { %v13351_v52 = vld [vmem:[#allocation9 + $0x18c] ss:$16 sps:$4 sm:$0xff]  }
 0x429   : > { %6463 = vmatpush1.bf16.msra.mxu0 %v13208_v59  ;;  %6549 = vmatpush1.bf16.msra.mxu1 %v13211_v60  ;;  %v13274_v59 = vld [vmem:[#allocation9] ss:$16 sps:$4 sm:$0xff]   ;;  %v13277_v60 = vld [vmem:[#allocation9 + $0x8] ss:$16 sps:$4 sm:$0xff]  }
 0x42a   : > { %6464 = vmatprep.subr.bf16.mxu0 %v13216_v0  ;;  %6550 = vmatprep.subr.bf16.mxu1 %v13219_v1  ;;  %v5752_v0 = vsel %vm655_vm1, %v5747_v56, %v5751_v57  ;;  %v5441_v1 = vpack.c.bf16 %v14645_v62, %v5433_v58  ;;  %v13354_v56 = vld [vmem:[#allocation9 + $0x1a4] ss:$16 sps:$4 sm:$0xff]   ;;  %v13357_v57 = vld [vmem:[#allocation9 + $0x1ac] ss:$16 sps:$4 sm:$0xff]   ;;  %v13352_v58 = vld [vmem:[#allocation9 + $0x1a0] ss:$16 sps:$4 sm:$0xff]  }
 0x42d   : > { %6465 = vmatpush1.bf16.msra.mxu0 %v13214_v2  ;;  %6551 = vmatpush1.bf16.msra.mxu1 %v13217_v3  ;;  %v13282_v2 = vld [vmem:[#allocation9 + $0x24] ss:$16 sps:$4 sm:$0xff]   ;;  %v13285_v3 = vld [vmem:[#allocation9 + $0x2c] ss:$16 sps:$4 sm:$0xff]  }
 0x42e   : > { %6466 = vmatprep.subr.bf16.mxu0 %v13222_v4  ;;  %6552 = vmatprep.subr.bf16.mxu1 %v13225_v5  ;;  %v13280_v4 = vld [vmem:[#allocation9 + $0x20] ss:$16 sps:$4 sm:$0xff]   ;;  %v13283_v5 = vld [vmem:[#allocation9 + $0x28] ss:$16 sps:$4 sm:$0xff]  }
 0x431   : > { %6467 = vmatpush1.bf16.msra.mxu0 %v13220_v6  ;;  %6553 = vmatpush1.bf16.msra.mxu1 %v13223_v8  ;;  %v13288_v6 = vld [vmem:[#allocation9 + $0x44] ss:$16 sps:$4 sm:$0xff]   ;;  %v13291_v8 = vld [vmem:[#allocation9 + $0x4c] ss:$16 sps:$4 sm:$0xff]  }
 0x432   : > { %6468 = vmatprep.subr.bf16.mxu0 %v13228_v9  ;;  %6554 = vmatprep.subr.bf16.mxu1 %v13231_v10  ;;  %v13286_v9 = vld [vmem:[#allocation9 + $0x40] ss:$16 sps:$4 sm:$0xff]   ;;  %v13289_v10 = vld [vmem:[#allocation9 + $0x48] ss:$16 sps:$4 sm:$0xff]  }
 0x435   : > { %6469 = vmatpush1.bf16.msra.mxu0 %v13226_v11  ;;  %6555 = vmatpush1.bf16.msra.mxu1 %v13229_v13  ;;  %v13294_v11 = vld [vmem:[#allocation9 + $0x64] ss:$16 sps:$4 sm:$0xff]   ;;  %v13297_v13 = vld [vmem:[#allocation9 + $0x6c] ss:$16 sps:$4 sm:$0xff]  }
 0x436   : > { %6470 = vmatprep.subr.bf16.mxu0 %v13234_v14  ;;  %6556 = vmatprep.subr.bf16.mxu1 %v13237_v29  ;;  %v13292_v14 = vld [vmem:[#allocation9 + $0x60] ss:$16 sps:$4 sm:$0xff]   ;;  %v13295_v29 = vld [vmem:[#allocation9 + $0x68] ss:$16 sps:$4 sm:$0xff]  }
 0x439   : > { %6471 = vmatpush1.bf16.msra.mxu0 %v13232_v16  ;;  %6557 = vmatpush1.bf16.msra.mxu1 %v13235_v17  ;;  %v13300_v16 = vld [vmem:[#allocation9 + $0x84] ss:$16 sps:$4 sm:$0xff]   ;;  %v13303_v17 = vld [vmem:[#allocation9 + $0x8c] ss:$16 sps:$4 sm:$0xff]  }
 0x43a   : > { %6472 = vmatprep.subr.bf16.mxu0 %v13240_v18  ;;  %6558 = vmatprep.subr.bf16.mxu1 %v13243_v19  ;;  %v13298_v18 = vld [vmem:[#allocation9 + $0x80] ss:$16 sps:$4 sm:$0xff]   ;;  %v13301_v19 = vld [vmem:[#allocation9 + $0x88] ss:$16 sps:$4 sm:$0xff]  }
 0x43d   : > { %6473 = vmatpush1.bf16.msra.mxu0 %v13238_v55  ;;  %6559 = vmatpush1.bf16.msra.mxu1 %v13241_v25  ;;  %v13306_v55 = vld [vmem:[#allocation9 + $0xa4] ss:$16 sps:$4 sm:$0xff]   ;;  %v13309_v25 = vld [vmem:[#allocation9 + $0xac] ss:$16 sps:$4 sm:$0xff]  }
 0x43e   : > { %6474 = vmatprep.subr.bf16.mxu0 %v13246_v26  ;;  %6560 = vmatprep.subr.bf16.mxu1 %v13249_v27  ;;  %v13304_v26 = vld [vmem:[#allocation9 + $0xa0] ss:$16 sps:$4 sm:$0xff]   ;;  %v13307_v27 = vld [vmem:[#allocation9 + $0xa8] ss:$16 sps:$4 sm:$0xff]  }
 0x441   : > { %6475 = vmatpush1.bf16.msra.mxu0 %v13244_v28  ;;  %6561 = vmatpush1.bf16.msra.mxu1 %v13247_v30  ;;  %v13312_v28 = vld [vmem:[#allocation9 + $0xc4] ss:$16 sps:$4 sm:$0xff]   ;;  %v13315_v30 = vld [vmem:[#allocation9 + $0xcc] ss:$16 sps:$4 sm:$0xff]  }
 0x442   : > { %6476 = vmatprep.subr.bf16.mxu0 %v13252_v31  ;;  %6562 = vmatprep.subr.bf16.mxu1 %v13255_v32  ;;  %v13310_v31 = vld [vmem:[#allocation9 + $0xc0] ss:$16 sps:$4 sm:$0xff]   ;;  %v13313_v32 = vld [vmem:[#allocation9 + $0xc8] ss:$16 sps:$4 sm:$0xff]  }
 0x445   : > { %6477 = vmatpush1.bf16.msra.mxu0 %v13250_v34  ;;  %6563 = vmatpush1.bf16.msra.mxu1 %v13253_v35  ;;  %v13321_v34 = vld [vmem:[#allocation9 + $0xec] ss:$16 sps:$4 sm:$0xff]   ;;  %v13316_v35 = vld [vmem:[#allocation9 + $0xe0] ss:$16 sps:$4 sm:$0xff]  }
 0x446   : > { %6478 = vmatprep.subr.bf16.mxu0 %v13258_v12  ;;  %6564 = vmatprep.subr.bf16.mxu1 %v13261_v36  ;;  %v13319_v12 = vld [vmem:[#allocation9 + $0xe8] ss:$16 sps:$4 sm:$0xff]   ;;  %v13324_v36 = vld [vmem:[#allocation9 + $0x104] ss:$16 sps:$4 sm:$0xff]  }
 0x449   : > { %6479 = vmatpush1.bf16.msra.mxu0 %v13256_v39  ;;  %6565 = vmatpush1.bf16.msra.mxu1 %v13259_v40  ;;  %v13325_v39 = vld [vmem:[#allocation9 + $0x108] ss:$16 sps:$4 sm:$0xff]   ;;  %v13330_v40 = vld [vmem:[#allocation9 + $0x124] ss:$16 sps:$4 sm:$0xff]  }
 0x44a   : > { %6480 = vmatprep.subr.bf16.mxu0 %v13264_v41  ;;  %6566 = vmatprep.subr.bf16.mxu1 %v13267_v42  ;;  %v13333_v41 = vld [vmem:[#allocation9 + $0x12c] ss:$16 sps:$4 sm:$0xff]   ;;  %v13328_v42 = vld [vmem:[#allocation9 + $0x120] ss:$16 sps:$4 sm:$0xff]  }
 0x44d   : > { %6481 = vmatpush1.bf16.msra.mxu0 %v13262_v45  ;;  %6567 = vmatpush1.bf16.msra.mxu1 %v13265_v46  ;;  %v13339_v45 = vld [vmem:[#allocation9 + $0x14c] ss:$16 sps:$4 sm:$0xff]   ;;  %v13334_v46 = vld [vmem:[#allocation9 + $0x140] ss:$16 sps:$4 sm:$0xff]  }
 0x44e   : > { %6482 = vmatprep.subr.bf16.mxu0 %v13270_v47  ;;  %6568 = vmatprep.subr.bf16.mxu1 %v13273_v48  ;;  %v13337_v47 = vld [vmem:[#allocation9 + $0x148] ss:$16 sps:$4 sm:$0xff]   ;;  %v13342_v48 = vld [vmem:[#allocation9 + $0x164] ss:$16 sps:$4 sm:$0xff]  }
 0x451   : > { %6483 = vmatpush1.bf16.msra.mxu0 %v13268_v50  ;;  %6569 = vmatpush1.bf16.msra.mxu1 %v13271_v51  ;;  %v13343_v50 = vld [vmem:[#allocation9 + $0x168] ss:$16 sps:$4 sm:$0xff]   ;;  %v13348_v51 = vld [vmem:[#allocation9 + $0x184] ss:$16 sps:$4 sm:$0xff]  }
 0x452   : > { %7221 = vmatprep.subr.bf16.mxu0 %v13276_v53  ;;  %7307 = vmatprep.subr.bf16.mxu1 %v13279_v54  ;;  %v13346_v53 = vld [vmem:[#allocation9 + $0x180] ss:$16 sps:$4 sm:$0xff]   ;;  %v13349_v54 = vld [vmem:[#allocation9 + $0x188] ss:$16 sps:$4 sm:$0xff]  }
 0x454   : > { %6485 = vmatmul.mubr.bf16.vlgmr.msra.gmra.mrb[4].mxu0 %v5752_v0  ;;  %6571 = vmatmul.mubr.bf16.vlgmr.msra.gmra.mrb[4].mxu1 %v5752_v0  ;;  %v13363_v0 = vld [vmem:[#allocation9 + $0x1cc] ss:$16 sps:$4 sm:$0xff]  }
 0x455   : > { %7222 = vmatpush1.bf16.msra.mxu0 %v13274_v59  ;;  %7253 = vmatprep.mubr.bf16.mxu0 %v5441_v1  ;;  %v13355_v59 = vld [vmem:[#allocation9 + $0x1a8] ss:$16 sps:$4 sm:$0xff]  }
 0x456   : > { %7308 = vmatpush1.bf16.msra.mxu1 %v13277_v60  ;;  %7339 = vmatprep.mubr.bf16.mxu1 %v5441_v1  ;;  %v13360_v60 = vld [vmem:[#allocation9 + $0x1c4] ss:$16 sps:$4 sm:$0xff]   ;;  %v13358_v1 = vld [vmem:[#allocation9 + $0x1c0] ss:$16 sps:$4 sm:$0xff]  }
 0x457   : > { %7223 = vmatprep.subr.bf16.mxu0 %v13282_v2  ;;  %7309 = vmatprep.subr.bf16.mxu1 %v13285_v3  ;;  %v13361_v2 = vld [vmem:[#allocation9 + $0x1c8] ss:$16 sps:$4 sm:$0xff]   ;;  %v13366_v3 = vld [vmem:[#allocation9 + $0x1e4] ss:$16 sps:$4 sm:$0xff]  }
 0x459   : > { %7224 = vmatpush1.bf16.msra.mxu0 %v13280_v4  ;;  %v13369_v4 = vld [vmem:[#allocation9 + $0x1ec] ss:$16 sps:$4 sm:$0xff]  }
 0x45a   : > { %7310 = vmatpush1.bf16.msra.mxu1 %v13283_v5  ;;  %7225 = vmatprep.subr.bf16.mxu0 %v13288_v6  ;;  %v13364_v5 = vld [vmem:[#allocation9 + $0x1e0] ss:$16 sps:$4 sm:$0xff]   ;;  %v13367_v6 = vld [vmem:[#allocation9 + $0x1e8] ss:$16 sps:$4 sm:$0xff]  }
 0x45b   : > { %7311 = vmatprep.subr.bf16.mxu1 %v13291_v8  ;;  %v13372_v8 = vld [vmem:[#allocation9 + $0x204] ss:$16 sps:$4 sm:$0xff]  }
 0x45d   : > { %7226 = vmatpush1.bf16.msra.mxu0 %v13286_v9  ;;  %v5432_v9 = vld [vmem:[#allocation3] sm:$0xff] }
 0x45e   : > { %7312 = vmatpush1.bf16.msra.mxu1 %v13289_v10  ;;  %7227 = vmatprep.subr.bf16.mxu0 %v13294_v11  ;;  %v13375_v10 = vld [vmem:[#allocation9 + $0x20c] ss:$16 sps:$4 sm:$0xff]   ;;  %v13370_v11 = vld [vmem:[#allocation9 + $0x200] ss:$16 sps:$4 sm:$0xff]  }
 0x45f   : > { %7313 = vmatprep.subr.bf16.mxu1 %v13297_v13  ;;  %v5435_v13 = vld [vmem:[#allocation3 + $0x18] sm:$0xff] }
 0x461   : > { %7228 = vmatpush1.bf16.msra.mxu0 %v13292_v14  ;;  %v5440_v14 = vpack.c.bf16 %v14637_v61, %v5432_v9  ;;  %v13382_v61 = vld [vmem:[#allocation9 + $0x240] ss:$16 sps:$4 sm:$0xff]  }
 0x462   : > { %7314 = vmatpush1.bf16.msra.mxu1 %v13295_v29  ;;  %7229 = vmatprep.subr.bf16.mxu0 %v13300_v16  ;;  %v13373_v29 = vld [vmem:[#allocation9 + $0x208] ss:$16 sps:$4 sm:$0xff]   ;;  %v13378_v16 = vld [vmem:[#allocation9 + $0x224] ss:$16 sps:$4 sm:$0xff]   ;;  %v13448_v9 = vld [vmem:[#allocation9 + $0x3a0] ss:$16 sps:$4 sm:$0xff]  }
 0x463   : > { %7315 = vmatprep.subr.bf16.mxu1 %v13303_v17  ;;  %v5443_v17 = vpack.c.bf16 %v14648_v63, %v5435_v13  ;;  %v13393_v63 = vld [vmem:[#allocation9 + $0x26c] ss:$16 sps:$4 sm:$0xff]  }
 0x464   : > { %v13459_v13 = vld [vmem:[#allocation9 + $0x3cc] ss:$16 sps:$4 sm:$0xff]  }
 0x465   : > { %7230 = vmatpush1.bf16.msra.mxu0 %v13298_v18  ;;  %v13381_v18 = vld [vmem:[#allocation9 + $0x22c] ss:$16 sps:$4 sm:$0xff]  }
 0x466   : > { %7316 = vmatpush1.bf16.msra.mxu1 %v13301_v19  ;;  %7231 = vmatprep.subr.bf16.mxu0 %v13306_v55  ;;  %v13376_v19 = vld [vmem:[#allocation9 + $0x220] ss:$16 sps:$4 sm:$0xff]   ;;  %v13379_v55 = vld [vmem:[#allocation9 + $0x228] ss:$16 sps:$4 sm:$0xff]  }
 0x467   : > { %7317 = vmatprep.subr.bf16.mxu1 %v13309_v25  ;;  %v13384_v25 = vld [vmem:[#allocation9 + $0x244] ss:$16 sps:$4 sm:$0xff]  }
 0x469   : > { %7232 = vmatpush1.bf16.msra.mxu0 %v13304_v26  ;;  %v13387_v26 = vld [vmem:[#allocation9 + $0x24c] ss:$16 sps:$4 sm:$0xff]  }
 0x46a   : > { %7318 = vmatpush1.bf16.msra.mxu1 %v13307_v27  ;;  %7233 = vmatprep.subr.bf16.mxu0 %v13312_v28  ;;  %v13385_v27 = vld [vmem:[#allocation9 + $0x248] ss:$16 sps:$4 sm:$0xff]   ;;  %v13390_v28 = vld [vmem:[#allocation9 + $0x264] ss:$16 sps:$4 sm:$0xff]  }
 0x46b   : > { %7319 = vmatprep.subr.bf16.mxu1 %v13315_v30  ;;  %v13388_v30 = vld [vmem:[#allocation9 + $0x260] ss:$16 sps:$4 sm:$0xff]  }
 0x46d   : > { %7234 = vmatpush1.bf16.msra.mxu0 %v13310_v31  ;;  %v13391_v31 = vld [vmem:[#allocation9 + $0x268] ss:$16 sps:$4 sm:$0xff]  }
 0x46e   : > { %7320 = vmatpush1.bf16.msra.mxu1 %v13313_v32  ;;  %7235 = vmatprep.subr.bf16.mxu0 %v13318_v33  ;;  %v13396_v32 = vld [vmem:[#allocation9 + $0x284] ss:$16 sps:$4 sm:$0xff]   ;;  %v13399_v33 = vld [vmem:[#allocation9 + $0x28c] ss:$16 sps:$4 sm:$0xff]  }
 0x46f   : > { %7321 = vmatprep.subr.bf16.mxu1 %v13321_v34  ;;  %v13394_v34 = vld [vmem:[#allocation9 + $0x280] ss:$16 sps:$4 sm:$0xff]  }
 0x471   : > { %7236 = vmatpush1.bf16.msra.mxu0 %v13316_v35  ;;  %v13397_v35 = vld [vmem:[#allocation9 + $0x288] ss:$16 sps:$4 sm:$0xff]  }
 0x472   : > { %7322 = vmatpush1.bf16.msra.mxu1 %v13319_v12  ;;  %7237 = vmatprep.subr.bf16.mxu0 %v13324_v36  ;;  %v13402_v12 = vld [vmem:[#allocation9 + $0x2a4] ss:$16 sps:$4 sm:$0xff]   ;;  %v13405_v36 = vld [vmem:[#allocation9 + $0x2ac] ss:$16 sps:$4 sm:$0xff]  }
 0x473   : > { %7323 = vmatprep.subr.bf16.mxu1 %v13327_v37  ;;  %v13400_v37 = vld [vmem:[#allocation9 + $0x2a0] ss:$16 sps:$4 sm:$0xff]  }
 0x475   : > { %7238 = vmatpush1.bf16.msra.mxu0 %v13322_v38  ;;  %v13403_v38 = vld [vmem:[#allocation9 + $0x2a8] ss:$16 sps:$4 sm:$0xff]  }
 0x476   : > { %7324 = vmatpush1.bf16.msra.mxu1 %v13325_v39  ;;  %7239 = vmatprep.subr.bf16.mxu0 %v13330_v40  ;;  %v13408_v39 = vld [vmem:[#allocation9 + $0x2c4] ss:$16 sps:$4 sm:$0xff]   ;;  %v13411_v40 = vld [vmem:[#allocation9 + $0x2cc] ss:$16 sps:$4 sm:$0xff]  }
 0x477   : > { %7325 = vmatprep.subr.bf16.mxu1 %v13333_v41  ;;  %v13406_v41 = vld [vmem:[#allocation9 + $0x2c0] ss:$16 sps:$4 sm:$0xff]  }
 0x479   : > { %7240 = vmatpush1.bf16.msra.mxu0 %v13328_v42  ;;  %v13409_v42 = vld [vmem:[#allocation9 + $0x2c8] ss:$16 sps:$4 sm:$0xff]  }
 0x47a   : > { %7326 = vmatpush1.bf16.msra.mxu1 %v13331_v43  ;;  %7241 = vmatprep.subr.bf16.mxu0 %v13336_v44  ;;  %v13414_v43 = vld [vmem:[#allocation9 + $0x2e4] ss:$16 sps:$4 sm:$0xff]   ;;  %v13417_v44 = vld [vmem:[#allocation9 + $0x2ec] ss:$16 sps:$4 sm:$0xff]  }
 0x47b   : > { %7327 = vmatprep.subr.bf16.mxu1 %v13339_v45  ;;  %v13412_v45 = vld [vmem:[#allocation9 + $0x2e0] ss:$16 sps:$4 sm:$0xff]  }
 0x47d   : > { %7242 = vmatpush1.bf16.msra.mxu0 %v13334_v46  ;;  %v13415_v46 = vld [vmem:[#allocation9 + $0x2e8] ss:$16 sps:$4 sm:$0xff]  }
 0x47e   : > { %7328 = vmatpush1.bf16.msra.mxu1 %v13337_v47  ;;  %7243 = vmatprep.subr.bf16.mxu0 %v13342_v48  ;;  %v13420_v47 = vld [vmem:[#allocation9 + $0x304] ss:$16 sps:$4 sm:$0xff]   ;;  %v13423_v48 = vld [vmem:[#allocation9 + $0x30c] ss:$16 sps:$4 sm:$0xff]  }
 0x47f   : > { %7329 = vmatprep.subr.bf16.mxu1 %v13345_v15  ;;  %v13418_v15 = vld [vmem:[#allocation9 + $0x300] ss:$16 sps:$4 sm:$0xff]  }
 0x481   : > { %7244 = vmatpush1.bf16.msra.mxu0 %v13340_v49  ;;  %v13421_v49 = vld [vmem:[#allocation9 + $0x308] ss:$16 sps:$4 sm:$0xff]  }
 0x482   : > { %7330 = vmatpush1.bf16.msra.mxu1 %v13343_v50  ;;  %7245 = vmatprep.subr.bf16.mxu0 %v13348_v51  ;;  %v13426_v50 = vld [vmem:[#allocation9 + $0x324] ss:$16 sps:$4 sm:$0xff]   ;;  %v13429_v51 = vld [vmem:[#allocation9 + $0x32c] ss:$16 sps:$4 sm:$0xff]  }
 0x483   : > { %7331 = vmatprep.subr.bf16.mxu1 %v13351_v52  ;;  %v13424_v52 = vld [vmem:[#allocation9 + $0x320] ss:$16 sps:$4 sm:$0xff]  }
 0x485   : > { %7246 = vmatpush1.bf16.msra.mxu0 %v13346_v53  ;;  %v13427_v53 = vld [vmem:[#allocation9 + $0x328] ss:$16 sps:$4 sm:$0xff]  }
 0x486   : > { %7332 = vmatpush1.bf16.msra.mxu1 %v13349_v54  ;;  %7247 = vmatprep.subr.bf16.mxu0 %v13354_v56  ;;  %v13432_v54 = vld [vmem:[#allocation9 + $0x344] ss:$16 sps:$4 sm:$0xff]   ;;  %v13435_v56 = vld [vmem:[#allocation9 + $0x34c] ss:$16 sps:$4 sm:$0xff]  }
 0x487   : > { %7333 = vmatprep.subr.bf16.mxu1 %v13357_v57  ;;  %v13430_v57 = vld [vmem:[#allocation9 + $0x340] ss:$16 sps:$4 sm:$0xff]  }
 0x489   : > { %7248 = vmatpush1.bf16.msra.mxu0 %v13352_v58  ;;  %v13433_v58 = vld [vmem:[#allocation9 + $0x348] ss:$16 sps:$4 sm:$0xff]  }
 0x48a   : > { %7334 = vmatpush1.bf16.msra.mxu1 %v13355_v59  ;;  %7249 = vmatprep.subr.bf16.mxu0 %v13360_v60  ;;  %v13438_v59 = vld [vmem:[#allocation9 + $0x364] ss:$16 sps:$4 sm:$0xff]   ;;  %v13441_v60 = vld [vmem:[#allocation9 + $0x36c] ss:$16 sps:$4 sm:$0xff]  }
 0x48b   : > { %7335 = vmatprep.subr.bf16.mxu1 %v13363_v0  ;;  %v13436_v0 = vld [vmem:[#allocation9 + $0x360] ss:$16 sps:$4 sm:$0xff]  }
 0x48d   : > { %7250 = vmatpush1.bf16.msra.mxu0 %v13358_v1  ;;  %v13439_v1 = vld [vmem:[#allocation9 + $0x368] ss:$16 sps:$4 sm:$0xff]  }
 0x48e   : > { %7336 = vmatpush1.bf16.msra.mxu1 %v13361_v2  ;;  %7251 = vmatprep.subr.bf16.mxu0 %v13366_v3  ;;  %v13444_v2 = vld [vmem:[#allocation9 + $0x384] ss:$16 sps:$4 sm:$0xff]   ;;  %v13447_v3 = vld [vmem:[#allocation9 + $0x38c] ss:$16 sps:$4 sm:$0xff]  }
 0x48f   : > { %7337 = vmatprep.subr.bf16.mxu1 %v13369_v4  ;;  %v13442_v4 = vld [vmem:[#allocation9 + $0x380] ss:$16 sps:$4 sm:$0xff]  }
 0x491   : > { %7252 = vmatpush1.bf16.msra.mxu0 %v13364_v5  ;;  %v13445_v5 = vld [vmem:[#allocation9 + $0x388] ss:$16 sps:$4 sm:$0xff]  }
 0x492   : > { %7338 = vmatpush1.bf16.msra.mxu1 %v13367_v6  ;;  %7264 = vmatprep.subr.bf16.mxu0 %v13372_v8  ;;  %v13450_v6 = vld [vmem:[#allocation9 + $0x3a4] ss:$16 sps:$4 sm:$0xff]   ;;  %v13453_v8 = vld [vmem:[#allocation9 + $0x3ac] ss:$16 sps:$4 sm:$0xff]  }
 0x493   : > { %7350 = vmatprep.subr.bf16.mxu1 %v13375_v10  ;;  %v13451_v10 = vld [vmem:[#allocation9 + $0x3a8] ss:$16 sps:$4 sm:$0xff]  }
 0x494   : > { %7254 = vmatmul.mubr.bf16.vlgmr.msra.gmra.mrb[4].mxu0 %v5440_v14 }
 0x495   : > { %7340 = vmatmul.mubr.bf16.vlgmr.msra.gmra.mrb[4].mxu1 %v5440_v14  ;;  %7265 = vmatpush1.bf16.msra.mxu0 %v13370_v11  ;;  %v13456_v11 = vld [vmem:[#allocation9 + $0x3c4] ss:$16 sps:$4 sm:$0xff]   ;;  %v13454_v14 = vld [vmem:[#allocation9 + $0x3c0] ss:$16 sps:$4 sm:$0xff]  }
 0x496   : > { %7296 = vmatprep.mubr.bf16.mxu0 %v5443_v17  ;;  %7351 = vmatpush1.bf16.msra.mxu1 %v13373_v29  ;;  %v13457_v29 = vld [vmem:[#allocation9 + $0x3c8] ss:$16 sps:$4 sm:$0xff]  }
 0x497   : > { %7382 = vmatprep.mubr.bf16.mxu1 %v5443_v17  ;;  %7266 = vmatprep.subr.bf16.mxu0 %v13378_v16  ;;  %v13462_v16 = vld [vmem:[#allocation9 + $0x3e4] ss:$16 sps:$4 sm:$0xff]   ;;  %v7398_v17 = vld [vmem:[#allocation3 + $0x48] sm:$0x3] }
 0x498   : > { %7352 = vmatprep.subr.bf16.mxu1 %v13381_v18  ;;  %v13465_v18 = vld [vmem:[#allocation9 + $0x3ec] ss:$16 sps:$4 sm:$0xff]  }
 0x499   : > { %7267 = vmatpush1.bf16.msra.mxu0 %v13376_v19  ;;  %v7394_v19 = vld [vmem:[#allocation3 + $0x8] sm:$0xfc] }
 0x49a   : > { %7353 = vmatpush1.bf16.msra.mxu1 %v13379_v55  ;;  %7268 = vmatprep.subr.bf16.mxu0 %v13384_v25  ;;  %v13460_v55 = vld [vmem:[#allocation9 + $0x3e0] ss:$16 sps:$4 sm:$0xff]   ;;  %v7406_v25 = vpack.c.bf16 %v7398_v17, %v7398_v17  ;;  %v13535_v17 = vld [vmem:[#allocation9 + $0x968] ss:$16 sps:$4 sm:$0xff]  }
 0x49b   : > { %7354 = vmatprep.subr.bf16.mxu1 %v13387_v26  ;;  %v13463_v26 = vld [vmem:[#allocation9 + $0x3e8] ss:$16 sps:$4 sm:$0xff]  }
 0x49d   : > { %7269 = vmatpush1.bf16.msra.mxu0 %v13382_v61  ;;  %v13468_v61 = vld [vmem:[#allocation9 + $0x804] ss:$16 sps:$4 sm:$0xff]  }
 0x49e   : > { %7355 = vmatpush1.bf16.msra.mxu1 %v13385_v27  ;;  %7270 = vmatprep.subr.bf16.mxu0 %v13390_v28  ;;  %v5434_v27 = vld [vmem:[#allocation3 + $0x10] sm:$0xff]  ;;  %v13471_v28 = vld [vmem:[#allocation9 + $0x80c] ss:$16 sps:$4 sm:$0xff]  }
 0x49f   : > { %7356 = vmatprep.subr.bf16.mxu1 %v13393_v63  ;;  %v7402_v63 = vpack.c.bf16 %v14645_v62, %v7394_v19  ;;  %v13475_v62 = vld [vmem:[#allocation9 + $0x828] ss:$16 sps:$4 sm:$0xff]   ;;  %v13543_v19 = vld [vmem:[#allocation9 + $0x98c] ss:$16 sps:$4 sm:$0xff]  }
 0x4a1   : > { %7271 = vmatpush1.bf16.msra.mxu0 %v13388_v30  ;;  %v13466_v30 = vld [vmem:[#allocation9 + $0x800] ss:$16 sps:$4 sm:$0xff]  }
 0x4a2   : > { %7357 = vmatpush1.bf16.msra.mxu1 %v13391_v31  ;;  %7272 = vmatprep.subr.bf16.mxu0 %v13396_v32  ;;  %v7550_v31 = vrot.slane %v7406_v25, 1  ;;  %v5442_v32 = vpack.c.bf16 %v14640_v22, %v5434_v27  ;;  %v13478_v22 = vld [vmem:[#allocation9 + $0x840] ss:$16 sps:$4 sm:$0xff]   ;;  %v13541_v25 = vld [vmem:[#allocation9 + $0x988] ss:$16 sps:$4 sm:$0xff]  }
 0x4a3   : > { %7358 = vmatprep.subr.bf16.mxu1 %v13399_v33  ;;  %v13469_v33 = vld [vmem:[#allocation9 + $0x808] ss:$16 sps:$4 sm:$0xff]   ;;  %v13544_v27 = vld [vmem:[#allocation9 + $0x9a0] ss:$16 sps:$4 sm:$0xff]  }
 0x4a5   : > { %7273 = vmatpush1.bf16.msra.mxu0 %v13394_v34  ;;  %v7549_v34 = vrot.slane %v7402_v63, 1  ;;  %v13552_v63 = vld [vmem:[#allocation9 + $0x9c4] ss:$16 sps:$4 sm:$0xff]  }
 0x4a6   : > { %7359 = vmatpush1.bf16.msra.mxu1 %v13397_v35  ;;  %7274 = vmatprep.subr.bf16.mxu0 %v13402_v12  ;;  %v13474_v35 = vld [vmem:[#allocation9 + $0x824] ss:$16 sps:$4 sm:$0xff]   ;;  %v13477_v12 = vld [vmem:[#allocation9 + $0x82c] ss:$16 sps:$4 sm:$0xff]  }
 0x4a7   : > { %7360 = vmatprep.subr.bf16.mxu1 %v13405_v36  ;;  %v7551_v36 = vsel %vm2485_vm2, %v7549_v34, %v7550_v31  ;;  %v7397_v31 = vld [vmem:[#allocation3 + $0x40] sm:$0x3]  ;;  %v13553_v34 = vld [vmem:[#allocation9 + $0x9c8] ss:$16 sps:$4 sm:$0xff]  }
 0x4a9   : > { %7275 = vmatpush1.bf16.msra.mxu0 %v13400_v37  ;;  %v13472_v37 = vld [vmem:[#allocation9 + $0x820] ss:$16 sps:$4 sm:$0xff]  }
 0x4aa   : > { %7361 = vmatpush1.bf16.msra.mxu1 %v13403_v38  ;;  %7276 = vmatprep.subr.bf16.mxu0 %v13408_v39  ;;  %v13480_v38 = vld [vmem:[#allocation9 + $0x844] ss:$16 sps:$4 sm:$0xff]   ;;  %v13483_v39 = vld [vmem:[#allocation9 + $0x84c] ss:$16 sps:$4 sm:$0xff]  }
 0x4ab   : > { %7362 = vmatprep.subr.bf16.mxu1 %v13411_v40  ;;  %v13481_v40 = vld [vmem:[#allocation9 + $0x848] ss:$16 sps:$4 sm:$0xff]  }
 0x4ad   : > { %7277 = vmatpush1.bf16.msra.mxu0 %v13406_v41  ;;  %v13486_v41 = vld [vmem:[#allocation9 + $0x864] ss:$16 sps:$4 sm:$0xff]  }
 0x4ae   : > { %7363 = vmatpush1.bf16.msra.mxu1 %v13409_v42  ;;  %7278 = vmatprep.subr.bf16.mxu0 %v13414_v43  ;;  %v13489_v42 = vld [vmem:[#allocation9 + $0x86c] ss:$16 sps:$4 sm:$0xff]   ;;  %v13484_v43 = vld [vmem:[#allocation9 + $0x860] ss:$16 sps:$4 sm:$0xff]  }
 0x4af   : > { %7364 = vmatprep.subr.bf16.mxu1 %v13417_v44  ;;  %v13487_v44 = vld [vmem:[#allocation9 + $0x868] ss:$16 sps:$4 sm:$0xff]  }
 0x4b1   : > { %7279 = vmatpush1.bf16.msra.mxu0 %v13412_v45  ;;  %v13492_v45 = vld [vmem:[#allocation9 + $0x884] ss:$16 sps:$4 sm:$0xff]  }
 0x4b2   : > { %7365 = vmatpush1.bf16.msra.mxu1 %v13415_v46  ;;  %7280 = vmatprep.subr.bf16.mxu0 %v13420_v47  ;;  %v13495_v46 = vld [vmem:[#allocation9 + $0x88c] ss:$16 sps:$4 sm:$0xff]   ;;  %v13490_v47 = vld [vmem:[#allocation9 + $0x880] ss:$16 sps:$4 sm:$0xff]  }
 0x4b3   : > { %7366 = vmatprep.subr.bf16.mxu1 %v13423_v48  ;;  %v13493_v48 = vld [vmem:[#allocation9 + $0x888] ss:$16 sps:$4 sm:$0xff]  }
 0x4b5   : > { %7281 = vmatpush1.bf16.msra.mxu0 %v13418_v15  ;;  %v13498_v15 = vld [vmem:[#allocation9 + $0x8a4] ss:$16 sps:$4 sm:$0xff]  }
 0x4b6   : > { %7367 = vmatpush1.bf16.msra.mxu1 %v13421_v49  ;;  %7282 = vmatprep.subr.bf16.mxu0 %v13426_v50  ;;  %v13501_v49 = vld [vmem:[#allocation9 + $0x8ac] ss:$16 sps:$4 sm:$0xff]   ;;  %v13496_v50 = vld [vmem:[#allocation9 + $0x8a0] ss:$16 sps:$4 sm:$0xff]  }
 0x4b7   : > { %7368 = vmatprep.subr.bf16.mxu1 %v13429_v51  ;;  %v13499_v51 = vld [vmem:[#allocation9 + $0x8a8] ss:$16 sps:$4 sm:$0xff]  }
 0x4b9   : > { %7283 = vmatpush1.bf16.msra.mxu0 %v13424_v52  ;;  %v13504_v52 = vld [vmem:[#allocation9 + $0x8c4] ss:$16 sps:$4 sm:$0xff]  }
 0x4ba   : > { %7369 = vmatpush1.bf16.msra.mxu1 %v13427_v53  ;;  %7284 = vmatprep.subr.bf16.mxu0 %v13432_v54  ;;  %v13507_v53 = vld [vmem:[#allocation9 + $0x8cc] ss:$16 sps:$4 sm:$0xff]   ;;  %v13502_v54 = vld [vmem:[#allocation9 + $0x8c0] ss:$16 sps:$4 sm:$0xff]  }
 0x4bb   : > { %7370 = vmatprep.subr.bf16.mxu1 %v13435_v56  ;;  %v13505_v56 = vld [vmem:[#allocation9 + $0x8c8] ss:$16 sps:$4 sm:$0xff]  }
 0x4bd   : > { %7285 = vmatpush1.bf16.msra.mxu0 %v13430_v57  ;;  %v13510_v57 = vld [vmem:[#allocation9 + $0x8e4] ss:$16 sps:$4 sm:$0xff]  }
 0x4be   : > { %7371 = vmatpush1.bf16.msra.mxu1 %v13433_v58  ;;  %7286 = vmatprep.subr.bf16.mxu0 %v13438_v59  ;;  %v13513_v58 = vld [vmem:[#allocation9 + $0x8ec] ss:$16 sps:$4 sm:$0xff]   ;;  %v13508_v59 = vld [vmem:[#allocation9 + $0x8e0] ss:$16 sps:$4 sm:$0xff]  }
 0x4bf   : > { %7372 = vmatprep.subr.bf16.mxu1 %v13441_v60  ;;  %v13511_v60 = vld [vmem:[#allocation9 + $0x8e8] ss:$16 sps:$4 sm:$0xff]  }
 0x4c1   : > { %7287 = vmatpush1.bf16.msra.mxu0 %v13436_v0  ;;  %v13516_v0 = vld [vmem:[#allocation9 + $0x904] ss:$16 sps:$4 sm:$0xff]  }
 0x4c2   : > { %7373 = vmatpush1.bf16.msra.mxu1 %v13439_v1  ;;  %7288 = vmatprep.subr.bf16.mxu0 %v13444_v2  ;;  %v13519_v1 = vld [vmem:[#allocation9 + $0x90c] ss:$16 sps:$4 sm:$0xff]   ;;  %v13514_v2 = vld [vmem:[#allocation9 + $0x900] ss:$16 sps:$4 sm:$0xff]  }
 0x4c3   : > { %7374 = vmatprep.subr.bf16.mxu1 %v13447_v3  ;;  %v13517_v3 = vld [vmem:[#allocation9 + $0x908] ss:$16 sps:$4 sm:$0xff]  }
 0x4c5   : > { %7289 = vmatpush1.bf16.msra.mxu0 %v13442_v4  ;;  %v13522_v4 = vld [vmem:[#allocation9 + $0x924] ss:$16 sps:$4 sm:$0xff]  }
 0x4c6   : > { %7375 = vmatpush1.bf16.msra.mxu1 %v13445_v5  ;;  %7290 = vmatprep.subr.bf16.mxu0 %v13450_v6  ;;  %v13525_v5 = vld [vmem:[#allocation9 + $0x92c] ss:$16 sps:$4 sm:$0xff]   ;;  %v13520_v6 = vld [vmem:[#allocation9 + $0x920] ss:$16 sps:$4 sm:$0xff]  }
 0x4c7   : > { %7376 = vmatprep.subr.bf16.mxu1 %v13453_v8  ;;  %v13523_v8 = vld [vmem:[#allocation9 + $0x928] ss:$16 sps:$4 sm:$0xff]  }
 0x4c9   : > { %7291 = vmatpush1.bf16.msra.mxu0 %v13448_v9  ;;  %v13528_v9 = vld [vmem:[#allocation9 + $0x944] ss:$16 sps:$4 sm:$0xff]  }
 0x4ca   : > { %7377 = vmatpush1.bf16.msra.mxu1 %v13451_v10  ;;  %7292 = vmatprep.subr.bf16.mxu0 %v13456_v11  ;;  %v13531_v10 = vld [vmem:[#allocation9 + $0x94c] ss:$16 sps:$4 sm:$0xff]   ;;  %v13526_v11 = vld [vmem:[#allocation9 + $0x940] ss:$16 sps:$4 sm:$0xff]  }
 0x4cb   : > { %7378 = vmatprep.subr.bf16.mxu1 %v13459_v13  ;;  %v13529_v13 = vld [vmem:[#allocation9 + $0x948] ss:$16 sps:$4 sm:$0xff]  }
 0x4cd   : > { %7293 = vmatpush1.bf16.msra.mxu0 %v13454_v14  ;;  %v13534_v14 = vld [vmem:[#allocation9 + $0x964] ss:$16 sps:$4 sm:$0xff]  }
 0x4ce   : > { %7379 = vmatpush1.bf16.msra.mxu1 %v13457_v29  ;;  %7294 = vmatprep.subr.bf16.mxu0 %v13462_v16  ;;  %v13537_v29 = vld [vmem:[#allocation9 + $0x96c] ss:$16 sps:$4 sm:$0xff]   ;;  %v13532_v16 = vld [vmem:[#allocation9 + $0x960] ss:$16 sps:$4 sm:$0xff]  }
 0x4cf   : > { %7380 = vmatprep.subr.bf16.mxu1 %v13465_v18  ;;  %v13540_v18 = vld [vmem:[#allocation9 + $0x984] ss:$16 sps:$4 sm:$0xff]  }
 0x4d1   : > { %7295 = vmatpush1.bf16.msra.mxu0 %v13460_v55  ;;  %v13538_v55 = vld [vmem:[#allocation9 + $0x980] ss:$16 sps:$4 sm:$0xff]  }
 0x4d2   : > { %7381 = vmatpush1.bf16.msra.mxu1 %v13463_v26  ;;  %8202 = vmatprep.subr.bf16.mxu0 %v13468_v61  ;;  %v13546_v26 = vld [vmem:[#allocation9 + $0x9a4] ss:$16 sps:$4 sm:$0xff]   ;;  %v13549_v61 = vld [vmem:[#allocation9 + $0x9ac] ss:$16 sps:$4 sm:$0xff]  }
 0x4d3   : > { %8288 = vmatprep.subr.bf16.mxu1 %v13471_v28  ;;  %v13547_v28 = vld [vmem:[#allocation9 + $0x9a8] ss:$16 sps:$4 sm:$0xff]  }
 0x4d4   : > { %7297 = vmatmul.mubr.bf16.vlgmr.msra.gmra.mrb[4].mxu0 %v5442_v32 }
 0x4d5   : > { %7383 = vmatmul.mubr.bf16.vlgmr.msra.gmra.mrb[4].mxu1 %v5442_v32  ;;  %8203 = vmatpush1.bf16.msra.mxu0 %v13466_v30  ;;  %v13555_v30 = vld [vmem:[#allocation9 + $0x9cc] ss:$16 sps:$4 sm:$0xff]   ;;  %v13550_v32 = vld [vmem:[#allocation9 + $0x9c0] ss:$16 sps:$4 sm:$0xff]  }
 0x4d6   : > { %8234 = vmatprep.mubr.bf16.mxu0 %v7551_v36  ;;  %8289 = vmatpush1.bf16.msra.mxu1 %v13469_v33  ;;  %v7393_v33 = vld [vmem:[#allocation3] sm:$0xfc] }
 0x4d7   : > { %8320 = vmatprep.mubr.bf16.mxu1 %v7551_v36  ;;  %8204 = vmatprep.subr.bf16.mxu0 %v13474_v35  ;;  %v13558_v35 = vld [vmem:[#allocation9 + $0x9e4] ss:$16 sps:$4 sm:$0xff]   ;;  %v13561_v36 = vld [vmem:[#allocation9 + $0x9ec] ss:$16 sps:$4 sm:$0xff]  }
 0x4d8   : > { %8290 = vmatprep.subr.bf16.mxu1 %v13477_v12  ;;  %v7400_v12 = vld [vmem:[#allocation3 + $0x58] sm:$0x3] }
 0x4d9   : > { %8205 = vmatpush1.bf16.msra.mxu0 %v13472_v37  ;;  %v7405_v37 = vpack.c.bf16 %v7397_v31, %v7397_v31  ;;  %v13621_v31 = vld [vmem:[#allocation9 + $0xb2c] ss:$16 sps:$4 sm:$0xff]  }
 0x4da   : > { %8291 = vmatpush1.bf16.msra.mxu1 %v13475_v62  ;;  %8206 = vmatprep.subr.bf16.mxu0 %v13480_v38  ;;  %v7396_v62 = vld [vmem:[#allocation3 + $0x18] sm:$0xfc]  ;;  %v13556_v38 = vld [vmem:[#allocation9 + $0x9e0] ss:$16 sps:$4 sm:$0xff]  }
 0x4db   : > { %8292 = vmatprep.subr.bf16.mxu1 %v13483_v39  ;;  %v14666_v39 = vld [vmem:[#allocation3 + $0x20] sm:$0xff] }
 0x4dd   : > { %8207 = vmatpush1.bf16.msra.mxu0 %v13478_v22  ;;  %v7401_v22 = vpack.c.bf16 %v14666_v39, %v7393_v33  ;;  %v13619_v33 = vld [vmem:[#allocation9 + $0xb28] ss:$16 sps:$4 sm:$0xff]  }
 0x4de   : > { %8293 = vmatpush1.bf16.msra.mxu1 %v13481_v40  ;;  %8208 = vmatprep.subr.bf16.mxu0 %v13486_v41  ;;  %v7408_v40 = vpack.c.bf16 %v7400_v12, %v7400_v12  ;;  %v13559_v41 = vld [vmem:[#allocation9 + $0x9e8] ss:$16 sps:$4 sm:$0xff]   ;;  %v13622_v12 = vld [vmem:[#allocation9 + $0xb40] ss:$16 sps:$4 sm:$0xff]  }
 0x4df   : > { %8294 = vmatprep.subr.bf16.mxu1 %v13489_v42  ;;  %v13564_v42 = vld [vmem:[#allocation9 + $0xa04] ss:$16 sps:$4 sm:$0xff]  }
 0x4e1   : > { %8209 = vmatpush1.bf16.msra.mxu0 %v13484_v43  ;;  %v7547_v43 = vrot.slane %v7405_v37, 1  ;;  %v13630_v37 = vld [vmem:[#allocation9 + $0xb64] ss:$16 sps:$4 sm:$0xff]  }
 0x4e2   : > { %8295 = vmatpush1.bf16.msra.mxu1 %v13487_v44  ;;  %8210 = vmatprep.subr.bf16.mxu0 %v13492_v45  ;;  %v13567_v44 = vld [vmem:[#allocation9 + $0xa0c] ss:$16 sps:$4 sm:$0xff]  }
 0x4e3   : > { %8296 = vmatprep.subr.bf16.mxu1 %v13495_v46  ;;  %v14669_v45 = vld [vmem:[#allocation3 + $0x38] sm:$0xff] }
 0x4e4   : > { %v7404_v46 = vpack.c.bf16 %v14669_v45, %v7396_v62  ;;  %v13633_v62 = vld [vmem:[#allocation9 + $0xb6c] ss:$16 sps:$4 sm:$0xff]  }
 0x4e5   : > { %8211 = vmatpush1.bf16.msra.mxu0 %v13490_v47  ;;  %v7546_v47 = vrot.slane %v7401_v22, 1  ;;  %v13631_v22 = vld [vmem:[#allocation9 + $0xb68] ss:$16 sps:$4 sm:$0xff]  }
 0x4e6   : > { %8297 = vmatpush1.bf16.msra.mxu1 %v13493_v48  ;;  %8212 = vmatprep.subr.bf16.mxu0 %v13498_v15  ;;  %v13562_v48 = vld [vmem:[#allocation9 + $0xa00] ss:$16 sps:$4 sm:$0xff]   ;;  %v7556_v15 = vrot.slane %v7408_v40, 1  ;;  %v13636_v40 = vld [vmem:[#allocation9 + $0xb84] ss:$16 sps:$4 sm:$0xff]  }
 0x4e7   : > { %8298 = vmatprep.subr.bf16.mxu1 %v13501_v49  ;;  %v13565_v49 = vld [vmem:[#allocation9 + $0xa08] ss:$16 sps:$4 sm:$0xff]  }
 0x4e9   : > { %8213 = vmatpush1.bf16.msra.mxu0 %v13496_v50  ;;  %v7548_v50 = vsel %vm2485_vm2, %v7546_v47, %v7547_v43  ;;  %v13637_v43 = vld [vmem:[#allocation9 + $0xb88] ss:$16 sps:$4 sm:$0xff]   ;;  %v13645_v47 = vld [vmem:[#allocation9 + $0xbac] ss:$16 sps:$4 sm:$0xff]  }
 0x4ea   : > { %8299 = vmatpush1.bf16.msra.mxu1 %v13499_v51  ;;  %8214 = vmatprep.subr.bf16.mxu0 %v13504_v52  ;;  %v7555_v51 = vrot.slane %v7404_v46, 1  ;;  %v13570_v52 = vld [vmem:[#allocation9 + $0xa24] ss:$16 sps:$4 sm:$0xff]   ;;  %v8387_v46 = vld [vmem:[#allocation3 + $0x48] sm:$0x7] }
 0x4eb   : > { %8300 = vmatprep.subr.bf16.mxu1 %v13507_v53  ;;  %v13573_v53 = vld [vmem:[#allocation9 + $0xa2c] ss:$16 sps:$4 sm:$0xff]  }
 0x4ed   : > { %8215 = vmatpush1.bf16.msra.mxu0 %v13502_v54  ;;  %v7557_v54 = vsel %vm2485_vm2, %v7555_v51, %v7556_v15  ;;  %v13640_v15 = vld [vmem:[#allocation9 + $0xba0] ss:$16 sps:$4 sm:$0xff]   ;;  %v13648_v51 = vld [vmem:[#allocation9 + $0xbc4] ss:$16 sps:$4 sm:$0xff]  }
 0x4ee   : > { %8301 = vmatpush1.bf16.msra.mxu1 %v13505_v56  ;;  %8216 = vmatprep.subr.bf16.mxu0 %v13510_v57  ;;  %v13568_v56 = vld [vmem:[#allocation9 + $0xa20] ss:$16 sps:$4 sm:$0xff]   ;;  %v13571_v57 = vld [vmem:[#allocation9 + $0xa28] ss:$16 sps:$4 sm:$0xff]  }
 0x4ef   : > { %8302 = vmatprep.subr.bf16.mxu1 %v13513_v58  ;;  %v13576_v58 = vld [vmem:[#allocation9 + $0xa44] ss:$16 sps:$4 sm:$0xff]  }
 0x4f1   : > { %8217 = vmatpush1.bf16.msra.mxu0 %v13508_v59  ;;  %v13579_v59 = vld [vmem:[#allocation9 + $0xa4c] ss:$16 sps:$4 sm:$0xff]  }
 0x4f2   : > { %8303 = vmatpush1.bf16.msra.mxu1 %v13511_v60  ;;  %8218 = vmatprep.subr.bf16.mxu0 %v13516_v0  ;;  %v13574_v60 = vld [vmem:[#allocation9 + $0xa40] ss:$16 sps:$4 sm:$0xff]   ;;  %v13577_v0 = vld [vmem:[#allocation9 + $0xa48] ss:$16 sps:$4 sm:$0xff]  }
 0x4f3   : > { %8304 = vmatprep.subr.bf16.mxu1 %v13519_v1  ;;  %v13582_v1 = vld [vmem:[#allocation9 + $0xa64] ss:$16 sps:$4 sm:$0xff]  }
 0x4f5   : > { %8219 = vmatpush1.bf16.msra.mxu0 %v13514_v2  ;;  %v13585_v2 = vld [vmem:[#allocation9 + $0xa6c] ss:$16 sps:$4 sm:$0xff]  }
 0x4f6   : > { %8305 = vmatpush1.bf16.msra.mxu1 %v13517_v3  ;;  %8220 = vmatprep.subr.bf16.mxu0 %v13522_v4  ;;  %v13580_v3 = vld [vmem:[#allocation9 + $0xa60] ss:$16 sps:$4 sm:$0xff]   ;;  %v13583_v4 = vld [vmem:[#allocation9 + $0xa68] ss:$16 sps:$4 sm:$0xff]  }
 0x4f7   : > { %8306 = vmatprep.subr.bf16.mxu1 %v13525_v5  ;;  %v13588_v5 = vld [vmem:[#allocation9 + $0xa84] ss:$16 sps:$4 sm:$0xff]  }
 0x4f9   : > { %8221 = vmatpush1.bf16.msra.mxu0 %v13520_v6  ;;  %v13591_v6 = vld [vmem:[#allocation9 + $0xa8c] ss:$16 sps:$4 sm:$0xff]  }
 0x4fa   : > { %8307 = vmatpush1.bf16.msra.mxu1 %v13523_v8  ;;  %8222 = vmatprep.subr.bf16.mxu0 %v13528_v9  ;;  %v13586_v8 = vld [vmem:[#allocation9 + $0xa80] ss:$16 sps:$4 sm:$0xff]   ;;  %v13589_v9 = vld [vmem:[#allocation9 + $0xa88] ss:$16 sps:$4 sm:$0xff]  }
 0x4fb   : > { %8308 = vmatprep.subr.bf16.mxu1 %v13531_v10  ;;  %v13594_v10 = vld [vmem:[#allocation9 + $0xaa4] ss:$16 sps:$4 sm:$0xff]  }
 0x4fd   : > { %8223 = vmatpush1.bf16.msra.mxu0 %v13526_v11  ;;  %v13597_v11 = vld [vmem:[#allocation9 + $0xaac] ss:$16 sps:$4 sm:$0xff]  }
 0x4fe   : > { %8309 = vmatpush1.bf16.msra.mxu1 %v13529_v13  ;;  %8224 = vmatprep.subr.bf16.mxu0 %v13534_v14  ;;  %v13592_v13 = vld [vmem:[#allocation9 + $0xaa0] ss:$16 sps:$4 sm:$0xff]   ;;  %v13595_v14 = vld [vmem:[#allocation9 + $0xaa8] ss:$16 sps:$4 sm:$0xff]  }
 0x4ff   : > { %8310 = vmatprep.subr.bf16.mxu1 %v13537_v29  ;;  %v13600_v29 = vld [vmem:[#allocation9 + $0xac4] ss:$16 sps:$4 sm:$0xff]  }
 0x501   : > { %8225 = vmatpush1.bf16.msra.mxu0 %v13532_v16  ;;  %v13603_v16 = vld [vmem:[#allocation9 + $0xacc] ss:$16 sps:$4 sm:$0xff]  }
 0x502   : > { %8311 = vmatpush1.bf16.msra.mxu1 %v13535_v17  ;;  %8226 = vmatprep.subr.bf16.mxu0 %v13540_v18  ;;  %v13598_v17 = vld [vmem:[#allocation9 + $0xac0] ss:$16 sps:$4 sm:$0xff]   ;;  %v13601_v18 = vld [vmem:[#allocation9 + $0xac8] ss:$16 sps:$4 sm:$0xff]  }
 0x503   : > { %8312 = vmatprep.subr.bf16.mxu1 %v13543_v19  ;;  %v13606_v19 = vld [vmem:[#allocation9 + $0xae4] ss:$16 sps:$4 sm:$0xff]  }
 0x505   : > { %8227 = vmatpush1.bf16.msra.mxu0 %v13538_v55  ;;  %v13609_v55 = vld [vmem:[#allocation9 + $0xaec] ss:$16 sps:$4 sm:$0xff]  }
 0x506   : > { %8313 = vmatpush1.bf16.msra.mxu1 %v13541_v25  ;;  %8228 = vmatprep.subr.bf16.mxu0 %v13546_v26  ;;  %v13604_v25 = vld [vmem:[#allocation9 + $0xae0] ss:$16 sps:$4 sm:$0xff]   ;;  %v13607_v26 = vld [vmem:[#allocation9 + $0xae8] ss:$16 sps:$4 sm:$0xff]  }
 0x507   : > { %8314 = vmatprep.subr.bf16.mxu1 %v13549_v61  ;;  %v13612_v61 = vld [vmem:[#allocation9 + $0xb04] ss:$16 sps:$4 sm:$0xff]  }
 0x509   : > { %8229 = vmatpush1.bf16.msra.mxu0 %v13544_v27  ;;  %v13615_v27 = vld [vmem:[#allocation9 + $0xb0c] ss:$16 sps:$4 sm:$0xff]  }
 0x50a   : > { %8315 = vmatpush1.bf16.msra.mxu1 %v13547_v28  ;;  %8230 = vmatprep.subr.bf16.mxu0 %v13552_v63  ;;  %v13610_v28 = vld [vmem:[#allocation9 + $0xb00] ss:$16 sps:$4 sm:$0xff]   ;;  %v13613_v63 = vld [vmem:[#allocation9 + $0xb08] ss:$16 sps:$4 sm:$0xff]  }
 0x50b   : > { %8316 = vmatprep.subr.bf16.mxu1 %v13555_v30  ;;  %v13618_v30 = vld [vmem:[#allocation9 + $0xb24] ss:$16 sps:$4 sm:$0xff]  }
 0x50d   : > { %8231 = vmatpush1.bf16.msra.mxu0 %v13550_v32  ;;  %v13616_v32 = vld [vmem:[#allocation9 + $0xb20] ss:$16 sps:$4 sm:$0xff]  }
 0x50e   : > { %8317 = vmatpush1.bf16.msra.mxu1 %v13553_v34  ;;  %8232 = vmatprep.subr.bf16.mxu0 %v13558_v35  ;;  %v13624_v34 = vld [vmem:[#allocation9 + $0xb44] ss:$16 sps:$4 sm:$0xff]   ;;  %v13627_v35 = vld [vmem:[#allocation9 + $0xb4c] ss:$16 sps:$4 sm:$0xff]  }
 0x50f   : > { %8318 = vmatprep.subr.bf16.mxu1 %v13561_v36  ;;  %v13625_v36 = vld [vmem:[#allocation9 + $0xb48] ss:$16 sps:$4 sm:$0xff]  }
 0x511   : > { %8233 = vmatpush1.bf16.msra.mxu0 %v13556_v38  ;;  %v13628_v38 = vld [vmem:[#allocation9 + $0xb60] ss:$16 sps:$4 sm:$0xff]  }
 0x512   : > { %8319 = vmatpush1.bf16.msra.mxu1 %v13559_v41  ;;  %8245 = vmatprep.subr.bf16.mxu0 %v13564_v42  ;;  %v13639_v41 = vld [vmem:[#allocation9 + $0xb8c] ss:$16 sps:$4 sm:$0xff]   ;;  %v13634_v42 = vld [vmem:[#allocation9 + $0xb80] ss:$16 sps:$4 sm:$0xff]  }
 0x513   : > { %8331 = vmatprep.subr.bf16.mxu1 %v13567_v44  ;;  %v13642_v44 = vld [vmem:[#allocation9 + $0xba4] ss:$16 sps:$4 sm:$0xff]  }
 0x514   : > { %8235 = vmatmul.mubr.bf16.vlgmr.msra.gmra.mrb[4].mxu0 %v7548_v50 }
 0x515   : > { %8321 = vmatmul.mubr.bf16.vlgmr.msra.gmra.mrb[4].mxu1 %v7548_v50  ;;  %8246 = vmatpush1.bf16.msra.mxu0 %v13562_v48  ;;  %v8383_v48 = vld [vmem:[#allocation3 + $0x8] sm:$0xf8] }
 0x516   : > { %8277 = vmatprep.mubr.bf16.mxu0 %v7557_v54  ;;  %8332 = vmatpush1.bf16.msra.mxu1 %v13565_v49  ;;  %v8395_v49 = vpack.c.bf16 %v8387_v46, %v8387_v46  ;;  %v13643_v50 = vld [vmem:[#allocation9 + $0xba8] ss:$16 sps:$4 sm:$0xff]   ;;  %v13688_v46 = vld [vmem:[#allocation9 + $0xca0] ss:$16 sps:$4 sm:$0xff]  }
 0x517   : > { %8363 = vmatprep.mubr.bf16.mxu1 %v7557_v54  ;;  %8247 = vmatprep.subr.bf16.mxu0 %v13570_v52  ;;  %v13651_v52 = vld [vmem:[#allocation9 + $0xbcc] ss:$16 sps:$4 sm:$0xff]  }
 0x518   : > { %8333 = vmatprep.subr.bf16.mxu1 %v13573_v53  ;;  %v14674_v53 = vld [vmem:[#allocation3 + $0x28] sm:$0xff] }
 0x519   : > { %8248 = vmatpush1.bf16.msra.mxu0 %v13568_v56  ;;  %v8391_v54 = vpack.c.bf16 %v14674_v53, %v8383_v48  ;;  %v7399_v56 = vld [vmem:[#allocation3 + $0x50] sm:$0x3]  ;;  %v13696_v48 = vld [vmem:[#allocation9 + $0xcc4] ss:$16 sps:$4 sm:$0xff]  }
 0x51a   : > { %8334 = vmatpush1.bf16.msra.mxu1 %v13571_v57  ;;  %8249 = vmatprep.subr.bf16.mxu0 %v13576_v58  ;;  %v13646_v57 = vld [vmem:[#allocation9 + $0xbc0] ss:$16 sps:$4 sm:$0xff]   ;;  %v8553_v58 = vshrl.u32 %v8395_v49, 16 }
 0x51b   : > { %8335 = vmatprep.subr.bf16.mxu1 %v13579_v59  ;;  %v8556_v59 = vshll.u32 %v8395_v49, 16  ;;  %v13694_v49 = vld [vmem:[#allocation9 + $0xcc0] ss:$16 sps:$4 sm:$0xff]  }
 0x51d   : > { %8250 = vmatpush1.bf16.msra.mxu0 %v13574_v60  ;;  %v13649_v60 = vld [vmem:[#allocation9 + $0xbc8] ss:$16 sps:$4 sm:$0xff]  }
 0x51e   : > { %8336 = vmatpush1.bf16.msra.mxu1 %v13577_v0  ;;  %8251 = vmatprep.subr.bf16.mxu0 %v13582_v1  ;;  %v13654_v0 = vld [vmem:[#allocation9 + $0xbe4] ss:$16 sps:$4 sm:$0xff]  }
 0x51f   : > { %8337 = vmatprep.subr.bf16.mxu1 %v13585_v2  ;;  %v7395_v1 = vld [vmem:[#allocation3 + $0x10] sm:$0xfc]  ;;  %v13657_v2 = vld [vmem:[#allocation9 + $0xbec] ss:$16 sps:$4 sm:$0xff]  }
 0x521   : > { %8252 = vmatpush1.bf16.msra.mxu0 %v13580_v3  ;;  %v7407_v3 = vpack.c.bf16 %v7399_v56, %v7399_v56  ;;  %v13703_v56 = vld [vmem:[#allocation9 + $0xce8] ss:$16 sps:$4 sm:$0xff]  }
 0x522   : > { %8338 = vmatpush1.bf16.msra.mxu1 %v13583_v4  ;;  %8253 = vmatprep.subr.bf16.mxu0 %v13588_v5  ;;  %v8545_v4 = vshrl.u32 %v8391_v54, 16  ;;  %v8548_v5 = vshll.u32 %v8391_v54, 16  ;;  %v13700_v54 = vld [vmem:[#allocation9 + $0xce0] ss:$16 sps:$4 sm:$0xff]  }
 0x523   : > { %8339 = vmatprep.subr.bf16.mxu1 %v13591_v6  ;;  %v13652_v6 = vld [vmem:[#allocation9 + $0xbe0] ss:$16 sps:$4 sm:$0xff]  }
 0x525   : > { %8254 = vmatpush1.bf16.msra.mxu0 %v13586_v8  ;;  %v14677_v8 = vld [vmem:[#allocation3 + $0x30] sm:$0xff] }
 0x526   : > { %8340 = vmatpush1.bf16.msra.mxu1 %v13589_v9  ;;  %8255 = vmatprep.subr.bf16.mxu0 %v13594_v10  ;;  %v7403_v9 = vpack.c.bf16 %v14677_v8, %v7395_v1  ;;  %v8555_v10 = vrot.slane %v8553_v58, 1  ;;  %v13711_v58 = vld [vmem:[#allocation9 + $0xd0c] ss:$16 sps:$4 sm:$0xff]  }
 0x527   : > { %8341 = vmatprep.subr.bf16.mxu1 %v13597_v11  ;;  %v8558_v11 = vrot.slane %v8556_v59, 2  ;;  %v13706_v59 = vld [vmem:[#allocation9 + $0xd00] ss:$16 sps:$4 sm:$0xff]   ;;  %v13717_v1 = vld [vmem:[#allocation9 + $0xd2c] ss:$16 sps:$4 sm:$0xff]  }
 0x529   : > { %8256 = vmatpush1.bf16.msra.mxu0 %v13592_v13  ;;  %v13655_v13 = vld [vmem:[#allocation9 + $0xbe8] ss:$16 sps:$4 sm:$0xff]  }
 0x52a   : > { %8342 = vmatpush1.bf16.msra.mxu1 %v13595_v14  ;;  %8257 = vmatprep.subr.bf16.mxu0 %v13600_v29  ;;  %v13660_v14 = vld [vmem:[#allocation9 + $0xc04] ss:$16 sps:$4 sm:$0xff]   ;;  %v7553_v29 = vrot.slane %v7407_v3, 1  ;;  %v13715_v3 = vld [vmem:[#allocation9 + $0xd28] ss:$16 sps:$4 sm:$0xff]  }
 0x52b   : > { %8343 = vmatprep.subr.bf16.mxu1 %v13603_v16  ;;  %v13663_v16 = vld [vmem:[#allocation9 + $0xc0c] ss:$16 sps:$4 sm:$0xff]  }
 0x52d   : > { %8258 = vmatpush1.bf16.msra.mxu0 %v13598_v17  ;;  %v8547_v17 = vrot.slane %v8545_v4, 1  ;;  %v13720_v4 = vld [vmem:[#allocation9 + $0xd44] ss:$16 sps:$4 sm:$0xff]  }
 0x52e   : > { %8344 = vmatpush1.bf16.msra.mxu1 %v13601_v18  ;;  %8259 = vmatprep.subr.bf16.mxu0 %v13606_v19  ;;  %v8550_v18 = vrot.slane %v8548_v5, 2  ;;  %v7552_v19 = vrot.slane %v7403_v9, 1  ;;  %v13723_v5 = vld [vmem:[#allocation9 + $0xd4c] ss:$16 sps:$4 sm:$0xff]   ;;  %v13721_v9 = vld [vmem:[#allocation9 + $0xd48] ss:$16 sps:$4 sm:$0xff]  }
 0x52f   : > { %8345 = vmatprep.subr.bf16.mxu1 %v13609_v55  ;;  %v13658_v55 = vld [vmem:[#allocation9 + $0xc00] ss:$16 sps:$4 sm:$0xff]  }
 0x531   : > { %8260 = vmatpush1.bf16.msra.mxu0 %v13604_v25  ;;  %v8559_v25 = vor.u32 %v8558_v11, %v8555_v10  ;;  %v13726_v10 = vld [vmem:[#allocation9 + $0xd64] ss:$16 sps:$4 sm:$0xff]   ;;  %v13729_v11 = vld [vmem:[#allocation9 + $0xd6c] ss:$16 sps:$4 sm:$0xff]  }
 0x532   : > { %8346 = vmatpush1.bf16.msra.mxu1 %v13607_v26  ;;  %8261 = vmatprep.subr.bf16.mxu0 %v13612_v61  ;;  %v13661_v26 = vld [vmem:[#allocation9 + $0xc08] ss:$16 sps:$4 sm:$0xff]   ;;  %v7554_v61 = vsel %vm2485_vm2, %v7552_v19, %v7553_v29  ;;  %v13732_v29 = vld [vmem:[#allocation9 + $0xd84] ss:$16 sps:$4 sm:$0xff]  }
 0x533   : > { %8347 = vmatprep.subr.bf16.mxu1 %v13615_v27  ;;  %v8551_v27 = vor.u32 %v8550_v18, %v8547_v17  ;;  %v8386_v17 = vld [vmem:[#allocation3 + $0x40] sm:$0x7]  ;;  %v8382_v19 = vld [vmem:[#allocation3] sm:$0xf8] }
 0x534   : > { %v13730_v18 = vld [vmem:[#allocation9 + $0xd80] ss:$16 sps:$4 sm:$0xff]  }
 0x535   : > { %8262 = vmatpush1.bf16.msra.mxu0 %v13610_v28  ;;  %v13666_v28 = vld [vmem:[#allocation9 + $0xc24] ss:$16 sps:$4 sm:$0xff]  }
 0x536   : > { %8348 = vmatpush1.bf16.msra.mxu1 %v13613_v63  ;;  %8263 = vmatprep.subr.bf16.mxu0 %v13618_v30  ;;  %v13669_v63 = vld [vmem:[#allocation9 + $0xc2c] ss:$16 sps:$4 sm:$0xff]   ;;  %v8560_v30 = vsel %vm3467_vm3, %v8551_v27, %v8559_v25  ;;  %v13738_v25 = vld [vmem:[#allocation9 + $0xda4] ss:$16 sps:$4 sm:$0xff]   ;;  %v8394_v27 = vpack.c.bf16 %v8386_v17, %v8386_v17 }
 0x537   : > { %8349 = vmatprep.subr.bf16.mxu1 %v13621_v31  ;;  %v13664_v31 = vld [vmem:[#allocation9 + $0xc20] ss:$16 sps:$4 sm:$0xff]   ;;  %v13777_v17 = vld [vmem:[#allocation9 + $0xe6c] ss:$16 sps:$4 sm:$0xff]  }
 0x539   : > { %8264 = vmatpush1.bf16.msra.mxu0 %v13616_v32  ;;  %v13667_v32 = vld [vmem:[#allocation9 + $0xc28] ss:$16 sps:$4 sm:$0xff]  }
 0x53a   : > { %8350 = vmatpush1.bf16.msra.mxu1 %v13619_v33  ;;  %8265 = vmatprep.subr.bf16.mxu0 %v13624_v34  ;;  %v13672_v33 = vld [vmem:[#allocation9 + $0xc44] ss:$16 sps:$4 sm:$0xff]   ;;  %v13675_v34 = vld [vmem:[#allocation9 + $0xc4c] ss:$16 sps:$4 sm:$0xff]  }
 0x53b   : > { %8351 = vmatprep.subr.bf16.mxu1 %v13627_v35  ;;  %v13670_v35 = vld [vmem:[#allocation9 + $0xc40] ss:$16 sps:$4 sm:$0xff]  }
 0x53d   : > { %8266 = vmatpush1.bf16.msra.mxu0 %v13622_v12  ;;  %v13673_v12 = vld [vmem:[#allocation9 + $0xc48] ss:$16 sps:$4 sm:$0xff]  }
 0x53e   : > { %8352 = vmatpush1.bf16.msra.mxu1 %v13625_v36  ;;  %8267 = vmatprep.subr.bf16.mxu0 %v13630_v37  ;;  %v13678_v36 = vld [vmem:[#allocation9 + $0xc64] ss:$16 sps:$4 sm:$0xff]   ;;  %v13681_v37 = vld [vmem:[#allocation9 + $0xc6c] ss:$16 sps:$4 sm:$0xff]  }
 0x53f   : > { %8353 = vmatprep.subr.bf16.mxu1 %v13633_v62  ;;  %v13676_v62 = vld [vmem:[#allocation9 + $0xc60] ss:$16 sps:$4 sm:$0xff]  }
 0x541   : > { %8268 = vmatpush1.bf16.msra.mxu0 %v13628_v38  ;;  %v13679_v38 = vld [vmem:[#allocation9 + $0xc68] ss:$16 sps:$4 sm:$0xff]  }
 0x542   : > { %8354 = vmatpush1.bf16.msra.mxu1 %v13631_v22  ;;  %8269 = vmatprep.subr.bf16.mxu0 %v13636_v40  ;;  %v13684_v22 = vld [vmem:[#allocation9 + $0xc84] ss:$16 sps:$4 sm:$0xff]   ;;  %v13687_v40 = vld [vmem:[#allocation9 + $0xc8c] ss:$16 sps:$4 sm:$0xff]  }
 0x543   : > { %8355 = vmatprep.subr.bf16.mxu1 %v13639_v41  ;;  %v13682_v41 = vld [vmem:[#allocation9 + $0xc80] ss:$16 sps:$4 sm:$0xff]  }
 0x545   : > { %8270 = vmatpush1.bf16.msra.mxu0 %v13634_v42  ;;  %v13685_v42 = vld [vmem:[#allocation9 + $0xc88] ss:$16 sps:$4 sm:$0xff]  }
 0x546   : > { %8356 = vmatpush1.bf16.msra.mxu1 %v13637_v43  ;;  %8271 = vmatprep.subr.bf16.mxu0 %v13642_v44  ;;  %v13690_v43 = vld [vmem:[#allocation9 + $0xca4] ss:$16 sps:$4 sm:$0xff]   ;;  %v13693_v44 = vld [vmem:[#allocation9 + $0xcac] ss:$16 sps:$4 sm:$0xff]  }
 0x547   : > { %8357 = vmatprep.subr.bf16.mxu1 %v13645_v47  ;;  %v13691_v47 = vld [vmem:[#allocation9 + $0xca8] ss:$16 sps:$4 sm:$0xff]  }
 0x549   : > { %8272 = vmatpush1.bf16.msra.mxu0 %v13640_v15  ;;  %v13699_v15 = vld [vmem:[#allocation9 + $0xccc] ss:$16 sps:$4 sm:$0xff]  }
 0x54a   : > { %8358 = vmatpush1.bf16.msra.mxu1 %v13643_v50  ;;  %8273 = vmatprep.subr.bf16.mxu0 %v13648_v51  ;;  %v13697_v50 = vld [vmem:[#allocation9 + $0xcc8] ss:$16 sps:$4 sm:$0xff]   ;;  %v13702_v51 = vld [vmem:[#allocation9 + $0xce4] ss:$16 sps:$4 sm:$0xff]  }
 0x54b   : > { %8359 = vmatprep.subr.bf16.mxu1 %v13651_v52  ;;  %v13705_v52 = vld [vmem:[#allocation9 + $0xcec] ss:$16 sps:$4 sm:$0xff]  }
 0x54d   : > { %8274 = vmatpush1.bf16.msra.mxu0 %v13646_v57  ;;  %v13708_v57 = vld [vmem:[#allocation9 + $0xd04] ss:$16 sps:$4 sm:$0xff]  }
 0x54e   : > { %8360 = vmatpush1.bf16.msra.mxu1 %v13649_v60  ;;  %8275 = vmatprep.subr.bf16.mxu0 %v13654_v0  ;;  %v13709_v60 = vld [vmem:[#allocation9 + $0xd08] ss:$16 sps:$4 sm:$0xff]   ;;  %v13714_v0 = vld [vmem:[#allocation9 + $0xd24] ss:$16 sps:$4 sm:$0xff]  }
 0x54f   : > { %8361 = vmatprep.subr.bf16.mxu1 %v13657_v2  ;;  %v13712_v2 = vld [vmem:[#allocation9 + $0xd20] ss:$16 sps:$4 sm:$0xff]  }
 0x551   : > { %8276 = vmatpush1.bf16.msra.mxu0 %v13652_v6  ;;  %v13718_v6 = vld [vmem:[#allocation9 + $0xd40] ss:$16 sps:$4 sm:$0xff]  }
 0x552   : > { %8362 = vmatpush1.bf16.msra.mxu1 %v13655_v13  ;;  %9239 = vmatprep.subr.bf16.mxu0 %v13660_v14  ;;  %v13724_v13 = vld [vmem:[#allocation9 + $0xd60] ss:$16 sps:$4 sm:$0xff]   ;;  %v13727_v14 = vld [vmem:[#allocation9 + $0xd68] ss:$16 sps:$4 sm:$0xff]  }
 0x553   : > { %9325 = vmatprep.subr.bf16.mxu1 %v13663_v16  ;;  %v13735_v16 = vld [vmem:[#allocation9 + $0xd8c] ss:$16 sps:$4 sm:$0xff]  }
 0x554   : > { %8278 = vmatmul.mubr.bf16.vlgmr.msra.gmra.mrb[4].mxu0 %v7554_v61 }
 0x555   : > { %8364 = vmatmul.mubr.bf16.vlgmr.msra.gmra.mrb[4].mxu1 %v7554_v61  ;;  %9240 = vmatpush1.bf16.msra.mxu0 %v13658_v55  ;;  %v13733_v55 = vld [vmem:[#allocation9 + $0xd88] ss:$16 sps:$4 sm:$0xff]   ;;  %v13741_v61 = vld [vmem:[#allocation9 + $0xdac] ss:$16 sps:$4 sm:$0xff]  }
 0x556   : > { %9271 = vmatprep.mubr.bf16.mxu0 %v8560_v30  ;;  %9326 = vmatpush1.bf16.msra.mxu1 %v13661_v26  ;;  %v8389_v26 = vld [vmem:[#allocation3 + $0x58] sm:$0x7] }
 0x557   : > { %9357 = vmatprep.mubr.bf16.mxu1 %v8560_v30  ;;  %9241 = vmatprep.subr.bf16.mxu0 %v13666_v28  ;;  %v8385_v28 = vld [vmem:[#allocation3 + $0x18] sm:$0xf8]  ;;  %v8390_v30 = vpack.c.bf16 %v14666_v39, %v8382_v19 }
 0x558   : > { %9327 = vmatprep.subr.bf16.mxu1 %v13669_v63  ;;  %v13736_v63 = vld [vmem:[#allocation9 + $0xda0] ss:$16 sps:$4 sm:$0xff]   ;;  %v13745_v39 = vld [vmem:[#allocation9 + $0xdc8] ss:$16 sps:$4 sm:$0xff]  }
 0x559   : > { %9242 = vmatpush1.bf16.msra.mxu0 %v13664_v31  ;;  %v8397_v31 = vpack.c.bf16 %v8389_v26, %v8389_v26  ;;  %v13775_v19 = vld [vmem:[#allocation9 + $0xe68] ss:$16 sps:$4 sm:$0xff]   ;;  %v13778_v26 = vld [vmem:[#allocation9 + $0xe80] ss:$16 sps:$4 sm:$0xff]  }
 0x55a   : > { %9328 = vmatpush1.bf16.msra.mxu1 %v13667_v32  ;;  %9243 = vmatprep.subr.bf16.mxu0 %v13672_v33  ;;  %v13739_v32 = vld [vmem:[#allocation9 + $0xda8] ss:$16 sps:$4 sm:$0xff]   ;;  %v13744_v33 = vld [vmem:[#allocation9 + $0xdc4] ss:$16 sps:$4 sm:$0xff]  }
 0x55b   : > { %9329 = vmatprep.subr.bf16.mxu1 %v13675_v34  ;;  %v13747_v34 = vld [vmem:[#allocation9 + $0xdcc] ss:$16 sps:$4 sm:$0xff]  }
 0x55d   : > { %9244 = vmatpush1.bf16.msra.mxu0 %v13670_v35  ;;  %v8536_v35 = vshrl.u32 %v8394_v27, 16 }
 0x55e   : > { %9330 = vmatpush1.bf16.msra.mxu1 %v13673_v12  ;;  %9245 = vmatprep.subr.bf16.mxu0 %v13678_v36  ;;  %v8539_v12 = vshll.u32 %v8394_v27, 16  ;;  %v8393_v36 = vpack.c.bf16 %v14669_v45, %v8385_v28  ;;  %v13786_v27 = vld [vmem:[#allocation9 + $0xea4] ss:$16 sps:$4 sm:$0xff]   ;;  %v13789_v28 = vld [vmem:[#allocation9 + $0xeac] ss:$16 sps:$4 sm:$0xff]  }
 0x55f   : > { %9331 = vmatprep.subr.bf16.mxu1 %v13681_v37  ;;  %v13742_v37 = vld [vmem:[#allocation9 + $0xdc0] ss:$16 sps:$4 sm:$0xff]  }
 0x561   : > { %9246 = vmatpush1.bf16.msra.mxu0 %v13676_v62  ;;  %v8528_v62 = vshrl.u32 %v8390_v30, 16 }
 0x562   : > { %9332 = vmatpush1.bf16.msra.mxu1 %v13679_v38  ;;  %9247 = vmatprep.subr.bf16.mxu0 %v13684_v22  ;;  %v8531_v38 = vshll.u32 %v8390_v30, 16  ;;  %v8587_v22 = vshrl.u32 %v8397_v31, 16  ;;  %v13787_v30 = vld [vmem:[#allocation9 + $0xea8] ss:$16 sps:$4 sm:$0xff]  }
 0x563   : > { %9333 = vmatprep.subr.bf16.mxu1 %v13687_v40  ;;  %v8590_v40 = vshll.u32 %v8397_v31, 16  ;;  %v13792_v31 = vld [vmem:[#allocation9 + $0xec4] ss:$16 sps:$4 sm:$0xff]  }
 0x564   : > { %v8533_v45 = vrot.slane %v8531_v38, 2  ;;  %v13807_v38 = vld [vmem:[#allocation9 + $0xf0c] ss:$16 sps:$4 sm:$0xff]  }
 0x565   : > { %9248 = vmatpush1.bf16.msra.mxu0 %v13682_v41  ;;  %v13750_v41 = vld [vmem:[#allocation9 + $0xde4] ss:$16 sps:$4 sm:$0xff]  }
 0x566   : > { %9334 = vmatpush1.bf16.msra.mxu1 %v13685_v42  ;;  %9249 = vmatprep.subr.bf16.mxu0 %v13690_v43  ;;  %v13753_v42 = vld [vmem:[#allocation9 + $0xdec] ss:$16 sps:$4 sm:$0xff]   ;;  %v8538_v43 = vrot.slane %v8536_v35, 1  ;;  %v13798_v35 = vld [vmem:[#allocation9 + $0xee4] ss:$16 sps:$4 sm:$0xff]  }
 0x567   : > { %9335 = vmatprep.subr.bf16.mxu1 %v13693_v44  ;;  %v8541_v44 = vrot.slane %v8539_v12, 2  ;;  %v13801_v12 = vld [vmem:[#allocation9 + $0xeec] ss:$16 sps:$4 sm:$0xff]  }
 0x569   : > { %9250 = vmatpush1.bf16.msra.mxu0 %v13688_v46  ;;  %v8579_v46 = vshrl.u32 %v8393_v36, 16 }
 0x56a   : > { %9336 = vmatpush1.bf16.msra.mxu1 %v13691_v47  ;;  %9251 = vmatprep.subr.bf16.mxu0 %v13696_v48  ;;  %v8582_v47 = vshll.u32 %v8393_v36, 16  ;;  %v13748_v48 = vld [vmem:[#allocation9 + $0xde0] ss:$16 sps:$4 sm:$0xff]  }
 0x56b   : > { %9337 = vmatprep.subr.bf16.mxu1 %v13699_v15  ;;  %v8530_v15 = vrot.slane %v8528_v62, 1  ;;  %v13796_v36 = vld [vmem:[#allocation9 + $0xee0] ss:$16 sps:$4 sm:$0xff]   ;;  %v13804_v62 = vld [vmem:[#allocation9 + $0xf04] ss:$16 sps:$4 sm:$0xff]  }
 0x56d   : > { %9252 = vmatpush1.bf16.msra.mxu0 %v13694_v49  ;;  %v8589_v49 = vrot.slane %v8587_v22, 1  ;;  %v13802_v22 = vld [vmem:[#allocation9 + $0xf00] ss:$16 sps:$4 sm:$0xff]  }
 0x56e   : > { %9338 = vmatpush1.bf16.msra.mxu1 %v13697_v50  ;;  %9253 = vmatprep.subr.bf16.mxu0 %v13702_v51  ;;  %v8592_v50 = vrot.slane %v8590_v40, 2  ;;  %v13751_v51 = vld [vmem:[#allocation9 + $0xde8] ss:$16 sps:$4 sm:$0xff]  }
 0x56f   : > { %9339 = vmatprep.subr.bf16.mxu1 %v13705_v52  ;;  %v13756_v52 = vld [vmem:[#allocation9 + $0xe04] ss:$16 sps:$4 sm:$0xff]   ;;  %v13805_v40 = vld [vmem:[#allocation9 + $0xf08] ss:$16 sps:$4 sm:$0xff]  }
 0x571   : > { %9254 = vmatpush1.bf16.msra.mxu0 %v13700_v54  ;;  %v8542_v54 = vor.u32 %v8541_v44, %v8538_v43  ;;  %v13811_v43 = vld [vmem:[#allocation9 + $0xf28] ss:$16 sps:$4 sm:$0xff]   ;;  %v13816_v44 = vld [vmem:[#allocation9 + $0xf44] ss:$16 sps:$4 sm:$0xff]  }
 0x572   : > { %9340 = vmatpush1.bf16.msra.mxu1 %v13703_v56  ;;  %9255 = vmatprep.subr.bf16.mxu0 %v13708_v57  ;;  %v13759_v56 = vld [vmem:[#allocation9 + $0xe0c] ss:$16 sps:$4 sm:$0xff]   ;;  %v8581_v57 = vrot.slane %v8579_v46, 1 }
 0x573   : > { %9341 = vmatprep.subr.bf16.mxu1 %v13711_v58  ;;  %v8584_v58 = vrot.slane %v8582_v47, 2  ;;  %v13819_v46 = vld [vmem:[#allocation9 + $0xf4c] ss:$16 sps:$4 sm:$0xff]   ;;  %v13814_v47 = vld [vmem:[#allocation9 + $0xf40] ss:$16 sps:$4 sm:$0xff]  }
 0x575   : > { %9256 = vmatpush1.bf16.msra.mxu0 %v13706_v59  ;;  %v8534_v59 = vor.u32 %v8533_v45, %v8530_v15  ;;  %v13822_v15 = vld [vmem:[#allocation9 + $0xf64] ss:$16 sps:$4 sm:$0xff]   ;;  %v13825_v45 = vld [vmem:[#allocation9 + $0xf6c] ss:$16 sps:$4 sm:$0xff]  }
 0x576   : > { %9342 = vmatpush1.bf16.msra.mxu1 %v13709_v60  ;;  %9257 = vmatprep.subr.bf16.mxu0 %v13714_v0  ;;  %v13754_v60 = vld [vmem:[#allocation9 + $0xe00] ss:$16 sps:$4 sm:$0xff]   ;;  %v8593_v0 = vor.u32 %v8592_v50, %v8589_v49  ;;  %v13823_v50 = vld [vmem:[#allocation9 + $0xf68] ss:$16 sps:$4 sm:$0xff]  }
 0x577   : > { %9343 = vmatprep.subr.bf16.mxu1 %v13717_v1  ;;  %v13757_v1 = vld [vmem:[#allocation9 + $0xe08] ss:$16 sps:$4 sm:$0xff]   ;;  %v13820_v49 = vld [vmem:[#allocation9 + $0xf60] ss:$16 sps:$4 sm:$0xff]  }
 0x579   : > { %9258 = vmatpush1.bf16.msra.mxu0 %v13712_v2  ;;  %v8543_v2 = vsel %vm3467_vm3, %v8534_v59, %v8542_v54  ;;  %v8388_v54 = vld [vmem:[#allocation3 + $0x50] sm:$0x7]  ;;  %v8384_v59 = vld [vmem:[#allocation3 + $0x10] sm:$0xf8] }
 0x57a   : > { %9344 = vmatpush1.bf16.msra.mxu1 %v13715_v3  ;;  %9259 = vmatprep.subr.bf16.mxu0 %v13720_v4  ;;  %v8585_v3 = vor.u32 %v8584_v58, %v8581_v57  ;;  %v13762_v4 = vld [vmem:[#allocation9 + $0xe24] ss:$16 sps:$4 sm:$0xff]   ;;  %v13829_v57 = vld [vmem:[#allocation9 + $0xf88] ss:$16 sps:$4 sm:$0xff]  }
 0x57b   : > { %9345 = vmatprep.subr.bf16.mxu1 %v13723_v5  ;;  %v13765_v5 = vld [vmem:[#allocation9 + $0xe2c] ss:$16 sps:$4 sm:$0xff]   ;;  %v13834_v58 = vld [vmem:[#allocation9 + $0xfa4] ss:$16 sps:$4 sm:$0xff]  }
 0x57d   : > { %9260 = vmatpush1.bf16.msra.mxu0 %v13718_v6  ;;  %v8594_v6 = vsel %vm3467_vm3, %v8585_v3, %v8593_v0  ;;  %v8396_v0 = vpack.c.bf16 %v8388_v54, %v8388_v54  ;;  %v13835_v3 = vld [vmem:[#allocation9 + $0xfa8] ss:$16 sps:$4 sm:$0xff]  }
 0x57e   : > { %9346 = vmatpush1.bf16.msra.mxu1 %v13721_v9  ;;  %9261 = vmatprep.subr.bf16.mxu0 %v13726_v10  ;;  %v13760_v9 = vld [vmem:[#allocation9 + $0xe20] ss:$16 sps:$4 sm:$0xff]   ;;  %v13763_v10 = vld [vmem:[#allocation9 + $0xe28] ss:$16 sps:$4 sm:$0xff]  }
 0x57f   : > { %9347 = vmatprep.subr.bf16.mxu1 %v13729_v11  ;;  %v13768_v11 = vld [vmem:[#allocation9 + $0xe44] ss:$16 sps:$4 sm:$0xff]   ;;  %v13883_v54 = vld [vmem:[#allocation9 + $0x10a8] ss:$16 sps:$4 sm:$0xff]  }
 0x581   : > { %9262 = vmatpush1.bf16.msra.mxu0 %v13724_v13  ;;  %v13771_v13 = vld [vmem:[#allocation9 + $0xe4c] ss:$16 sps:$4 sm:$0xff]  }
 0x582   : > { %9348 = vmatpush1.bf16.msra.mxu1 %v13727_v14  ;;  %9263 = vmatprep.subr.bf16.mxu0 %v13732_v29  ;;  %v13766_v14 = vld [vmem:[#allocation9 + $0xe40] ss:$16 sps:$4 sm:$0xff]   ;;  %v13769_v29 = vld [vmem:[#allocation9 + $0xe48] ss:$16 sps:$4 sm:$0xff]  }
 0x583   : > { %9349 = vmatprep.subr.bf16.mxu1 %v13735_v16  ;;  %v13774_v16 = vld [vmem:[#allocation9 + $0xe64] ss:$16 sps:$4 sm:$0xff]  }
 0x585   : > { %9264 = vmatpush1.bf16.msra.mxu0 %v13730_v18  ;;  %v13772_v18 = vld [vmem:[#allocation9 + $0xe60] ss:$16 sps:$4 sm:$0xff]  }
 0x586   : > { %9350 = vmatpush1.bf16.msra.mxu1 %v13733_v55  ;;  %9265 = vmatprep.subr.bf16.mxu0 %v13738_v25  ;;  %v13780_v55 = vld [vmem:[#allocation9 + $0xe84] ss:$16 sps:$4 sm:$0xff]   ;;  %v13783_v25 = vld [vmem:[#allocation9 + $0xe8c] ss:$16 sps:$4 sm:$0xff]  }
 0x587   : > { %9351 = vmatprep.subr.bf16.mxu1 %v13741_v61  ;;  %v13781_v61 = vld [vmem:[#allocation9 + $0xe88] ss:$16 sps:$4 sm:$0xff]  }
 0x589   : > { %9266 = vmatpush1.bf16.msra.mxu0 %v13736_v63  ;;  %v13784_v63 = vld [vmem:[#allocation9 + $0xea0] ss:$16 sps:$4 sm:$0xff]  }
 0x58a   : > { %9352 = vmatpush1.bf16.msra.mxu1 %v13739_v32  ;;  %9267 = vmatprep.subr.bf16.mxu0 %v13744_v33  ;;  %v13795_v32 = vld [vmem:[#allocation9 + $0xecc] ss:$16 sps:$4 sm:$0xff]   ;;  %v13790_v33 = vld [vmem:[#allocation9 + $0xec0] ss:$16 sps:$4 sm:$0xff]  }
 0x58b   : > { %9353 = vmatprep.subr.bf16.mxu1 %v13747_v34  ;;  %v13793_v34 = vld [vmem:[#allocation9 + $0xec8] ss:$16 sps:$4 sm:$0xff]  }
 0x58d   : > { %9268 = vmatpush1.bf16.msra.mxu0 %v13742_v37  ;;  %v13799_v37 = vld [vmem:[#allocation9 + $0xee8] ss:$16 sps:$4 sm:$0xff]  }
 0x58e   : > { %9354 = vmatpush1.bf16.msra.mxu1 %v13745_v39  ;;  %9269 = vmatprep.subr.bf16.mxu0 %v13750_v41  ;;  %v13810_v39 = vld [vmem:[#allocation9 + $0xf24] ss:$16 sps:$4 sm:$0xff]   ;;  %v13813_v41 = vld [vmem:[#allocation9 + $0xf2c] ss:$16 sps:$4 sm:$0xff]  }
 0x58f   : > { %9355 = vmatprep.subr.bf16.mxu1 %v13753_v42  ;;  %v13808_v42 = vld [vmem:[#allocation9 + $0xf20] ss:$16 sps:$4 sm:$0xff]  }
 0x591   : > { %9270 = vmatpush1.bf16.msra.mxu0 %v13748_v48  ;;  %v13817_v48 = vld [vmem:[#allocation9 + $0xf48] ss:$16 sps:$4 sm:$0xff]  }
 0x592   : > { %9356 = vmatpush1.bf16.msra.mxu1 %v13751_v51  ;;  %9282 = vmatprep.subr.bf16.mxu0 %v13756_v52  ;;  %v13828_v51 = vld [vmem:[#allocation9 + $0xf84] ss:$16 sps:$4 sm:$0xff]   ;;  %v13831_v52 = vld [vmem:[#allocation9 + $0xf8c] ss:$16 sps:$4 sm:$0xff]  }
 0x593   : > { %9368 = vmatprep.subr.bf16.mxu1 %v13759_v56  ;;  %v13826_v56 = vld [vmem:[#allocation9 + $0xf80] ss:$16 sps:$4 sm:$0xff]  }
 0x594   : > { %9272 = vmatmul.mubr.bf16.vlgmr.msra.gmra.mrb[4].mxu0 %v8543_v2 }
 0x595   : > { %9358 = vmatmul.mubr.bf16.vlgmr.msra.gmra.mrb[4].mxu1 %v8543_v2  ;;  %9283 = vmatpush1.bf16.msra.mxu0 %v13754_v60  ;;  %v13837_v60 = vld [vmem:[#allocation9 + $0xfac] ss:$16 sps:$4 sm:$0xff]   ;;  %v8392_v2 = vpack.c.bf16 %v14677_v8, %v8384_v59  ;;  %v13889_v59 = vld [vmem:[#allocation9 + $0x10c8] ss:$16 sps:$4 sm:$0xff]  }
 0x596   : > { %9314 = vmatprep.mubr.bf16.mxu0 %v8594_v6  ;;  %9369 = vmatpush1.bf16.msra.mxu1 %v13757_v1  ;;  %v13832_v1 = vld [vmem:[#allocation9 + $0xfa0] ss:$16 sps:$4 sm:$0xff]  }
 0x597   : > { %9400 = vmatprep.mubr.bf16.mxu1 %v8594_v6  ;;  %9284 = vmatprep.subr.bf16.mxu0 %v13762_v4  ;;  %v13840_v4 = vld [vmem:[#allocation9 + $0xfc4] ss:$16 sps:$4 sm:$0xff]   ;;  %v8570_v6 = vshrl.u32 %v8396_v0, 16 }
 0x598   : > { %9370 = vmatprep.subr.bf16.mxu1 %v13765_v5  ;;  %v13843_v5 = vld [vmem:[#allocation9 + $0xfcc] ss:$16 sps:$4 sm:$0xff]  }
 0x599   : > { %9285 = vmatpush1.bf16.msra.mxu0 %v13760_v9  ;;  %v8573_v9 = vshll.u32 %v8396_v0, 16  ;;  %v8572_v8 = vrot.slane %v8570_v6, 1  ;;  %v13897_v0 = vld [vmem:[#allocation9 + $0x10ec] ss:$16 sps:$4 sm:$0xff]   ;;  %v13901_v6 = vld [vmem:[#allocation9 + $0x1108] ss:$16 sps:$4 sm:$0xff]  }
 0x59a   : > { %9371 = vmatpush1.bf16.msra.mxu1 %v13763_v10  ;;  %9286 = vmatprep.subr.bf16.mxu0 %v13768_v11  ;;  %v13838_v10 = vld [vmem:[#allocation9 + $0xfc0] ss:$16 sps:$4 sm:$0xff]   ;;  %v8562_v11 = vshrl.u32 %v8392_v2, 16 }
 0x59b   : > { %9372 = vmatprep.subr.bf16.mxu1 %v13771_v13  ;;  %v8565_v13 = vshll.u32 %v8392_v2, 16  ;;  %v13895_v2 = vld [vmem:[#allocation9 + $0x10e8] ss:$16 sps:$4 sm:$0xff]  }
 0x59d   : > { %9287 = vmatpush1.bf16.msra.mxu0 %v13766_v14  ;;  %v13841_v14 = vld [vmem:[#allocation9 + $0xfc8] ss:$16 sps:$4 sm:$0xff]  }
 0x59e   : > { %9373 = vmatpush1.bf16.msra.mxu1 %v13769_v29  ;;  %9288 = vmatprep.subr.bf16.mxu0 %v13774_v16  ;;  %v13846_v29 = vld [vmem:[#allocation9 + $0xfe4] ss:$16 sps:$4 sm:$0xff]   ;;  %v9424_v16 = vld [vmem:[#allocation3 + $0x48] sm:$0xf] }
 0x59f   : > { %9374 = vmatprep.subr.bf16.mxu1 %v13777_v17  ;;  %v13849_v17 = vld [vmem:[#allocation9 + $0xfec] ss:$16 sps:$4 sm:$0xff]  }
 0x5a1   : > { %9289 = vmatpush1.bf16.msra.mxu0 %v13772_v18  ;;  %v8575_v18 = vrot.slane %v8573_v9, 2  ;;  %v13906_v9 = vld [vmem:[#allocation9 + $0x1124] ss:$16 sps:$4 sm:$0xff]  }
 0x5a2   : > { %9375 = vmatpush1.bf16.msra.mxu1 %v13775_v19  ;;  %9290 = vmatprep.subr.bf16.mxu0 %v13780_v55  ;;  %v9420_v19 = vld [vmem:[#allocation3 + $0x8] sm:$0xf0]  ;;  %v13844_v55 = vld [vmem:[#allocation9 + $0xfe0] ss:$16 sps:$4 sm:$0xff]  }
 0x5a3   : > { %9376 = vmatprep.subr.bf16.mxu1 %v13783_v25  ;;  %v8564_v25 = vrot.slane %v8562_v11, 1  ;;  %v13904_v11 = vld [vmem:[#allocation9 + $0x1120] ss:$16 sps:$4 sm:$0xff]  }
 0x5a5   : > { %9291 = vmatpush1.bf16.msra.mxu0 %v13778_v26  ;;  %v8567_v26 = vrot.slane %v8565_v13, 2  ;;  %v13907_v13 = vld [vmem:[#allocation9 + $0x1128] ss:$16 sps:$4 sm:$0xff]  }
 0x5a6   : > { %9377 = vmatpush1.bf16.msra.mxu1 %v13781_v61  ;;  %9292 = vmatprep.subr.bf16.mxu0 %v13786_v27  ;;  %v9432_v61 = vpack.c.bf16 %v9424_v16, %v9424_v16  ;;  %v13847_v27 = vld [vmem:[#allocation9 + $0xfe8] ss:$16 sps:$4 sm:$0xff]   ;;  %v13910_v16 = vld [vmem:[#allocation9 + $0x1140] ss:$16 sps:$4 sm:$0xff]  }
 0x5a7   : > { %9378 = vmatprep.subr.bf16.mxu1 %v13789_v28  ;;  %v13852_v28 = vld [vmem:[#allocation9 + $0x1004] ss:$16 sps:$4 sm:$0xff]  }
 0x5a9   : > { %9293 = vmatpush1.bf16.msra.mxu0 %v13784_v63  ;;  %v8576_v63 = vor.u32 %v8575_v18, %v8572_v8  ;;  %v13918_v8 = vld [vmem:[#allocation9 + $0x1164] ss:$16 sps:$4 sm:$0xff]   ;;  %v13921_v18 = vld [vmem:[#allocation9 + $0x116c] ss:$16 sps:$4 sm:$0xff]  }
 0x5aa   : > { %9379 = vmatpush1.bf16.msra.mxu1 %v13787_v30  ;;  %9294 = vmatprep.subr.bf16.mxu0 %v13792_v31  ;;  %v13855_v30 = vld [vmem:[#allocation9 + $0x100c] ss:$16 sps:$4 sm:$0xff]   ;;  %v9428_v31 = vpack.c.bf16 %v14674_v53, %v9420_v19  ;;  %v13859_v53 = vld [vmem:[#allocation9 + $0x1028] ss:$16 sps:$4 sm:$0xff]   ;;  %v13916_v19 = vld [vmem:[#allocation9 + $0x1160] ss:$16 sps:$4 sm:$0xff]  }
 0x5ab   : > { %9380 = vmatprep.subr.bf16.mxu1 %v13795_v32  ;;  %v8568_v32 = vor.u32 %v8567_v26, %v8564_v25  ;;  %v13924_v25 = vld [vmem:[#allocation9 + $0x1184] ss:$16 sps:$4 sm:$0xff]   ;;  %v13927_v26 = vld [vmem:[#allocation9 + $0x118c] ss:$16 sps:$4 sm:$0xff]  }
 0x5ad   : > { %9295 = vmatpush1.bf16.msra.mxu0 %v13790_v33  ;;  %v13850_v33 = vld [vmem:[#allocation9 + $0x1000] ss:$16 sps:$4 sm:$0xff]  }
 0x5ae   : > { %9381 = vmatpush1.bf16.msra.mxu1 %v13793_v34  ;;  %9296 = vmatprep.subr.bf16.mxu0 %v13798_v35  ;;  %v9576_v34 = vrot.slane %v9432_v61, 2  ;;  %v13853_v35 = vld [vmem:[#allocation9 + $0x1008] ss:$16 sps:$4 sm:$0xff]   ;;  %v13922_v61 = vld [vmem:[#allocation9 + $0x1180] ss:$16 sps:$4 sm:$0xff]  }
 0x5af   : > { %9382 = vmatprep.subr.bf16.mxu1 %v13801_v12  ;;  %v8577_v12 = vsel %vm3467_vm3, %v8568_v32, %v8576_v63  ;;  %v13933_v63 = vld [vmem:[#allocation9 + $0x11ac] ss:$16 sps:$4 sm:$0xff]   ;;  %v13936_v32 = vld [vmem:[#allocation9 + $0x11c4] ss:$16 sps:$4 sm:$0xff]  }
 0x5b1   : > { %9297 = vmatpush1.bf16.msra.mxu0 %v13796_v36  ;;  %v9575_v36 = vrot.slane %v9428_v31, 2  ;;  %v13931_v31 = vld [vmem:[#allocation9 + $0x11a8] ss:$16 sps:$4 sm:$0xff]  }
 0x5b2   : > { %9383 = vmatpush1.bf16.msra.mxu1 %v13799_v37  ;;  %9298 = vmatprep.subr.bf16.mxu0 %v13804_v62  ;;  %v13858_v37 = vld [vmem:[#allocation9 + $0x1024] ss:$16 sps:$4 sm:$0xff]   ;;  %v13861_v62 = vld [vmem:[#allocation9 + $0x102c] ss:$16 sps:$4 sm:$0xff]  }
 0x5b3   : > { %9384 = vmatprep.subr.bf16.mxu1 %v13807_v38  ;;  %v9577_v38 = vsel %vm4513_vm4, %v9575_v36, %v9576_v34  ;;  %v9423_v34 = vld [vmem:[#allocation3 + $0x40] sm:$0xf]  ;;  %v13937_v36 = vld [vmem:[#allocation9 + $0x11c8] ss:$16 sps:$4 sm:$0xff]  }
 0x5b5   : > { %9299 = vmatpush1.bf16.msra.mxu0 %v13802_v22  ;;  %v13856_v22 = vld [vmem:[#allocation9 + $0x1020] ss:$16 sps:$4 sm:$0xff]  }
 0x5b6   : > { %9385 = vmatpush1.bf16.msra.mxu1 %v13805_v40  ;;  %9300 = vmatprep.subr.bf16.mxu0 %v13810_v39  ;;  %v13864_v40 = vld [vmem:[#allocation9 + $0x1044] ss:$16 sps:$4 sm:$0xff]   ;;  %v13867_v39 = vld [vmem:[#allocation9 + $0x104c] ss:$16 sps:$4 sm:$0xff]  }
 0x5b7   : > { %9386 = vmatprep.subr.bf16.mxu1 %v13813_v41  ;;  %v13862_v41 = vld [vmem:[#allocation9 + $0x1040] ss:$16 sps:$4 sm:$0xff]  }
 0x5b9   : > { %9301 = vmatpush1.bf16.msra.mxu0 %v13808_v42  ;;  %v13865_v42 = vld [vmem:[#allocation9 + $0x1048] ss:$16 sps:$4 sm:$0xff]  }
 0x5ba   : > { %9387 = vmatpush1.bf16.msra.mxu1 %v13811_v43  ;;  %9302 = vmatprep.subr.bf16.mxu0 %v13816_v44  ;;  %v13870_v43 = vld [vmem:[#allocation9 + $0x1064] ss:$16 sps:$4 sm:$0xff]   ;;  %v13873_v44 = vld [vmem:[#allocation9 + $0x106c] ss:$16 sps:$4 sm:$0xff]  }
 0x5bb   : > { %9388 = vmatprep.subr.bf16.mxu1 %v13819_v46  ;;  %v13868_v46 = vld [vmem:[#allocation9 + $0x1060] ss:$16 sps:$4 sm:$0xff]  }
 0x5bd   : > { %9303 = vmatpush1.bf16.msra.mxu0 %v13814_v47  ;;  %v13871_v47 = vld [vmem:[#allocation9 + $0x1068] ss:$16 sps:$4 sm:$0xff]  }
 0x5be   : > { %9389 = vmatpush1.bf16.msra.mxu1 %v13817_v48  ;;  %9304 = vmatprep.subr.bf16.mxu0 %v13822_v15  ;;  %v13876_v48 = vld [vmem:[#allocation9 + $0x1084] ss:$16 sps:$4 sm:$0xff]   ;;  %v13879_v15 = vld [vmem:[#allocation9 + $0x108c] ss:$16 sps:$4 sm:$0xff]  }
 0x5bf   : > { %9390 = vmatprep.subr.bf16.mxu1 %v13825_v45  ;;  %v13874_v45 = vld [vmem:[#allocation9 + $0x1080] ss:$16 sps:$4 sm:$0xff]  }
 0x5c1   : > { %9305 = vmatpush1.bf16.msra.mxu0 %v13820_v49  ;;  %v13877_v49 = vld [vmem:[#allocation9 + $0x1088] ss:$16 sps:$4 sm:$0xff]  }
 0x5c2   : > { %9391 = vmatpush1.bf16.msra.mxu1 %v13823_v50  ;;  %9306 = vmatprep.subr.bf16.mxu0 %v13828_v51  ;;  %v13882_v50 = vld [vmem:[#allocation9 + $0x10a4] ss:$16 sps:$4 sm:$0xff]   ;;  %v13885_v51 = vld [vmem:[#allocation9 + $0x10ac] ss:$16 sps:$4 sm:$0xff]  }
 0x5c3   : > { %9392 = vmatprep.subr.bf16.mxu1 %v13831_v52  ;;  %v13880_v52 = vld [vmem:[#allocation9 + $0x10a0] ss:$16 sps:$4 sm:$0xff]  }
 0x5c5   : > { %9307 = vmatpush1.bf16.msra.mxu0 %v13826_v56  ;;  %v13888_v56 = vld [vmem:[#allocation9 + $0x10c4] ss:$16 sps:$4 sm:$0xff]  }
 0x5c6   : > { %9393 = vmatpush1.bf16.msra.mxu1 %v13829_v57  ;;  %9308 = vmatprep.subr.bf16.mxu0 %v13834_v58  ;;  %v13891_v57 = vld [vmem:[#allocation9 + $0x10cc] ss:$16 sps:$4 sm:$0xff]   ;;  %v13886_v58 = vld [vmem:[#allocation9 + $0x10c0] ss:$16 sps:$4 sm:$0xff]  }
 0x5c7   : > { %9394 = vmatprep.subr.bf16.mxu1 %v13837_v60  ;;  %v13894_v60 = vld [vmem:[#allocation9 + $0x10e4] ss:$16 sps:$4 sm:$0xff]  }
 0x5c9   : > { %9309 = vmatpush1.bf16.msra.mxu0 %v13832_v1  ;;  %v13892_v1 = vld [vmem:[#allocation9 + $0x10e0] ss:$16 sps:$4 sm:$0xff]  }
 0x5ca   : > { %9395 = vmatpush1.bf16.msra.mxu1 %v13835_v3  ;;  %9310 = vmatprep.subr.bf16.mxu0 %v13840_v4  ;;  %v13900_v3 = vld [vmem:[#allocation9 + $0x1104] ss:$16 sps:$4 sm:$0xff]   ;;  %v13903_v4 = vld [vmem:[#allocation9 + $0x110c] ss:$16 sps:$4 sm:$0xff]  }
 0x5cb   : > { %9396 = vmatprep.subr.bf16.mxu1 %v13843_v5  ;;  %v13898_v5 = vld [vmem:[#allocation9 + $0x1100] ss:$16 sps:$4 sm:$0xff]  }
 0x5cd   : > { %9311 = vmatpush1.bf16.msra.mxu0 %v13838_v10  ;;  %v13909_v10 = vld [vmem:[#allocation9 + $0x112c] ss:$16 sps:$4 sm:$0xff]  }
 0x5ce   : > { %9397 = vmatpush1.bf16.msra.mxu1 %v13841_v14  ;;  %9312 = vmatprep.subr.bf16.mxu0 %v13846_v29  ;;  %v13912_v14 = vld [vmem:[#allocation9 + $0x1144] ss:$16 sps:$4 sm:$0xff]   ;;  %v13915_v29 = vld [vmem:[#allocation9 + $0x114c] ss:$16 sps:$4 sm:$0xff]  }
 0x5cf   : > { %9398 = vmatprep.subr.bf16.mxu1 %v13849_v17  ;;  %v13913_v17 = vld [vmem:[#allocation9 + $0x1148] ss:$16 sps:$4 sm:$0xff]  }
 0x5d1   : > { %9313 = vmatpush1.bf16.msra.mxu0 %v13844_v55  ;;  %v13919_v55 = vld [vmem:[#allocation9 + $0x1168] ss:$16 sps:$4 sm:$0xff]  }
 0x5d2   : > { %9399 = vmatpush1.bf16.msra.mxu1 %v13847_v27  ;;  %10228 = vmatprep.subr.bf16.mxu0 %v13852_v28  ;;  %v13925_v27 = vld [vmem:[#allocation9 + $0x1188] ss:$16 sps:$4 sm:$0xff]   ;;  %v13930_v28 = vld [vmem:[#allocation9 + $0x11a4] ss:$16 sps:$4 sm:$0xff]  }
 0x5d3   : > { %10314 = vmatprep.subr.bf16.mxu1 %v13855_v30  ;;  %v13928_v30 = vld [vmem:[#allocation9 + $0x11a0] ss:$16 sps:$4 sm:$0xff]  }
 0x5d4   : > { %9315 = vmatmul.mubr.bf16.vlgmr.msra.gmra.mrb[4].mxu0 %v8577_v12 }
 0x5d5   : > { %9401 = vmatmul.mubr.bf16.vlgmr.msra.gmra.mrb[4].mxu1 %v8577_v12  ;;  %10229 = vmatpush1.bf16.msra.mxu0 %v13850_v33  ;;  %v13939_v33 = vld [vmem:[#allocation9 + $0x11cc] ss:$16 sps:$4 sm:$0xff]   ;;  %v9419_v12 = vld [vmem:[#allocation3] sm:$0xf0] }
 0x5d6   : > { %10260 = vmatprep.mubr.bf16.mxu0 %v9577_v38  ;;  %10315 = vmatpush1.bf16.msra.mxu1 %v13853_v35  ;;  %v13934_v35 = vld [vmem:[#allocation9 + $0x11c0] ss:$16 sps:$4 sm:$0xff]  }
 0x5d7   : > { %10346 = vmatprep.mubr.bf16.mxu1 %v9577_v38  ;;  %10230 = vmatprep.subr.bf16.mxu0 %v13858_v37  ;;  %v13942_v37 = vld [vmem:[#allocation9 + $0x11e4] ss:$16 sps:$4 sm:$0xff]   ;;  %v13945_v38 = vld [vmem:[#allocation9 + $0x11ec] ss:$16 sps:$4 sm:$0xff]  }
 0x5d8   : > { %10316 = vmatprep.subr.bf16.mxu1 %v13861_v62  ;;  %v9426_v62 = vld [vmem:[#allocation3 + $0x58] sm:$0xf] }
 0x5d9   : > { %10231 = vmatpush1.bf16.msra.mxu0 %v13856_v22  ;;  %v9431_v22 = vpack.c.bf16 %v9423_v34, %v9423_v34  ;;  %v14005_v34 = vld [vmem:[#allocation9 + $0x132c] ss:$16 sps:$4 sm:$0xff]  }
 0x5da   : > { %10317 = vmatpush1.bf16.msra.mxu1 %v13859_v53  ;;  %10232 = vmatprep.subr.bf16.mxu0 %v13864_v40  ;;  %v9422_v53 = vld [vmem:[#allocation3 + $0x18] sm:$0xf0]  ;;  %v13940_v40 = vld [vmem:[#allocation9 + $0x11e0] ss:$16 sps:$4 sm:$0xff]  }
 0x5db   : > { %10318 = vmatprep.subr.bf16.mxu1 %v13867_v39  ;;  %v14056_v39 = vld [vmem:[#allocation3 + $0x20] sm:$0xff] }
 0x5dd   : > { %10233 = vmatpush1.bf16.msra.mxu0 %v13862_v41  ;;  %v9427_v41 = vpack.c.bf16 %v14056_v39, %v9419_v12  ;;  %v14003_v12 = vld [vmem:[#allocation9 + $0x1328] ss:$16 sps:$4 sm:$0xff]  }
 0x5de   : > { %10319 = vmatpush1.bf16.msra.mxu1 %v13865_v42  ;;  %10234 = vmatprep.subr.bf16.mxu0 %v13870_v43  ;;  %v9434_v42 = vpack.c.bf16 %v9426_v62, %v9426_v62  ;;  %v13943_v43 = vld [vmem:[#allocation9 + $0x11e8] ss:$16 sps:$4 sm:$0xff]   ;;  %v14006_v62 = vld [vmem:[#allocation9 + $0x1340] ss:$16 sps:$4 sm:$0xff]  }
 0x5df   : > { %10320 = vmatprep.subr.bf16.mxu1 %v13873_v44  ;;  %v13948_v44 = vld [vmem:[#allocation9 + $0x1204] ss:$16 sps:$4 sm:$0xff]   ;;  %v14015_v39 = vld [vmem:[#allocation9 + $0x1368] ss:$16 sps:$4 sm:$0xff]  }
 0x5e1   : > { %10235 = vmatpush1.bf16.msra.mxu0 %v13868_v46  ;;  %v9573_v46 = vrot.slane %v9431_v22, 2  ;;  %v14014_v22 = vld [vmem:[#allocation9 + $0x1364] ss:$16 sps:$4 sm:$0xff]  }
 0x5e2   : > { %10321 = vmatpush1.bf16.msra.mxu1 %v13871_v47  ;;  %10236 = vmatprep.subr.bf16.mxu0 %v13876_v48  ;;  %v13951_v47 = vld [vmem:[#allocation9 + $0x120c] ss:$16 sps:$4 sm:$0xff]  }
 0x5e3   : > { %10322 = vmatprep.subr.bf16.mxu1 %v13879_v15  ;;  %v14057_v48 = vld [vmem:[#allocation3 + $0x38] sm:$0xff] }
 0x5e4   : > { %v9430_v15 = vpack.c.bf16 %v14057_v48, %v9422_v53  ;;  %v14017_v53 = vld [vmem:[#allocation9 + $0x136c] ss:$16 sps:$4 sm:$0xff]   ;;  %v14024_v48 = vld [vmem:[#allocation9 + $0x13a0] ss:$16 sps:$4 sm:$0xff]  }
 0x5e5   : > { %10237 = vmatpush1.bf16.msra.mxu0 %v13874_v45  ;;  %v9572_v45 = vrot.slane %v9427_v41, 2  ;;  %v14020_v41 = vld [vmem:[#allocation9 + $0x1384] ss:$16 sps:$4 sm:$0xff]  }
 0x5e6   : > { %10323 = vmatpush1.bf16.msra.mxu1 %v13877_v49  ;;  %10238 = vmatprep.subr.bf16.mxu0 %v13882_v50  ;;  %v13946_v49 = vld [vmem:[#allocation9 + $0x1200] ss:$16 sps:$4 sm:$0xff]   ;;  %v9582_v50 = vrot.slane %v9434_v42, 2  ;;  %v14023_v42 = vld [vmem:[#allocation9 + $0x138c] ss:$16 sps:$4 sm:$0xff]  }
 0x5e7   : > { %10324 = vmatprep.subr.bf16.mxu1 %v13885_v51  ;;  %v13949_v51 = vld [vmem:[#allocation9 + $0x1208] ss:$16 sps:$4 sm:$0xff]  }
 0x5e9   : > { %10239 = vmatpush1.bf16.msra.mxu0 %v13880_v52  ;;  %v9574_v52 = vsel %vm4513_vm4, %v9572_v45, %v9573_v46  ;;  %v14026_v46 = vld [vmem:[#allocation9 + $0x13a4] ss:$16 sps:$4 sm:$0xff]  }
 0x5ea   : > { %10325 = vmatpush1.bf16.msra.mxu1 %v13883_v54  ;;  %10240 = vmatprep.subr.bf16.mxu0 %v13888_v56  ;;  %v9581_v54 = vrot.slane %v9430_v15, 2  ;;  %v13954_v56 = vld [vmem:[#allocation9 + $0x1224] ss:$16 sps:$4 sm:$0xff]   ;;  %v14027_v15 = vld [vmem:[#allocation9 + $0x13a8] ss:$16 sps:$4 sm:$0xff]  }
 0x5eb   : > { %10326 = vmatprep.subr.bf16.mxu1 %v13891_v57  ;;  %v13957_v57 = vld [vmem:[#allocation9 + $0x122c] ss:$16 sps:$4 sm:$0xff]   ;;  %v14032_v45 = vld [vmem:[#allocation9 + $0x13c4] ss:$16 sps:$4 sm:$0xff]  }
 0x5ed   : > { %10241 = vmatpush1.bf16.msra.mxu0 %v13886_v58  ;;  %v9583_v58 = vsel %vm4513_vm4, %v9581_v54, %v9582_v50  ;;  %v9425_v50 = vld [vmem:[#allocation3 + $0x50] sm:$0xf]  ;;  %v14038_v54 = vld [vmem:[#allocation9 + $0x13e4] ss:$16 sps:$4 sm:$0xff]  }
 0x5ee   : > { %10327 = vmatpush1.bf16.msra.mxu1 %v13889_v59  ;;  %10242 = vmatprep.subr.bf16.mxu0 %v13894_v60  ;;  %v13952_v59 = vld [vmem:[#allocation9 + $0x1220] ss:$16 sps:$4 sm:$0xff]   ;;  %v13955_v60 = vld [vmem:[#allocation9 + $0x1228] ss:$16 sps:$4 sm:$0xff]  }
 0x5ef   : > { %10328 = vmatprep.subr.bf16.mxu1 %v13897_v0  ;;  %v13960_v0 = vld [vmem:[#allocation9 + $0x1244] ss:$16 sps:$4 sm:$0xff]  }
 0x5f1   : > { %10243 = vmatpush1.bf16.msra.mxu0 %v13892_v1  ;;  %v13963_v1 = vld [vmem:[#allocation9 + $0x124c] ss:$16 sps:$4 sm:$0xff]  }
 0x5f2   : > { %10329 = vmatpush1.bf16.msra.mxu1 %v13895_v2  ;;  %10244 = vmatprep.subr.bf16.mxu0 %v13900_v3  ;;  %v13958_v2 = vld [vmem:[#allocation9 + $0x1240] ss:$16 sps:$4 sm:$0xff]   ;;  %v13961_v3 = vld [vmem:[#allocation9 + $0x1248] ss:$16 sps:$4 sm:$0xff]  }
 0x5f3   : > { %10330 = vmatprep.subr.bf16.mxu1 %v13903_v4  ;;  %v13966_v4 = vld [vmem:[#allocation9 + $0x1264] ss:$16 sps:$4 sm:$0xff]  }
 0x5f5   : > { %10245 = vmatpush1.bf16.msra.mxu0 %v13898_v5  ;;  %v13969_v5 = vld [vmem:[#allocation9 + $0x126c] ss:$16 sps:$4 sm:$0xff]  }
 0x5f6   : > { %10331 = vmatpush1.bf16.msra.mxu1 %v13901_v6  ;;  %10246 = vmatprep.subr.bf16.mxu0 %v13906_v9  ;;  %v13964_v6 = vld [vmem:[#allocation9 + $0x1260] ss:$16 sps:$4 sm:$0xff]   ;;  %v13967_v9 = vld [vmem:[#allocation9 + $0x1268] ss:$16 sps:$4 sm:$0xff]  }
 0x5f7   : > { %10332 = vmatprep.subr.bf16.mxu1 %v13909_v10  ;;  %v13972_v10 = vld [vmem:[#allocation9 + $0x1284] ss:$16 sps:$4 sm:$0xff]  }
 0x5f9   : > { %10247 = vmatpush1.bf16.msra.mxu0 %v13904_v11  ;;  %v13975_v11 = vld [vmem:[#allocation9 + $0x128c] ss:$16 sps:$4 sm:$0xff]  }
 0x5fa   : > { %10333 = vmatpush1.bf16.msra.mxu1 %v13907_v13  ;;  %10248 = vmatprep.subr.bf16.mxu0 %v13912_v14  ;;  %v13970_v13 = vld [vmem:[#allocation9 + $0x1280] ss:$16 sps:$4 sm:$0xff]   ;;  %v13973_v14 = vld [vmem:[#allocation9 + $0x1288] ss:$16 sps:$4 sm:$0xff]  }
 0x5fb   : > { %10334 = vmatprep.subr.bf16.mxu1 %v13915_v29  ;;  %v13978_v29 = vld [vmem:[#allocation9 + $0x12a4] ss:$16 sps:$4 sm:$0xff]  }
 0x5fd   : > { %10249 = vmatpush1.bf16.msra.mxu0 %v13910_v16  ;;  %v13981_v16 = vld [vmem:[#allocation9 + $0x12ac] ss:$16 sps:$4 sm:$0xff]  }
 0x5fe   : > { %10335 = vmatpush1.bf16.msra.mxu1 %v13913_v17  ;;  %10250 = vmatprep.subr.bf16.mxu0 %v13918_v8  ;;  %v13976_v17 = vld [vmem:[#allocation9 + $0x12a0] ss:$16 sps:$4 sm:$0xff]   ;;  %v13979_v8 = vld [vmem:[#allocation9 + $0x12a8] ss:$16 sps:$4 sm:$0xff]  }
 0x5ff   : > { %10336 = vmatprep.subr.bf16.mxu1 %v13921_v18  ;;  %v13984_v18 = vld [vmem:[#allocation9 + $0x12c4] ss:$16 sps:$4 sm:$0xff]  }
 0x601   : > { %10251 = vmatpush1.bf16.msra.mxu0 %v13916_v19  ;;  %v13987_v19 = vld [vmem:[#allocation9 + $0x12cc] ss:$16 sps:$4 sm:$0xff]  }
 0x602   : > { %10337 = vmatpush1.bf16.msra.mxu1 %v13919_v55  ;;  %10252 = vmatprep.subr.bf16.mxu0 %v13924_v25  ;;  %v13982_v55 = vld [vmem:[#allocation9 + $0x12c0] ss:$16 sps:$4 sm:$0xff]   ;;  %v13985_v25 = vld [vmem:[#allocation9 + $0x12c8] ss:$16 sps:$4 sm:$0xff]  }
 0x603   : > { %10338 = vmatprep.subr.bf16.mxu1 %v13927_v26  ;;  %v13990_v26 = vld [vmem:[#allocation9 + $0x12e4] ss:$16 sps:$4 sm:$0xff]  }
 0x605   : > { %10253 = vmatpush1.bf16.msra.mxu0 %v13922_v61  ;;  %v13993_v61 = vld [vmem:[#allocation9 + $0x12ec] ss:$16 sps:$4 sm:$0xff]  }
 0x606   : > { %10339 = vmatpush1.bf16.msra.mxu1 %v13925_v27  ;;  %10254 = vmatprep.subr.bf16.mxu0 %v13930_v28  ;;  %v13988_v27 = vld [vmem:[#allocation9 + $0x12e0] ss:$16 sps:$4 sm:$0xff]   ;;  %v13991_v28 = vld [vmem:[#allocation9 + $0x12e8] ss:$16 sps:$4 sm:$0xff]  }
 0x607   : > { %10340 = vmatprep.subr.bf16.mxu1 %v13933_v63  ;;  %v13996_v63 = vld [vmem:[#allocation9 + $0x1304] ss:$16 sps:$4 sm:$0xff]  }
 0x609   : > { %10255 = vmatpush1.bf16.msra.mxu0 %v13928_v30  ;;  %v13999_v30 = vld [vmem:[#allocation9 + $0x130c] ss:$16 sps:$4 sm:$0xff]  }
 0x60a   : > { %10341 = vmatpush1.bf16.msra.mxu1 %v13931_v31  ;;  %10256 = vmatprep.subr.bf16.mxu0 %v13936_v32  ;;  %v13994_v31 = vld [vmem:[#allocation9 + $0x1300] ss:$16 sps:$4 sm:$0xff]   ;;  %v13997_v32 = vld [vmem:[#allocation9 + $0x1308] ss:$16 sps:$4 sm:$0xff]  }
 0x60b   : > { %10342 = vmatprep.subr.bf16.mxu1 %v13939_v33  ;;  %v14002_v33 = vld [vmem:[#allocation9 + $0x1324] ss:$16 sps:$4 sm:$0xff]  }
 0x60d   : > { %10257 = vmatpush1.bf16.msra.mxu0 %v13934_v35  ;;  %v14000_v35 = vld [vmem:[#allocation9 + $0x1320] ss:$16 sps:$4 sm:$0xff]  }
 0x60e   : > { %10343 = vmatpush1.bf16.msra.mxu1 %v13937_v36  ;;  %10258 = vmatprep.subr.bf16.mxu0 %v13942_v37  ;;  %v14008_v36 = vld [vmem:[#allocation9 + $0x1344] ss:$16 sps:$4 sm:$0xff]   ;;  %v14011_v37 = vld [vmem:[#allocation9 + $0x134c] ss:$16 sps:$4 sm:$0xff]  }
 0x60f   : > { %10344 = vmatprep.subr.bf16.mxu1 %v13945_v38  ;;  %v14009_v38 = vld [vmem:[#allocation9 + $0x1348] ss:$16 sps:$4 sm:$0xff]  }
 0x611   : > { %10259 = vmatpush1.bf16.msra.mxu0 %v13940_v40  ;;  %v14012_v40 = vld [vmem:[#allocation9 + $0x1360] ss:$16 sps:$4 sm:$0xff]  }
 0x612   : > { %10345 = vmatpush1.bf16.msra.mxu1 %v13943_v43  ;;  %10271 = vmatprep.subr.bf16.mxu0 %v13948_v44  ;;  %v14018_v43 = vld [vmem:[#allocation9 + $0x1380] ss:$16 sps:$4 sm:$0xff]   ;;  %v14021_v44 = vld [vmem:[#allocation9 + $0x1388] ss:$16 sps:$4 sm:$0xff]  }
 0x613   : > { %10357 = vmatprep.subr.bf16.mxu1 %v13951_v47  ;;  %v14029_v47 = vld [vmem:[#allocation9 + $0x13ac] ss:$16 sps:$4 sm:$0xff]  }
 0x614   : > { %10261 = vmatmul.mubr.bf16.vlgmr.msra.gmra.mrb[4].mxu0 %v9574_v52 }
 0x615   : > { %10347 = vmatmul.mubr.bf16.vlgmr.msra.gmra.mrb[4].mxu1 %v9574_v52  ;;  %10272 = vmatpush1.bf16.msra.mxu0 %v13946_v49  ;;  %v14035_v49 = vld [vmem:[#allocation9 + $0x13cc] ss:$16 sps:$4 sm:$0xff]   ;;  %v14033_v52 = vld [vmem:[#allocation9 + $0x13c8] ss:$16 sps:$4 sm:$0xff]  }
 0x616   : > { %10303 = vmatprep.mubr.bf16.mxu0 %v9583_v58  ;;  %10358 = vmatpush1.bf16.msra.mxu1 %v13949_v51  ;;  %v14030_v51 = vld [vmem:[#allocation9 + $0x13c0] ss:$16 sps:$4 sm:$0xff]  }
 0x617   : > { %10389 = vmatprep.mubr.bf16.mxu1 %v9583_v58  ;;  %10273 = vmatprep.subr.bf16.mxu0 %v13954_v56  ;;  %v9421_v56 = vld [vmem:[#allocation3 + $0x10] sm:$0xf0]  ;;  %v9433_v58 = vpack.c.bf16 %v9425_v50, %v9425_v50 }
 0x618   : > { %10359 = vmatprep.subr.bf16.mxu1 %v13957_v57  ;;  %v14041_v57 = vld [vmem:[#allocation9 + $0x13ec] ss:$16 sps:$4 sm:$0xff]  }
 0x619   : > { %10274 = vmatpush1.bf16.msra.mxu0 %v13952_v59  ;;  %v14036_v59 = vld [vmem:[#allocation9 + $0x13e0] ss:$16 sps:$4 sm:$0xff]  }
 0x61a   : > { %10360 = vmatpush1.bf16.msra.mxu1 %v13955_v60  ;;  %10275 = vmatprep.subr.bf16.mxu0 %v13960_v0  ;;  %v14058_v60 = vld [vmem:[#allocation3 + $0x30] sm:$0xff] }
 0x61b   : > { %10361 = vmatprep.subr.bf16.mxu1 %v13963_v1  ;;  %v9429_v0 = vpack.c.bf16 %v14058_v60, %v9421_v56  ;;  %v14039_v1 = vld [vmem:[#allocation9 + $0x13e8] ss:$16 sps:$4 sm:$0xff]  }
 0x61d   : > { %10276 = vmatpush1.bf16.msra.mxu0 %v13958_v2  ;;  %v9579_v2 = vrot.slane %v9433_v58, 2 }
 0x61e   : > { %10362 = vmatpush1.bf16.msra.mxu1 %v13961_v3  ;;  %10277 = vmatprep.subr.bf16.mxu0 %v13966_v4  ;;  %v9578_v3 = vrot.slane %v9429_v0, 2 }
 0x61f   : > { %10363 = vmatprep.subr.bf16.mxu1 %v13969_v5  ;;  %v10416_v5 = vld [vmem:[#allocation12] sm:$0xf] }
 0x620   : > { %v9580_v4 = vsel %vm4513_vm4, %v9578_v3, %v9579_v2 }
 0x621   : > { %10278 = vmatpush1.bf16.msra.mxu0 %v13964_v6  ;;  %v10421_v6 = vrot.slane %v10416_v5, %v5354_v21 }
 0x622   : > { %10364 = vmatpush1.bf16.msra.mxu1 %v13967_v9  ;;  %10279 = vmatprep.subr.bf16.mxu0 %v13972_v10  ;;  %v10429_v10 = vrot.slane %v10416_v5, %v5362_v23 }
 0x623   : > { %10365 = vmatprep.subr.bf16.mxu1 %v13975_v11  ;;  %v10425_v11 = vrot.slane %v10416_v5, %v5358_v7  ;;  %v14062_v7 = vld [vmem:[%s14550_s30 + $0x18] sm:$0xff] }
 0x625   : > { %10280 = vmatpush1.bf16.msra.mxu0 %v13970_v13  ;;  %v14059_v13 = vld [vmem:[%s14550_s30] sm:$0xff] }
 0x626   : > { %10366 = vmatpush1.bf16.msra.mxu1 %v13973_v14  ;;  %10281 = vmatprep.subr.bf16.mxu0 %v13978_v29 }
 0x627   : > { %10367 = vmatprep.subr.bf16.mxu1 %v13981_v16 }
 0x629   : > { %10282 = vmatpush1.bf16.msra.mxu0 %v13976_v17  ;;  %v10433_v17 = vrot.slane %v10416_v5, %v5366_v24 }
 0x62a   : > { %10368 = vmatpush1.bf16.msra.mxu1 %v13979_v8  ;;  %10283 = vmatprep.subr.bf16.mxu0 %v13984_v18  ;;  %v14060_v8 = vld [vmem:[%s14550_s30 + $0x10] sm:$0xff]  ;;  %v14061_v18 = vld [vmem:[%s14550_s30 + $0x8] sm:$0xff] }
 0x62b   : > { %10369 = vmatprep.subr.bf16.mxu1 %v13987_v19 }
 0x62d   : > { %10284 = vmatpush1.bf16.msra.mxu0 %v13982_v55 }
 0x62e   : > { %10370 = vmatpush1.bf16.msra.mxu1 %v13985_v25  ;;  %10285 = vmatprep.subr.bf16.mxu0 %v13990_v26 }
 0x62f   : > { %10371 = vmatprep.subr.bf16.mxu1 %v13993_v61  ;;  %v14063_v61 = vld [vmem:[%s14550_s30 + $0x20] sm:$0xff] }
 0x631   : > { %10286 = vmatpush1.bf16.msra.mxu0 %v13988_v27 }
 0x632   : > { %10372 = vmatpush1.bf16.msra.mxu1 %v13991_v28  ;;  %10287 = vmatprep.subr.bf16.mxu0 %v13996_v63 }
 0x633   : > { %10373 = vmatprep.subr.bf16.mxu1 %v13999_v30  ;;  %v14064_v30 = vld [vmem:[%s14550_s30 + $0x30] sm:$0xff] }
 0x635   : > { %10288 = vmatpush1.bf16.msra.mxu0 %v13994_v31 }
 0x636   : > { %10374 = vmatpush1.bf16.msra.mxu1 %v13997_v32  ;;  %10289 = vmatprep.subr.bf16.mxu0 %v14002_v33  ;;  %v14065_v32 = vld [vmem:[%s14550_s30 + $0x28] sm:$0xff] }
 0x637   : > { %10375 = vmatprep.subr.bf16.mxu1 %v14005_v34 }
 0x639   : > { %10290 = vmatpush1.bf16.msra.mxu0 %v14000_v35 }
 0x63a   : > { %10376 = vmatpush1.bf16.msra.mxu1 %v14003_v12  ;;  %10291 = vmatprep.subr.bf16.mxu0 %v14008_v36  ;;  %v14066_v36 = vld [vmem:[%s14550_s30 + $0x38] sm:$0xff] }
 0x63b   : > { %10377 = vmatprep.subr.bf16.mxu1 %v14011_v37 }
 0x63d   : > { %10292 = vmatpush1.bf16.msra.mxu0 %v14006_v62 }
 0x63e   : > { %10378 = vmatpush1.bf16.msra.mxu1 %v14009_v38  ;;  %10293 = vmatprep.subr.bf16.mxu0 %v14014_v22 }
 0x63f   : > { %10379 = vmatprep.subr.bf16.mxu1 %v14017_v53 }
 0x641   : > { %10294 = vmatpush1.bf16.msra.mxu0 %v14012_v40 }
 0x642   : > { %10380 = vmatpush1.bf16.msra.mxu1 %v14015_v39  ;;  %10295 = vmatprep.subr.bf16.mxu0 %v14020_v41 }
 0x643   : > { %10381 = vmatprep.subr.bf16.mxu1 %v14023_v42 }
 0x645   : > { %10296 = vmatpush1.bf16.msra.mxu0 %v14018_v43 }
 0x646   : > { %10382 = vmatpush1.bf16.msra.mxu1 %v14021_v44  ;;  %10297 = vmatprep.subr.bf16.mxu0 %v14026_v46 }
 0x647   : > { %10383 = vmatprep.subr.bf16.mxu1 %v14029_v47 }
 0x649   : > { %10298 = vmatpush1.bf16.msra.mxu0 %v14024_v48 }
 0x64a   : > { %10384 = vmatpush1.bf16.msra.mxu1 %v14027_v15  ;;  %10299 = vmatprep.subr.bf16.mxu0 %v14032_v45 }
 0x64b   : > { %10385 = vmatprep.subr.bf16.mxu1 %v14035_v49 }
 0x64d   : > { %10300 = vmatpush1.bf16.msra.mxu0 %v14030_v51 }
 0x64e   : > { %10386 = vmatpush1.bf16.msra.mxu1 %v14033_v52  ;;  %10301 = vmatprep.subr.bf16.mxu0 %v14038_v54 }
 0x64f   : > { %10387 = vmatprep.subr.bf16.mxu1 %v14041_v57 }
 0x651   : > { %10302 = vmatpush1.bf16.msra.mxu0 %v14036_v59 }
 0x652   : > { %10388 = vmatpush1.bf16.msra.mxu1 %v14039_v1 }
 0x654   : > { %10304 = vmatmul.mubr.bf16.vlgmr.msra.gmra.mrb[4].mxu0 %v9580_v4 }
 0x655   : > { %10390 = vmatmul.mubr.bf16.vlgmr.msra.gmra.mrb[4].mxu1 %v9580_v4 }
 0x727   : > { %v10305_v9 = vpop.f32.mrb[4].mxu0 }
 0x728   : > { %v10408_v14 = vadd.f32 %v14059_v13, %v10305_v9  ;;  %v10391_v29 = vpop.f32.mrb[4].mxu1  ;;  %v10307_v16 = vpop.f32.mrb[5].mxu0 }
 0x729   : > { %v10410_v21 = vadd.f32 %v14060_v8, %v10391_v29  ;;  %v10409_v19 = vadd.f32 %v14061_v18, %v10307_v16  ;;  %v10393_v23 = vpop.f32.mrb[5].mxu1  ;;  %v10309_v55 = vpop.f32.mrb[6].mxu0 }
 0x72a   : > { %v10438_v25 = vadd.f32 %v10421_v6, %v10408_v14  ;;  %v10411_v26 = vadd.f32 %v14062_v7, %v10393_v23  ;;  %v10412_v27 = vadd.f32 %v14063_v61, %v10309_v55  ;;  %v10395_v28 = vpop.f32.mrb[6].mxu1  ;;  %v10311_v20 = vpop.f32.mrb[7].mxu0 }
 0x72b   : > { %v10440_v24 = vadd.f32 %v10429_v10, %v10410_v21  ;;  %v10439_v63 = vadd.f32 %v10425_v11, %v10409_v19  ;;  %v10414_v31 = vadd.f32 %v14064_v30, %v10395_v28  ;;  %v10413_v33 = vadd.f32 %v14065_v32, %v10311_v20  ;;  %v10397_v34 = vpop.f32.mrb[7].mxu1 }
 0x72c   : > { %10446 = vst [vmem:[%s14564_s26] sm:$0xff] %v10438_v25  ;;  %v10441_v35 = vadd.f32 %v10433_v17, %v10411_v26  ;;  %v10442_v12 = vadd.f32 %v10421_v6, %v10412_v27  ;;  %v10415_v37 = vadd.f32 %v14066_v36, %v10397_v34 }
 0x72d   : > { %10448 = vst [vmem:[%s14564_s26 + $0x10] sm:$0xff] %v10440_v24  ;;  %10447 = vst [vmem:[%s14564_s26 + $0x8] sm:$0xff] %v10439_v63  ;;  %v10444_v62 = vadd.f32 %v10429_v10, %v10414_v31  ;;  %v10443_v38 = vadd.f32 %v10425_v11, %v10413_v33 }
 0x72e   : > { %10449 = vst [vmem:[%s14564_s26 + $0x18] sm:$0xff] %v10441_v35  ;;  %10450 = vst [vmem:[%s14564_s26 + $0x20] sm:$0xff] %v10442_v12  ;;  %v10445_v22 = vadd.f32 %v10433_v17, %v10415_v37 }
 0x72f   : > { %10452 = vst [vmem:[%s14564_s26 + $0x30] sm:$0xff] %v10444_v62  ;;  %10451 = vst [vmem:[%s14564_s26 + $0x28] sm:$0xff] %v10443_v38 }
 0x730   : > { %10453 = vst [vmem:[%s14564_s26 + $0x38] sm:$0xff] %v10445_v22 }
 0x731   : > { %14222 = shalt.err (!%p14219_p10)
}
 0x732   : > { %s14223_s23 = scalar_lea.hbm %s14717_s15, 1024  ;;  %s14227_s7 = scalar_lea.hbm %s14773_s5, 2048 }
 0x733   : > { %p14224_p3 = scmp.ne.s32.totalorder %s14717_s15, %s14223_s23  ;;  %p14228_p9 = scmp.lt.u32.totalorder %s14717_s15, %s14773_s5 }
 0x734   : > { %p14229_p6 = scmp.lt.u32.totalorder %s14227_s7, %s14223_s23  ;;  %p14231_p5 = scmp.lt.u32.totalorder %s14223_s23, %s14717_s15 }
 0x735   : > { %p14225_p12 = pnand %p14224_p3, %p14494_p8 }
 0x736   : > { %p14230_p11 = por %p14229_p6, %p14228_p9 }
 0x737   : > { %p14226_p4 = pneg %p14225_p12 }
 0x738   : > { %p14232_p7 = por %p14231_p5, %p14230_p11 }
 0x73a   : > { %p14233_p13 = pnand %p14232_p7, %p14226_p4 }
 0x73c   : > { %14236 = shalt.err (!%p14233_p13)
}
 0x73d   : > { %s14296_s24 = smov 512   ;;  %s14297_s22 = smov 32  }
 0x73e   : > { %12046 = dma.vmem_to_hbm [thread:$0]  (%p14494_p8), %s14719_s11, 1024, %s14717_s15, %s10455_s8, %s14296_s24, %s14296_s24, %s14297_s22  }
 0x73f PF: > { %s10483_s13 = sand.u32 1, %s14271_s18   ;;  %p14792_p1 = scmp.ne.s32.totalorder %s14778_s25, 0 }
 0x740   : > { %p14793_p2 = scmp.ge.s32.totalorder %s14283_s21, 2  ;;  %s10484_s17 = scalar_lea.sflag [#allocation6], %s10483_s13 }
 0x742   : > { %p12066_p0 = pnand %p14793_p2, %p14792_p1 }
 0x744   : > { %14266 = dma.done.wait (!%p12066_p0), %s10484_s17, 1024  }
 0x745   : > { %14268 = vsyncadd (!%p12066_p0), %s10484_s17, 4294966272  ;;  %p20_p10 = scmp.ge.s32.totalorder %s14484_s14, 4   ;;  %s14794_s18 = smov %s14275_s19 }
 0x746   : > { %s14795_s19 = smov %s14279_s20  ;;  %s14796_s20 = smov %s14500_s28 }
 0x747   : > { %s14797_s21 = smov %s14484_s14  ;;  %22 = sbr.rel (!%p20_p10) target bundleno = 7 (0x7), region = 113 }
 0x74e   :  { %10489 = vsyncpa [#allocation5], 1 }
 0x74f   :  { %10491 = vsyncpa [#allocation5 + $0x1], 1 }
 0x750   :  { %10492 = vsyncpa [#allocation8], 1 }
 0x751   :  { %10493 = vsyncpa [#allocation11], 1 }
 0x752   :  { %10494 = vsyncpa [#allocation6], 1 }
 0x753   :  { %10496 = vsyncpa [#allocation6 + $0x1], 1 }

</bundles_post_ra>
